<compile_context>
chip_gen: v7x
topology: tpu7x:2x2x1
jax: 0.10.0
libtpu: 0.0.40
codegen_flags: <defaults>
</compile_context>

<pallas_src>
import functools

import numpy as np
import jax
import jax.numpy as jnp
from jax.experimental import pallas as pl
from jax.experimental.pallas import tpu as pltpu

NEG_SLOPE = 0.01   # default negative_slope of F.leaky_relu_ / nn.LeakyReLU


def _leaky(v):
    return jnp.where(v > 0, v, NEG_SLOPE * v)


# ---------------------------------------------------------------------------
# One fused Pallas kernel for the whole forward pass.
# ---------------------------------------------------------------------------
def actor_fused_kernel(src_ref, dstr_ref, dstc_ref, ewr_ref, ewc_ref, x_ref,
                       w1_ref, b1_ref, w2_ref, b2_ref,
                       wh0_ref, wx0_ref, b0_ref,
                       nm_ref, cmach_ref, rmod_ref, gsel_ref,
                       wm1_ref, bm1_ref, wm2_ref, bm2_ref,
                       wo_ref, bo_ref,
                       o_ref):
    f32 = jnp.float32
    n = x_ref.shape[0]          # num_nodes
    e = src_ref.shape[0]        # num_edges (without self loops)
    mk = wh0_ref.shape[1]       # machine_num * K
    k = b0_ref.shape[1]         # width of first MLP hidden layer

    # ---- normalized dense adjacency A_hat (gcn_norm) via one-hot MXU matmul ----
    # oh_dst_w[c, e'] = edge_weight[e'] if dst[e'] == c else 0
    lane_nodes = jax.lax.broadcasted_iota(jnp.int32, (n, e), 0)
    oh_dst_w = jnp.where(dstr_ref[...] == lane_nodes, ewr_ref[...], 0.0)     # [n, e]
    # oh_src[e', r] = 1 if src[e'] == r else 0
    row_nodes = jax.lax.broadcasted_iota(jnp.int32, (e, n), 1)
    oh_src = (src_ref[...] == row_nodes).astype(f32)                         # [e, n]
    # adj[c, r] = sum_e ew[e] * [dst==c] * [src==r]   (== the original scatter-add)
    adj = jnp.dot(oh_dst_w, oh_src, preferred_element_type=f32)              # [n, n]
    eye = (jax.lax.broadcasted_iota(jnp.int32, (n, n), 0)
           == jax.lax.broadcasted_iota(jnp.int32, (n, n), 1)).astype(f32)
    adj = adj + eye                                            # self loops, weight 1

    # Degree (same vector) in both layouts -> pure elementwise normalization,
    # no second [n,n]x[n,n] matmul on the serial dependency chain.
    deg_col = jnp.sum(oh_dst_w, axis=1, keepdims=True) + 1.0                 # [n, 1]
    oh_dst_w_t = jnp.where(dstc_ref[...] == row_nodes, ewc_ref[...], 0.0)    # [e, n]
    deg_row = jnp.sum(oh_dst_w_t, axis=0, keepdims=True) + 1.0               # [1, n]
    dinv_col = jnp.where(deg_col > 0.0, jax.lax.rsqrt(deg_col), 0.0)
    dinv_row = jnp.where(deg_row > 0.0, jax.lax.rsqrt(deg_row), 0.0)
    a_hat = dinv_col * adj * dinv_row                          # D^-1/2 (A+I) D^-1/2

    # ---- GCNConv 1 + leaky_relu ----
    x = x_ref[...]
    h = jnp.dot(a_hat, jnp.dot(x, w1_ref[...], preferred_element_type=f32),
                preferred_element_type=f32) + b1_ref[...]
    h = _leaky(h)
    # TODO(synk): F.dropout(p=0.5) is treated as eval-mode identity (inference
    #             kernel); training-mode random mask (pltpu.prng_*) omitted.

    # ---- GCNConv 2 + leaky_relu ----
    h = jnp.dot(a_hat, jnp.dot(h, w2_ref[...], preferred_element_type=f32),
                preferred_element_type=f32) + b2_ref[...]
    h = _leaky(h)

    # ---- FlattenMlp layer 0: the [N, H+F] -> [G, M*(H+F)] flatten is done on the
    # weight side (wide per-machine weights).  The x-part matmul depends only on the
    # input, so it sits off the critical adjacency->GCN chain.  mask / fold are
    # built in-kernel from tiny int32 vectors (no 200+ KiB of serial DMA), and the
    # selection is reassociated:  z = (gsel @ (p*mask)) @ fold  -> the wide fold
    # contraction (M*K deep) runs over G rows instead of N rows. ----
    p = (jnp.dot(h, wh0_ref[...], preferred_element_type=f32)
         + jnp.dot(x, wx0_ref[...], preferred_element_type=f32))             # [n, M*K]
    mask = (nm_ref[...] == cmach_ref[...]).astype(f32)                       # [n, M*K]
    zp = jnp.dot(gsel_ref[...], p * mask, preferred_element_type=f32)        # [G, M*K]
    fold = (rmod_ref[...] ==
            jax.lax.broadcasted_iota(jnp.int32, (mk, k), 1)).astype(f32)     # [M*K, K]
    z = jnp.dot(zp, fold, preferred_element_type=f32) + b0_ref[...]          # [G, K]
    z = _leaky(z)

    # ---- remaining MLP hidden layers + linear output ----
    z = _leaky(jnp.dot(z, wm1_ref[...], preferred_element_type=f32) + bm1_ref[...])
    z = _leaky(jnp.dot(z, wm2_ref[...], preferred_element_type=f32) + bm2_ref[...])
    z = jnp.dot(z, wo_ref[...], preferred_element_type=f32) + bo_ref[...]

    # ---- tanh * 40 + 50 ----
    o_ref[...] = jnp.tanh(z) * 40.0 + 50.0


# ---------------------------------------------------------------------------
# One-time (outside jit) restructuring of w_fc0 into weight-side-flatten form.
# ---------------------------------------------------------------------------
def prepare_actor_params(params, machine_num=22):
    hidden = params['w_conv1'].shape[1]
    fea_dim = params['w_conv1'].shape[0]
    k = params['w_fc0'].shape[1]
    # w_fc0[m*(H+F)+f, j] -> wide per-machine matrices for the h-part and x-part.
    w0r = params['w_fc0'].reshape(machine_num, hidden + fea_dim, k)
    wh0 = jnp.transpose(w0r[:, :hidden, :], (1, 0, 2)).reshape(hidden, machine_num * k)
    wx0 = jnp.transpose(w0r[:, hidden:, :], (1, 0, 2)).reshape(fea_dim, machine_num * k)
    prepared = {kk: v for kk, v in params.items() if kk != 'w_fc0'}
    prepared['wh0'] = jax.device_put(wh0)
    prepared['wx0'] = jax.device_put(wx0)
    return prepared


# ---------------------------------------------------------------------------
# Wrapper: tiny static index tables + single pallas_call.
# ---------------------------------------------------------------------------
@functools.partial(jax.jit, static_argnames=("machine_num",))
def actor_forward(prepared, x, edge_index, edge_weight, machine_num=22):
    n, fea_dim = x.shape
    assert n % machine_num == 0, "num_nodes must be a multiple of machine_num"
    num_graphs = n // machine_num
    hidden = prepared['w_conv1'].shape[1]
    k = prepared['b_fc0'].shape[1]
    mk = machine_num * k
    e = edge_index.shape[1]

    src_col = edge_index[0].astype(jnp.int32).reshape(e, 1)
    dst_row = edge_index[1].astype(jnp.int32).reshape(1, e)
    dst_col = edge_index[1].astype(jnp.int32).reshape(e, 1)
    ew_row = edge_weight.astype(jnp.float32).reshape(1, e)
    ew_col = edge_weight.astype(jnp.float32).reshape(e, 1)

    # Tiny int32 index tables (trace-time constants, a few KiB total) replacing the
    # former ~215 KiB mask/fold f32 inputs.
    nm = jnp.asarray((np.arange(n) % machine_num).astype(np.int32).reshape(n, 1))
    cmach = jnp.asarray((np.arange(mk) // k).astype(np.int32).reshape(1, mk))
    rmod = jnp.asarray((np.arange(mk) % k).astype(np.int32).reshape(mk, 1))
    gsel = jnp.asarray((np.arange(n)[None, :] // machine_num
                        == np.arange(num_graphs)[:, None]).astype(np.float32))

    inputs = (src_col, dst_row, dst_col, ew_row, ew_col, x,
              prepared['w_conv1'], prepared['b_conv1'],
              prepared['w_conv2'], prepared['b_conv2'],
              prepared['wh0'], prepared['wx0'], prepared['b_fc0'],
              nm, cmach, rmod, gsel,
              prepared['w_fc1'], prepared['b_fc1'],
              prepared['w_fc2'], prepared['b_fc2'],
              prepared['w_out'], prepared['b_out'])

    flops = 2 * (n * e * n                                     # adjacency build
                 + n * fea_dim * hidden + n * n * hidden       # GCN 1
                 + n * hidden * hidden + n * n * hidden        # GCN 2
                 + n * hidden * mk + n * fea_dim * mk          # MLP layer 0 (wide)
                 + num_graphs * n * mk + num_graphs * mk * k   # gsel + fold
                 + 2 * num_graphs * k * k + num_graphs * k)    # MLP layers 1,2,out
    bytes_accessed = (sum(int(np.prod(a.shape)) * a.dtype.itemsize for a in inputs)
                      + num_graphs * 4)
    cost = pl.CostEstimate(flops=flops, transcendentals=2 * n + num_graphs,
                           bytes_accessed=bytes_accessed)

    return pl.pallas_call(
        actor_fused_kernel,
        out_shape=jax.ShapeDtypeStruct((num_graphs, 1), jnp.float32),
        in_specs=[pl.BlockSpec(memory_space=pltpu.MemorySpace.VMEM)] * len(inputs),
        out_specs=pl.BlockSpec(memory_space=pltpu.MemorySpace.VMEM),
        cost_estimate=cost,
    )(*inputs)


# ---------------------------------------------------------------------------
# Pure-JAX reference (test-only; mirrors the original scatter-based formulation).
# ---------------------------------------------------------------------------
def _reference_forward(params, x, edge_index, edge_weight, machine_num):
    n = x.shape[0]
    row, col = edge_index[0], edge_index[1]
    loop = jnp.arange(n, dtype=row.dtype)
    row = jnp.concatenate([row, loop])
    col = jnp.concatenate([col, loop])
    ew = jnp.concatenate([edge_weight, jnp.ones((n,), edge_weight.dtype)])
    deg = jnp.zeros((n,), jnp.float32).at[col].add(ew)
    dis = jnp.where(deg > 0, 1.0 / jnp.sqrt(deg), 0.0)
    norm = dis[row] * ew * dis[col]
    a_hat = jnp.zeros((n, n), jnp.float32).at[col, row].add(norm)
    with jax.default_matmul_precision("highest"):
        h = _leaky(a_hat @ (x @ params['w_conv1']) + params['b_conv1'])
        h = _leaky(a_hat @ (h @ params['w_conv2']) + params['b_conv2'])
        cat = jnp.concatenate([h, x], axis=1)
        flat = cat.reshape(n // machine_num, -1)
        z = _leaky(flat @ params['w_fc0'] + params['b_fc0'])
        z = _leaky(z @ params['w_fc1'] + params['b_fc1'])
        z = _leaky(z @ params['w_fc2'] + params['b_fc2'])
        z = z @ params['w_out'] + params['b_out']
    return jnp.tanh(z) * 40.0 + 50.0


# ---------------------------------------------------------------------------
if __name__ == "__main__":
    key = jax.random.PRNGKey(0)

    hidden = 32
    max_num = 10
    machine_num = 22
    fea_dim = max_num * 6                 # 60
    num_graphs = 2
    n = num_graphs * machine_num          # 44 nodes (forward hardcodes /22 grouping)
    num_edges = 100

    keys = jax.random.split(key, 16)
    x = jax.random.normal(keys[0], (n, fea_dim), jnp.float32)
    src = jax.random.randint(keys[1], (num_edges,), 0, n)
    dst = jax.random.randint(keys[2], (num_edges,), 0, n)
    edge_index = jnp.stack([src, dst])
    edge_weight = jax.random.uniform(keys[3], (num_edges,), jnp.float32, 0.1, 1.0)

    def lin(kw, kb, din, dout, scale=0.1):
        w = scale * jax.random.normal(kw, (din, dout), jnp.float32)
        b = scale * jax.random.normal(kb, (1, dout), jnp.float32)
        return w, b

    flat_dim = machine_num * (hidden + fea_dim)   # 22 * 92 = 2024
    params = {}
    params['w_conv1'], params['b_conv1'] = lin(keys[4], keys[5], fea_dim, hidden)
    params['w_conv2'], params['b_conv2'] = lin(keys[6], keys[7], hidden, hidden)
    params['w_fc0'], params['b_fc0'] = lin(keys[8], keys[9], flat_dim, hidden)
    params['w_fc1'], params['b_fc1'] = lin(keys[10], keys[11], hidden, hidden)
    params['w_fc2'], params['b_fc2'] = lin(keys[12], keys[13], hidden, hidden)
    params['w_out'], params['b_out'] = lin(keys[14], keys[15], hidden, 1)

    prepared = prepare_actor_params(params, machine_num=machine_num)
    y = actor_forward(prepared, x, edge_index, edge_weight, machine_num=machine_num)
    y = jax.block_until_ready(y)
    assert y.shape == (num_graphs, 1), y.shape

    y_ref = jax.block_until_ready(
        _reference_forward(params, x, edge_index, edge_weight, machine_num))
    np.testing.assert_allclose(np.asarray(y), np.asarray(y_ref), rtol=1e-2, atol=1e-1)

    print("KERNEL_OK")
</pallas_src>

<mosaic_0001>
module attributes {stable_mosaic.version = 11 : i64} {
  func.func @actor_fused_kernel(%arg0: memref<100x1xi32, #tpu.memory_space<vmem>>, %arg1: memref<1x100xi32, #tpu.memory_space<vmem>>, %arg2: memref<100x1xi32, #tpu.memory_space<vmem>>, %arg3: memref<1x100xf32, #tpu.memory_space<vmem>>, %arg4: memref<100x1xf32, #tpu.memory_space<vmem>>, %arg5: memref<44x60xf32, #tpu.memory_space<vmem>>, %arg6: memref<60x32xf32, #tpu.memory_space<vmem>>, %arg7: memref<1x32xf32, #tpu.memory_space<vmem>>, %arg8: memref<32x32xf32, #tpu.memory_space<vmem>>, %arg9: memref<1x32xf32, #tpu.memory_space<vmem>>, %arg10: memref<32x704xf32, #tpu.memory_space<vmem>>, %arg11: memref<60x704xf32, #tpu.memory_space<vmem>>, %arg12: memref<1x32xf32, #tpu.memory_space<vmem>>, %arg13: memref<44x1xi32, #tpu.memory_space<vmem>>, %arg14: memref<1x704xi32, #tpu.memory_space<vmem>>, %arg15: memref<704x1xi32, #tpu.memory_space<vmem>>, %arg16: memref<2x44xf32, #tpu.memory_space<vmem>>, %arg17: memref<32x32xf32, #tpu.memory_space<vmem>>, %arg18: memref<1x32xf32, #tpu.memory_space<vmem>>, %arg19: memref<32x32xf32, #tpu.memory_space<vmem>>, %arg20: memref<1x32xf32, #tpu.memory_space<vmem>>, %arg21: memref<32x1xf32, #tpu.memory_space<vmem>>, %arg22: memref<1x1xf32, #tpu.memory_space<vmem>>, %arg23: memref<2x1xf32, #tpu.memory_space<vmem>>) attributes {dimension_semantics = [], scalar_prefetch = 0 : i64, scratch_operands = 0 : i64, tpu.core_type = #tpu.core_type<tc>} {
    %0 = tpu.iota {dimensions = array<i32: 0>} : vector<44x100xi32>
    %c0 = arith.constant 0 : index
    %c0_0 = arith.constant 0 : index
    %1 = vector.load %arg1[%c0, %c0_0] : memref<1x100xi32, #tpu.memory_space<vmem>>, vector<1x100xi32>
    %2 = vector.broadcast %1 : vector<1x100xi32> to vector<44x100xi32>
    %3 = arith.cmpi eq, %2, %0 : vector<44x100xi32>
    %c0_1 = arith.constant 0 : index
    %c0_2 = arith.constant 0 : index
    %4 = vector.load %arg3[%c0_1, %c0_2] : memref<1x100xf32, #tpu.memory_space<vmem>>, vector<1x100xf32>
    %cst = arith.constant 0.000000e+00 : f32
    %5 = vector.shape_cast %4 : vector<1x100xf32> to vector<1x100xf32>
    %6 = vector.broadcast %5 : vector<1x100xf32> to vector<44x100xf32>
    %7 = vector.broadcast %cst : f32 to vector<44x100xf32>
    %8 = arith.select %3, %6, %7 : vector<44x100xi1>, vector<44x100xf32>
    %9 = tpu.iota {dimensions = array<i32: 1>} : vector<100x44xi32>
    %c0_3 = arith.constant 0 : index
    %c0_4 = arith.constant 0 : index
    %10 = vector.load %arg0[%c0_3, %c0_4] : memref<100x1xi32, #tpu.memory_space<vmem>>, vector<100x1xi32>
    %11 = vector.broadcast %10 : vector<100x1xi32> to vector<100x44xi32>
    %12 = arith.cmpi eq, %11, %9 : vector<100x44xi32>
    %13 = arith.extui %12 : vector<100x44xi1> to vector<100x44xi32>
    %14 = arith.sitofp %13 : vector<100x44xi32> to vector<100x44xf32>
    %cst_5 = arith.constant dense<0.000000e+00> : vector<44x44xf32>
    %15 = tpu.matmul %8, %14, %cst_5 {dimension_numbers = #tpu.dot_dimension_numbers<[1], [0], [0], [1], [0, 0, 1, 1], [], []>} : vector<44x100xf32>, vector<100x44xf32>, vector<44x44xf32> -> vector<44x44xf32>
    %16 = tpu.iota {dimensions = array<i32: 0>} : vector<44x44xi32>
    %17 = tpu.iota {dimensions = array<i32: 1>} : vector<44x44xi32>
    %18 = arith.cmpi eq, %16, %17 : vector<44x44xi32>
    %19 = arith.extui %18 : vector<44x44xi1> to vector<44x44xi32>
    %20 = arith.sitofp %19 : vector<44x44xi32> to vector<44x44xf32>
    %21 = arith.addf %15, %20 : vector<44x44xf32>
    %cst_6 = arith.constant dense<0.000000e+00> : vector<44xf32>
    %22 = vector.multi_reduction <add>, %8, %cst_6 [1] : vector<44x100xf32> to vector<44xf32>
    %23 = vector.shape_cast %22 : vector<44xf32> to vector<44x1xf32>
    %cst_7 = arith.constant 1.000000e+00 : f32
    %24 = vector.broadcast %cst_7 : f32 to vector<44x1xf32>
    %25 = arith.addf %23, %24 : vector<44x1xf32>
    %c0_8 = arith.constant 0 : index
    %c0_9 = arith.constant 0 : index
    %26 = vector.load %arg2[%c0_8, %c0_9] : memref<100x1xi32, #tpu.memory_space<vmem>>, vector<100x1xi32>
    %27 = vector.broadcast %26 : vector<100x1xi32> to vector<100x44xi32>
    %28 = arith.cmpi eq, %27, %9 : vector<100x44xi32>
    %c0_10 = arith.constant 0 : index
    %c0_11 = arith.constant 0 : index
    %29 = vector.load %arg4[%c0_10, %c0_11] : memref<100x1xf32, #tpu.memory_space<vmem>>, vector<100x1xf32>
    %cst_12 = arith.constant 0.000000e+00 : f32
    %30 = vector.shape_cast %29 : vector<100x1xf32> to vector<100x1xf32>
    %31 = vector.broadcast %30 : vector<100x1xf32> to vector<100x44xf32>
    %32 = vector.broadcast %cst_12 : f32 to vector<100x44xf32>
    %33 = arith.select %28, %31, %32 : vector<100x44xi1>, vector<100x44xf32>
    %cst_13 = arith.constant dense<0.000000e+00> : vector<44xf32>
    %34 = vector.multi_reduction <add>, %33, %cst_13 [0] : vector<100x44xf32> to vector<44xf32>
    %35 = vector.shape_cast %34 : vector<44xf32> to vector<1x44xf32>
    %cst_14 = arith.constant 1.000000e+00 : f32
    %36 = vector.broadcast %cst_14 : f32 to vector<1x44xf32>
    %37 = arith.addf %35, %36 : vector<1x44xf32>
    %cst_15 = arith.constant 0.000000e+00 : f32
    %38 = vector.broadcast %cst_15 : f32 to vector<44x1xf32>
    %39 = arith.cmpf ogt, %25, %38 : vector<44x1xf32>
    %40 = math.rsqrt %25 : vector<44x1xf32>
    %cst_16 = arith.constant 0.000000e+00 : f32
    %41 = vector.broadcast %cst_16 : f32 to vector<44x1xf32>
    %42 = arith.select %39, %40, %41 : vector<44x1xi1>, vector<44x1xf32>
    %cst_17 = arith.constant 0.000000e+00 : f32
    %43 = vector.broadcast %cst_17 : f32 to vector<1x44xf32>
    %44 = arith.cmpf ogt, %37, %43 : vector<1x44xf32>
    %45 = math.rsqrt %37 : vector<1x44xf32>
    %cst_18 = arith.constant 0.000000e+00 : f32
    %46 = vector.broadcast %cst_18 : f32 to vector<1x44xf32>
    %47 = arith.select %44, %45, %46 : vector<1x44xi1>, vector<1x44xf32>
    %48 = vector.broadcast %42 : vector<44x1xf32> to vector<44x44xf32>
    %49 = arith.mulf %48, %21 : vector<44x44xf32>
    %50 = vector.broadcast %47 : vector<1x44xf32> to vector<44x44xf32>
    %51 = arith.mulf %49, %50 : vector<44x44xf32>
    %c0_19 = arith.constant 0 : index
    %c0_20 = arith.constant 0 : index
    %52 = vector.load %arg5[%c0_19, %c0_20] : memref<44x60xf32, #tpu.memory_space<vmem>>, vector<44x60xf32>
    %c0_21 = arith.constant 0 : index
    %c0_22 = arith.constant 0 : index
    %53 = vector.load %arg6[%c0_21, %c0_22] : memref<60x32xf32, #tpu.memory_space<vmem>>, vector<60x32xf32>
    %cst_23 = arith.constant dense<0.000000e+00> : vector<44x32xf32>
    %54 = tpu.matmul %52, %53, %cst_23 {dimension_numbers = #tpu.dot_dimension_numbers<[1], [0], [0], [1], [0, 0, 1, 1], [], []>} : vector<44x60xf32>, vector<60x32xf32>, vector<44x32xf32> -> vector<44x32xf32>
    %cst_24 = arith.constant dense<0.000000e+00> : vector<44x32xf32>
    %55 = tpu.matmul %51, %54, %cst_24 {dimension_numbers = #tpu.dot_dimension_numbers<[1], [0], [0], [1], [0, 0, 1, 1], [], []>} : vector<44x44xf32>, vector<44x32xf32>, vector<44x32xf32> -> vector<44x32xf32>
    %c0_25 = arith.constant 0 : index
    %c0_26 = arith.constant 0 : index
    %56 = vector.load %arg7[%c0_25, %c0_26] : memref<1x32xf32, #tpu.memory_space<vmem>>, vector<1x32xf32>
    %57 = vector.broadcast %56 : vector<1x32xf32> to vector<44x32xf32>
    %58 = arith.addf %55, %57 : vector<44x32xf32>
    %cst_27 = arith.constant 0.000000e+00 : f32
    %59 = vector.broadcast %cst_27 : f32 to vector<44x32xf32>
    %60 = arith.cmpf ogt, %58, %59 : vector<44x32xf32>
    %cst_28 = arith.constant 0.00999999977 : f32
    %61 = vector.broadcast %cst_28 : f32 to vector<44x32xf32>
    %62 = arith.mulf %61, %58 : vector<44x32xf32>
    %63 = arith.select %60, %58, %62 : vector<44x32xi1>, vector<44x32xf32>
    %c0_29 = arith.constant 0 : index
    %c0_30 = arith.constant 0 : index
    %64 = vector.load %arg8[%c0_29, %c0_30] : memref<32x32xf32, #tpu.memory_space<vmem>>, vector<32x32xf32>
    %cst_31 = arith.constant dense<0.000000e+00> : vector<44x32xf32>
    %65 = tpu.matmul %63, %64, %cst_31 {dimension_numbers = #tpu.dot_dimension_numbers<[1], [0], [0], [1], [0, 0, 1, 1], [], []>} : vector<44x32xf32>, vector<32x32xf32>, vector<44x32xf32> -> vector<44x32xf32>
    %cst_32 = arith.constant dense<0.000000e+00> : vector<44x32xf32>
    %66 = tpu.matmul %51, %65, %cst_32 {dimension_numbers = #tpu.dot_dimension_numbers<[1], [0], [0], [1], [0, 0, 1, 1], [], []>} : vector<44x44xf32>, vector<44x32xf32>, vector<44x32xf32> -> vector<44x32xf32>
    %c0_33 = arith.constant 0 : index
    %c0_34 = arith.constant 0 : index
    %67 = vector.load %arg9[%c0_33, %c0_34] : memref<1x32xf32, #tpu.memory_space<vmem>>, vector<1x32xf32>
    %68 = vector.broadcast %67 : vector<1x32xf32> to vector<44x32xf32>
    %69 = arith.addf %66, %68 : vector<44x32xf32>
    %cst_35 = arith.constant 0.000000e+00 : f32
    %70 = vector.broadcast %cst_35 : f32 to vector<44x32xf32>
    %71 = arith.cmpf ogt, %69, %70 : vector<44x32xf32>
    %cst_36 = arith.constant 0.00999999977 : f32
    %72 = vector.broadcast %cst_36 : f32 to vector<44x32xf32>
    %73 = arith.mulf %72, %69 : vector<44x32xf32>
    %74 = arith.select %71, %69, %73 : vector<44x32xi1>, vector<44x32xf32>
    %c0_37 = arith.constant 0 : index
    %c0_38 = arith.constant 0 : index
    %75 = vector.load %arg10[%c0_37, %c0_38] : memref<32x704xf32, #tpu.memory_space<vmem>>, vector<32x704xf32>
    %cst_39 = arith.constant dense<0.000000e+00> : vector<44x704xf32>
    %76 = tpu.matmul %74, %75, %cst_39 {dimension_numbers = #tpu.dot_dimension_numbers<[1], [0], [0], [1], [0, 0, 1, 1], [], []>} : vector<44x32xf32>, vector<32x704xf32>, vector<44x704xf32> -> vector<44x704xf32>
    %c0_40 = arith.constant 0 : index
    %c0_41 = arith.constant 0 : index
    %77 = vector.load %arg11[%c0_40, %c0_41] : memref<60x704xf32, #tpu.memory_space<vmem>>, vector<60x704xf32>
    %cst_42 = arith.constant dense<0.000000e+00> : vector<44x704xf32>
    %78 = tpu.matmul %52, %77, %cst_42 {dimension_numbers = #tpu.dot_dimension_numbers<[1], [0], [0], [1], [0, 0, 1, 1], [], []>} : vector<44x60xf32>, vector<60x704xf32>, vector<44x704xf32> -> vector<44x704xf32>
    %79 = arith.addf %76, %78 : vector<44x704xf32>
    %c0_43 = arith.constant 0 : index
    %c0_44 = arith.constant 0 : index
    %80 = vector.load %arg13[%c0_43, %c0_44] : memref<44x1xi32, #tpu.memory_space<vmem>>, vector<44x1xi32>
    %c0_45 = arith.constant 0 : index
    %c0_46 = arith.constant 0 : index
    %81 = vector.load %arg14[%c0_45, %c0_46] : memref<1x704xi32, #tpu.memory_space<vmem>>, vector<1x704xi32>
    %82 = vector.broadcast %80 : vector<44x1xi32> to vector<44x704xi32>
    %83 = vector.broadcast %81 : vector<1x704xi32> to vector<44x704xi32>
    %84 = arith.cmpi eq, %82, %83 : vector<44x704xi32>
    %85 = arith.extui %84 : vector<44x704xi1> to vector<44x704xi32>
    %86 = arith.sitofp %85 : vector<44x704xi32> to vector<44x704xf32>
    %c0_47 = arith.constant 0 : index
    %c0_48 = arith.constant 0 : index
    %87 = vector.load %arg16[%c0_47, %c0_48] : memref<2x44xf32, #tpu.memory_space<vmem>>, vector<2x44xf32>
    %88 = arith.mulf %79, %86 : vector<44x704xf32>
    %cst_49 = arith.constant dense<0.000000e+00> : vector<2x704xf32>
    %89 = tpu.matmul %87, %88, %cst_49 {dimension_numbers = #tpu.dot_dimension_numbers<[1], [0], [0], [1], [0, 0, 1, 1], [], []>} : vector<2x44xf32>, vector<44x704xf32>, vector<2x704xf32> -> vector<2x704xf32>
    %c0_50 = arith.constant 0 : index
    %c0_51 = arith.constant 0 : index
    %90 = vector.load %arg15[%c0_50, %c0_51] : memref<704x1xi32, #tpu.memory_space<vmem>>, vector<704x1xi32>
    %91 = tpu.iota {dimensions = array<i32: 1>} : vector<704x32xi32>
    %92 = vector.broadcast %90 : vector<704x1xi32> to vector<704x32xi32>
    %93 = arith.cmpi eq, %92, %91 : vector<704x32xi32>
    %94 = arith.extui %93 : vector<704x32xi1> to vector<704x32xi32>
    %95 = arith.sitofp %94 : vector<704x32xi32> to vector<704x32xf32>
    %cst_52 = arith.constant dense<0.000000e+00> : vector<2x32xf32>
    %96 = tpu.matmul %89, %95, %cst_52 {dimension_numbers = #tpu.dot_dimension_numbers<[1], [0], [0], [1], [0, 0, 1, 1], [], []>} : vector<2x704xf32>, vector<704x32xf32>, vector<2x32xf32> -> vector<2x32xf32>
    %c0_53 = arith.constant 0 : index
    %c0_54 = arith.constant 0 : index
    %97 = vector.load %arg12[%c0_53, %c0_54] : memref<1x32xf32, #tpu.memory_space<vmem>>, vector<1x32xf32>
    %98 = vector.broadcast %97 : vector<1x32xf32> to vector<2x32xf32>
    %99 = arith.addf %96, %98 : vector<2x32xf32>
    %cst_55 = arith.constant 0.000000e+00 : f32
    %100 = vector.broadcast %cst_55 : f32 to vector<2x32xf32>
    %101 = arith.cmpf ogt, %99, %100 : vector<2x32xf32>
    %cst_56 = arith.constant 0.00999999977 : f32
    %102 = vector.broadcast %cst_56 : f32 to vector<2x32xf32>
    %103 = arith.mulf %102, %99 : vector<2x32xf32>
    %104 = arith.select %101, %99, %103 : vector<2x32xi1>, vector<2x32xf32>
    %c0_57 = arith.constant 0 : index
    %c0_58 = arith.constant 0 : index
    %105 = vector.load %arg17[%c0_57, %c0_58] : memref<32x32xf32, #tpu.memory_space<vmem>>, vector<32x32xf32>
    %cst_59 = arith.constant dense<0.000000e+00> : vector<2x32xf32>
    %106 = tpu.matmul %104, %105, %cst_59 {dimension_numbers = #tpu.dot_dimension_numbers<[1], [0], [0], [1], [0, 0, 1, 1], [], []>} : vector<2x32xf32>, vector<32x32xf32>, vector<2x32xf32> -> vector<2x32xf32>
    %c0_60 = arith.constant 0 : index
    %c0_61 = arith.constant 0 : index
    %107 = vector.load %arg18[%c0_60, %c0_61] : memref<1x32xf32, #tpu.memory_space<vmem>>, vector<1x32xf32>
    %108 = vector.broadcast %107 : vector<1x32xf32> to vector<2x32xf32>
    %109 = arith.addf %106, %108 : vector<2x32xf32>
    %cst_62 = arith.constant 0.000000e+00 : f32
    %110 = vector.broadcast %cst_62 : f32 to vector<2x32xf32>
    %111 = arith.cmpf ogt, %109, %110 : vector<2x32xf32>
    %cst_63 = arith.constant 0.00999999977 : f32
    %112 = vector.broadcast %cst_63 : f32 to vector<2x32xf32>
    %113 = arith.mulf %112, %109 : vector<2x32xf32>
    %114 = arith.select %111, %109, %113 : vector<2x32xi1>, vector<2x32xf32>
    %c0_64 = arith.constant 0 : index
    %c0_65 = arith.constant 0 : index
    %115 = vector.load %arg19[%c0_64, %c0_65] : memref<32x32xf32, #tpu.memory_space<vmem>>, vector<32x32xf32>
    %cst_66 = arith.constant dense<0.000000e+00> : vector<2x32xf32>
    %116 = tpu.matmul %114, %115, %cst_66 {dimension_numbers = #tpu.dot_dimension_numbers<[1], [0], [0], [1], [0, 0, 1, 1], [], []>} : vector<2x32xf32>, vector<32x32xf32>, vector<2x32xf32> -> vector<2x32xf32>
    %c0_67 = arith.constant 0 : index
    %c0_68 = arith.constant 0 : index
    %117 = vector.load %arg20[%c0_67, %c0_68] : memref<1x32xf32, #tpu.memory_space<vmem>>, vector<1x32xf32>
    %118 = vector.broadcast %117 : vector<1x32xf32> to vector<2x32xf32>
    %119 = arith.addf %116, %118 : vector<2x32xf32>
    %cst_69 = arith.constant 0.000000e+00 : f32
    %120 = vector.broadcast %cst_69 : f32 to vector<2x32xf32>
    %121 = arith.cmpf ogt, %119, %120 : vector<2x32xf32>
    %cst_70 = arith.constant 0.00999999977 : f32
    %122 = vector.broadcast %cst_70 : f32 to vector<2x32xf32>
    %123 = arith.mulf %122, %119 : vector<2x32xf32>
    %124 = arith.select %121, %119, %123 : vector<2x32xi1>, vector<2x32xf32>
    %c0_71 = arith.constant 0 : index
    %c0_72 = arith.constant 0 : index
    %125 = vector.load %arg21[%c0_71, %c0_72] : memref<32x1xf32, #tpu.memory_space<vmem>>, vector<32x1xf32>
    %cst_73 = arith.constant dense<0.000000e+00> : vector<2x1xf32>
    %126 = tpu.matmul %124, %125, %cst_73 {dimension_numbers = #tpu.dot_dimension_numbers<[1], [0], [0], [1], [0, 0, 1, 1], [], []>} : vector<2x32xf32>, vector<32x1xf32>, vector<2x1xf32> -> vector<2x1xf32>
    %c0_74 = arith.constant 0 : index
    %c0_75 = arith.constant 0 : index
    %127 = vector.load %arg22[%c0_74, %c0_75] : memref<1x1xf32, #tpu.memory_space<vmem>>, vector<1x1xf32>
    %128 = vector.broadcast %127 : vector<1x1xf32> to vector<2x1xf32>
    %129 = arith.addf %126, %128 : vector<2x1xf32>
    %130 = math.tanh %129 : vector<2x1xf32>
    %cst_76 = arith.constant 4.000000e+01 : f32
    %131 = vector.broadcast %cst_76 : f32 to vector<2x1xf32>
    %132 = arith.mulf %130, %131 : vector<2x1xf32>
    %cst_77 = arith.constant 5.000000e+01 : f32
    %133 = vector.broadcast %cst_77 : f32 to vector<2x1xf32>
    %134 = arith.addf %132, %133 : vector<2x1xf32>
    %c0_78 = arith.constant 0 : index
    %c0_79 = arith.constant 0 : index
    %135 = vector.load %arg23[%c0_78, %c0_79] : memref<2x1xf32, #tpu.memory_space<vmem>>, vector<2x1xf32>
    tpu.vector_store %arg23[%c0_78, %c0_79], %134 {strides = array<i32>} : memref<2x1xf32, #tpu.memory_space<vmem>>, vector<2x1xf32>,
    return
  }
}

</mosaic_0001>

<bundles_post_ra>
// kernel: actor_forward.1
= control target key start
LH: loop header
LB: loop body
LE: loop exit
PB: predicated region body
PF: predicated region fallthrough
CT: control target
= control target key end

     0   :  { %s6396_s0 = inlined_call_operand.vmem [shape: s32[100,1], index: 0, kind: input, shape index: {}]   ;;  %s6397_s1 = inlined_call_operand.vmem [shape: s32[1,100], index: 1, kind: input, shape index: {}]   ;;  %s6398_s2 = inlined_call_operand.vmem [shape: s32[100,1], index: 2, kind: input, shape index: {}]   ;;  %s6399_s3 = inlined_call_operand.vmem [shape: f32[1,100], index: 3, kind: input, shape index: {}]   ;;  %s6400_s4 = inlined_call_operand.vmem [shape: f32[100,1], index: 4, kind: input, shape index: {}]   ;;  %s6401_s5 = inlined_call_operand.vmem [shape: f32[44,60], index: 5, kind: input, shape index: {}]   ;;  %s6402_s6 = inlined_call_operand.vmem [shape: f32[60,32], index: 6, kind: input, shape index: {}]   ;;  %s6403_s7 = inlined_call_operand.hbm [shape: f32[1,32], index: 7, kind: input, shape index: {}]   ;;  %s6404_s8 = inlined_call_operand.vmem [shape: f32[32,32], index: 8, kind: input, shape index: {}]   ;;  %s6405_s9 = inlined_call_operand.hbm [shape: f32[1,32], index: 9, kind: input, shape index: {}]   ;;  %s6406_s10 = inlined_call_operand.hbm [shape: f32[32,704], index: 10, kind: input, shape index: {}]   ;;  %s6407_s11 = inlined_call_operand.vmem [shape: f32[60,704], index: 11, kind: input, shape index: {}]   ;;  %s6408_s12 = inlined_call_operand.hbm [shape: f32[1,32], index: 12, kind: input, shape index: {}]   ;;  %s6409_s13 = inlined_call_operand.vmem [shape: s32[44,1], index: 13, kind: input, shape index: {}]   ;;  %s6410_s14 = inlined_call_operand.vmem [shape: s32[1,704], index: 14, kind: input, shape index: {}]   ;;  %s6411_s15 = inlined_call_operand.hbm [shape: s32[704,1], index: 15, kind: input, shape index: {}]   ;;  %s6412_s16 = inlined_call_operand.vmem [shape: f32[2,44], index: 16, kind: input, shape index: {}]   ;;  %s6413_s17 = inlined_call_operand.hbm [shape: f32[32,32], index: 17, kind: input, shape index: {}]   ;;  %s6414_s18 = inlined_call_operand.hbm [shape: f32[1,32], index: 18, kind: input, shape index: {}]   ;;  %s6415_s19 = inlined_call_operand.hbm [shape: f32[32,32], index: 19, kind: input, shape index: {}]   ;;  %s6416_s20 = inlined_call_operand.hbm [shape: f32[1,32], index: 20, kind: input, shape index: {}]   ;;  %s6417_s21 = inlined_call_operand.vmem [shape: f32[32,1], index: 21, kind: input, shape index: {}]   ;;  %s6418_s22 = inlined_call_operand.<no memory space> [shape: f32[1,1], index: 22, kind: input, shape index: {}]   ;;  %s6419_s23 = inlined_call_operand.vmem [shape: f32[2,1], index: 23, kind: output, shape index: {}]  }
   0x1   :  { %6449 = sst [smem:[#allocation63_spill]] %s6396_s0  ;;  %v28_v0 = vstv %s6418_s22 }
   0x2   :  { %6450 = sst [smem:[#allocation64_spill]] %s6397_s1  ;;  %29 = vst [vmem:[#allocation2] sm:$0x1] %v28_v0 }
   0x3   :  { %6451 = sst [smem:[#allocation65_spill]] %s6398_s2 }
   0x4   :  { %6452 = sst [smem:[#allocation66_spill]] %s6399_s3 }
   0x5   :  { %6453 = sst [smem:[#allocation67_spill]] %s6400_s4 }
   0x6   :  { %6454 = sst [smem:[#allocation68_spill]] %s6401_s5 }
   0x7   :  { %6455 = sst [smem:[#allocation69_spill]] %s6402_s6 }
   0x8   :  { %6456 = sst [smem:[#allocation70_spill]] %s6403_s7 }
   0x9   :  { %30 = vsyncpa [#allocation4], 0 }
   0xa   :  { %31 = vsyncpa [#allocation6], 0 }
   0xb   :  { %32 = vsyncpa [#allocation9], 0 }
   0xc   :  { %33 = vsyncpa [#allocation12], 0 }
   0xd   :  { %34 = vsyncpa [#allocation15], 0  ;;  %s4710_s24 = smov [#allocation5]   ;;  %s4711_s5 = smov [#allocation8]  }
   0xe   :  { %s67_s25 = sshll.u32 %s4710_s24, 4  ;;  %s91_s1 = sshll.u32 %s4711_s5, 4  ;;  %s68_s25 = int_to_ptr.vmem [resolvable:$true] %s67_s25  ;;  %s92_s1 = int_to_ptr.vmem [resolvable:$true] %s91_s1 }
   0xf   :  { %s4502_s6 = scalar_lea.hbm %s6405_s9, 16 }
  0x10   :  { %p4503_p0 = scmp.ne.s32.totalorder %s6405_s9, %s4502_s6  ;;  %p4506_p1 = scmp.lt.u32.totalorder %s4502_s6, %s6405_s9 }
  0x12   :  { %p4508_p2 = pnand %p4506_p1, %p4503_p0 }
  0x14   :  { %4511 = shalt.err (!%p4508_p2)
}
  0x15   :  { %s4512_s29 = scalar_lea.vmem %s68_s25, 16  ;;  %s4516_s3 = scalar_lea.vmem %s68_s25, 32 }
  0x16   :  { %p4513_p3 = scmp.ne.s32.totalorder %s68_s25, %s4512_s29  ;;  %p4517_p4 = scmp.lt.s32.totalorder %s68_s25, %s68_s25 }
  0x17   :  { %p4518_p5 = scmp.lt.s32.totalorder %s4516_s3, %s4512_s29 }
  0x19   :  { %p4519_p6 = por %p4518_p5, %p4517_p4 }
  0x1b   :  { %p4520_p7 = pnand %p4519_p6, %p4513_p3 }
  0x1d   :  { %4523 = shalt.err (!%p4520_p7)
}
  0x1e   :  { %70 = dma.hbm_to_vmem [thread:$0]  %s6405_s9, 16, %s68_s25, [#allocation6]  }
  0x1f   :  { %s4524_s5 = scalar_lea.hbm %s6408_s12, 16 }
  0x20   :  { %p4525_p8 = scmp.ne.s32.totalorder %s6408_s12, %s4524_s5  ;;  %p4528_p9 = scmp.lt.u32.totalorder %s4524_s5, %s6408_s12 }
  0x22   :  { %p4530_p10 = pnand %p4528_p9, %p4525_p8 }
  0x24   :  { %4533 = shalt.err (!%p4530_p10)
}
  0x25   :  { %s4534_s7 = scalar_lea.vmem %s92_s1, 16  ;;  %s4538_s22 = scalar_lea.vmem %s92_s1, 32 }
  0x26   :  { %p4535_p11 = scmp.ne.s32.totalorder %s92_s1, %s4534_s7  ;;  %p4539_p12 = scmp.lt.s32.totalorder %s92_s1, %s92_s1 }
  0x27   :  { %p4540_p13 = scmp.lt.s32.totalorder %s4538_s22, %s4534_s7 }
  0x29   :  { %p4541_p0 = por %p4540_p13, %p4539_p12 }
  0x2b   :  { %p4542_p1 = pnand %p4541_p0, %p4535_p11 }
  0x2d   :  { %4545 = shalt.err (!%p4542_p1)
}
  0x2e   :  { %94 = dma.hbm_to_vmem [thread:$0]  %s6408_s12, 16, %s92_s1, [#allocation9]  }
  0x2f   :  { %s4712_s28 = smov [#allocation11]   ;;  %s4713_s3 = smov [#allocation14]  }
  0x30   :  { %s118_s29 = sshll.u32 %s4712_s28, 4  ;;  %s140_s0 = sshll.u32 %s4713_s3, 4  ;;  %s119_s29 = int_to_ptr.vmem [resolvable:$true] %s118_s29  ;;  %s4876_s0 = int_to_ptr.vmem [resolvable:$true] %s140_s0 }
  0x31   :  { %s4546_s24 = scalar_lea.hbm %s6413_s17, 512 }
  0x32   :  { %p4547_p2 = scmp.ne.s32.totalorder %s6413_s17, %s4546_s24  ;;  %p4550_p3 = scmp.lt.u32.totalorder %s4546_s24, %s6413_s17 }
  0x34   :  { %p4552_p4 = pnand %p4550_p3, %p4547_p2 }
  0x36   :  { %4555 = shalt.err (!%p4552_p4)
}
  0x37   :  { %s4556_s12 = scalar_lea.vmem %s119_s29, 512  ;;  %p4561_p6 = scmp.lt.s32.totalorder %s119_s29, %s119_s29 }
  0x38   :  { %p4557_p5 = scmp.ne.s32.totalorder %s119_s29, %s4556_s12  ;;  %p4562_p7 = scmp.lt.s32.totalorder %s4556_s12, %s4556_s12 }
  0x3a   :  { %p4563_p8 = por %p4562_p7, %p4561_p6 }
  0x3c   :  { %p4564_p9 = pnand %p4563_p8, %p4557_p5 }
  0x3e   :  { %4567 = shalt.err (!%p4564_p9)
}
  0x3f   :  { %s4714_s1 = smov 128   ;;  %s4715_s27 = smov 8  }
  0x40   :  { %124 = dma.hbm_to_vmem [thread:$0]  %s6413_s17, 512, %s119_s29, [#allocation12], %s4714_s1, %s4714_s1, %s4715_s27  }
  0x41   :  { %s4568_s28 = scalar_lea.hbm %s6415_s19, 512 }
  0x42   :  { %p4569_p10 = scmp.ne.s32.totalorder %s6415_s19, %s4568_s28  ;;  %p4572_p11 = scmp.lt.u32.totalorder %s4568_s28, %s6415_s19 }
  0x44   :  { %p4574_p12 = pnand %p4572_p11, %p4569_p10 }
  0x46   :  { %4577 = shalt.err (!%p4574_p12)
}
  0x47   :  { %s4578_s5 = scalar_lea.vmem %s4876_s0, 512  ;;  %p4583_p0 = scmp.lt.s32.totalorder %s4876_s0, %s4876_s0 }
  0x48   :  { %p4579_p13 = scmp.ne.s32.totalorder %s4876_s0, %s4578_s5  ;;  %p4584_p1 = scmp.lt.s32.totalorder %s4578_s5, %s4578_s5 }
  0x4a   :  { %p4585_p2 = por %p4584_p1, %p4583_p0 }
  0x4c   :  { %p4586_p3 = pnand %p4585_p2, %p4579_p13 }
  0x4e   :  { %4589 = shalt.err (!%p4586_p3)
}
  0x4f   :  { %146 = dma.hbm_to_vmem [thread:$0]  %s6415_s19, 512, %s4876_s0, [#allocation15], %s4714_s1, %s4714_s1, %s4715_s27  }
  0x50   :  { %s4716_s26 = smov [#allocation3]   ;;  %s4717_s6 = smov [#allocation7]  }
  0x51   :  { %s55_s2 = sshll.u32 %s4716_s26, 4  ;;  %s76_s12 = sshll.u32 %s4717_s6, 4  ;;  %s56_s2 = int_to_ptr.vmem [resolvable:$true] %s55_s2  ;;  %s4913_s12 = int_to_ptr.vmem [resolvable:$true] %s76_s12 }
  0x52   :  { %s6457_s9 = sld [smem:[#allocation70_spill]] }
  0x58   :  { %s4590_s25 = scalar_lea.hbm %s6457_s9, 16 }
  0x59   :  { %p4591_p4 = scmp.ne.s32.totalorder %s6457_s9, %s4590_s25  ;;  %p4594_p5 = scmp.lt.u32.totalorder %s4590_s25, %s6457_s9 }
  0x5b   :  { %p4596_p6 = pnand %p4594_p5, %p4591_p4 }
  0x5d   :  { %4599 = shalt.err (!%p4596_p6)
}
  0x5e   :  { %s4600_s19 = scalar_lea.vmem %s56_s2, 16  ;;  %s4604_s0 = scalar_lea.vmem %s56_s2, 32 }
  0x5f   :  { %p4601_p7 = scmp.ne.s32.totalorder %s56_s2, %s4600_s19  ;;  %p4605_p8 = scmp.lt.s32.totalorder %s56_s2, %s56_s2 }
  0x60   :  { %p4606_p9 = scmp.lt.s32.totalorder %s4604_s0, %s4600_s19 }
  0x62   :  { %p4607_p10 = por %p4606_p9, %p4605_p8 }
  0x64   :  { %p4608_p11 = pnand %p4607_p10, %p4601_p7 }
  0x66   :  { %4611 = shalt.err (!%p4608_p11)
}
  0x67   :  { %58 = dma.hbm_to_vmem [thread:$0]  %s6457_s9, 16, %s56_s2, [#allocation4]  }
  0x68   :  { %s4612_s26 = scalar_lea.hbm %s6406_s10, 3072 }
  0x69   :  { %p4613_p12 = scmp.ne.s32.totalorder %s6406_s10, %s4612_s26  ;;  %p4616_p13 = scmp.lt.u32.totalorder %s4612_s26, %s6406_s10 }
  0x6b   :  { %p4618_p0 = pnand %p4616_p13, %p4613_p12 }
  0x6d   :  { %4621 = shalt.err (!%p4618_p0)
}
  0x6e   :  { %s4622_s28 = scalar_lea.vmem %s4913_s12, 3072  ;;  %p4627_p2 = scmp.lt.s32.totalorder %s4913_s12, %s4913_s12 }
  0x6f   :  { %p4623_p1 = scmp.ne.s32.totalorder %s4913_s12, %s4622_s28  ;;  %p4628_p3 = scmp.lt.s32.totalorder %s4622_s28, %s4622_s28 }
  0x71   :  { %p4629_p4 = por %p4628_p3, %p4627_p2 }
  0x73   :  { %p4630_p5 = pnand %p4629_p4, %p4623_p1 }
  0x75   :  { %4633 = shalt.err (!%p4630_p5)
}
  0x76   :  { %s4718_s2 = smov 768   ;;  %s4719_s9 = smov 48  }
  0x77   :  { %82 = dma.hbm_to_vmem [thread:$0]  %s6406_s10, 3072, %s4913_s12, [#allocation6], %s4718_s2, %s4718_s2, %s4719_s9  }
  0x78   :  { %s4720_s30 = smov [#allocation10]   ;;  %s4721_s0 = smov [#allocation13]  }
  0x79   :  { %s104_s19 = sshll.u32 %s4720_s30, 4  ;;  %s131_s24 = sshll.u32 %s4721_s0, 4  ;;  %s105_s19 = int_to_ptr.vmem [resolvable:$true] %s104_s19  ;;  %s132_s24 = int_to_ptr.vmem [resolvable:$true] %s131_s24 }
  0x7a   :  { %s4634_s29 = scalar_lea.hbm %s6411_s15, 11264 }
  0x7b   :  { %p4635_p6 = scmp.ne.s32.totalorder %s6411_s15, %s4634_s29  ;;  %p4638_p7 = scmp.lt.u32.totalorder %s4634_s29, %s6411_s15 }
  0x7d   :  { %p4640_p8 = pnand %p4638_p7, %p4635_p6 }
  0x7f   :  { %4643 = shalt.err (!%p4640_p8)
}
  0x80   :  { %s4644_s10 = scalar_lea.vmem %s105_s19, 11264  ;;  %p4649_p10 = scmp.lt.s32.totalorder %s105_s19, %s105_s19 }
  0x81   :  { %p4645_p9 = scmp.ne.s32.totalorder %s105_s19, %s4644_s10  ;;  %p4650_p11 = scmp.lt.s32.totalorder %s4644_s10, %s4644_s10 }
  0x83   :  { %p4651_p12 = por %p4650_p11, %p4649_p10 }
  0x85   :  { %p4652_p13 = pnand %p4651_p12, %p4645_p9 }
  0x87   :  { %4655 = shalt.err (!%p4652_p13)
}
  0x88   :  { %110 = dma.hbm_to_vmem [thread:$0]  %s6411_s15, 11264, %s105_s19, [#allocation9], %s4714_s1, %s4714_s1, %s4715_s27  }
  0x89   :  { %s4656_s9 = scalar_lea.hbm %s6414_s18, 16 }
  0x8a   :  { %p4657_p0 = scmp.ne.s32.totalorder %s6414_s18, %s4656_s9  ;;  %p4660_p1 = scmp.lt.u32.totalorder %s4656_s9, %s6414_s18 }
  0x8c   :  { %p4662_p2 = pnand %p4660_p1, %p4657_p0 }
  0x8e   :  { %4665 = shalt.err (!%p4662_p2)
}
  0x8f   :  { %s4666_s5 = scalar_lea.vmem %s132_s24, 16  ;;  %s4670_s17 = scalar_lea.vmem %s132_s24, 32 }
  0x90   :  { %p4667_p3 = scmp.ne.s32.totalorder %s132_s24, %s4666_s5  ;;  %p4671_p4 = scmp.lt.s32.totalorder %s132_s24, %s132_s24 }
  0x91   :  { %p4672_p5 = scmp.lt.s32.totalorder %s4670_s17, %s4666_s5 }
  0x93   :  { %p4673_p6 = por %p4672_p5, %p4671_p4 }
  0x95   :  { %p4674_p7 = pnand %p4673_p6, %p4667_p3 }
  0x97   :  { %4677 = shalt.err (!%p4674_p7)
}
  0x98   :  { %134 = dma.hbm_to_vmem [thread:$0]  %s6414_s18, 16, %s132_s24, [#allocation12]  }
  0x99   :  { %s4722_s27 = smov [#allocation16]   ;;  %s4678_s6 = scalar_lea.hbm %s6416_s20, 16 }
  0x9a   :  { %s153_s19 = sshll.u32 %s4722_s27, 4  ;;  %p4679_p8 = scmp.ne.s32.totalorder %s6416_s20, %s4678_s6  ;;  %s154_s19 = int_to_ptr.vmem [resolvable:$true] %s153_s19 }
  0x9b   :  { %p4682_p9 = scmp.lt.u32.totalorder %s4678_s6, %s6416_s20 }
  0x9d   :  { %p4684_p10 = pnand %p4682_p9, %p4679_p8 }
  0x9f   :  { %4687 = shalt.err (!%p4684_p10)
}
  0xa0   :  { %s4688_s25 = scalar_lea.vmem %s154_s19, 16  ;;  %s4692_s18 = scalar_lea.vmem %s154_s19, 32 }
  0xa1   :  { %p4689_p11 = scmp.ne.s32.totalorder %s154_s19, %s4688_s25  ;;  %p4693_p12 = scmp.lt.s32.totalorder %s154_s19, %s154_s19 }
  0xa2   :  { %p4694_p13 = scmp.lt.s32.totalorder %s4692_s18, %s4688_s25 }
  0xa4   :  { %p4695_p0 = por %p4694_p13, %p4693_p12 }
  0xa6   :  { %p4696_p1 = pnand %p4695_p0, %p4689_p11 }
  0xa8   :  { %4699 = shalt.err (!%p4696_p1)
}
  0xa9   :  { %156 = dma.hbm_to_vmem [thread:$0]  %s6416_s20, 16, %s154_s19, [#allocation15]  }
  0xaa   :  { %4700 = dma.done.wait [#allocation4], 16  }
  0xab   :  { %4701 = vsyncadd [#allocation4], 4294967280 }
  0xac   :  { %4702 = dma.done.wait [#allocation6], 3088  }
  0xad   :  { %4703 = vsyncadd [#allocation6], 4294964208 }
  0xae   :  { %4704 = dma.done.wait [#allocation9], 11280  }
  0xaf   :  { %4705 = vsyncadd [#allocation9], 4294956016 }
  0xb0   :  { %4706 = dma.done.wait [#allocation12], 528  }
  0xb1   :  { %4707 = vsyncadd [#allocation12], 4294966768 }
  0xb2   :  { %4708 = dma.done.wait [#allocation15], 528  }
  0xb3   :  { %4709 = vsyncadd [#allocation15], 4294966768  ;;  %v4723_v1 = vmov 0   ;;  %s6458_s3 = sld [smem:[#allocation63_spill]]  ;;  %v188_v6 = vlaneseq  ;;  %vm330_vm0 = vcmask 818176   ;;  %s6459_s18 = sld [smem:[#allocation64_spill]] }
  0xb4   :  { %4479 = vset.pattern.permute.xlu1 %v4723_v1  ;;  %4478 = vset.pattern.permute.xlu0 %v4723_v1  ;;  %s6460_s2 = sld [smem:[#allocation66_spill]]  ;;  %s6461_s0 = sld [smem:[#allocation69_spill]]  ;;  %vm6444_vm7 = vcmask 490496   ;;  %vm349_vm8 = vcmask 1043456   ;;  %vm4724_vm9 = vmmov 1   ;;  %vm463_vm11 = vcmask 814080  }
  0xb5   :  { %v5002_v9 = vshrl.u32 %v188_v6, 7  ;;  %s6462_s28 = sld [smem:[#allocation65_spill]]  ;;  %s6463_s1 = sld [smem:[#allocation68_spill]]  ;;  %vm5104_vm10 = vmpackc.low %vm349_vm8, %vm4724_vm9 }
  0xb6   :  { %s6464_s19 = sld [smem:[#allocation67_spill]] }
  0xb7   :  { %v5011_v12 = vadd.s32 8, %v5002_v9  ;;  %v5014_v13 = vadd.s32 16, %v5002_v9  ;;  %v5017_v14 = vadd.s32 24, %v5002_v9  ;;  %v5020_v15 = vadd.s32 32, %v5002_v9 }
  0xb8   :  { %v5032_v19 = vadd.s32 40, %v5002_v9 }
  0xb9   :  { %v223_v2 = vld [vmem:[%s6458_s3 + $0x10] sm:$0xff]  ;;  %v221_v3 = vld [vmem:[%s6458_s3] sm:$0xff]  ;;  %v224_v4 = vld [vmem:[%s6458_s3 + $0x18] sm:$0xff] }
  0xba   :  { %241 = vperm.xlu1 %4479, %v223_v2   ;;  %235 = vperm.xlu0 %4478, %v221_v3   ;;  %v222_v5 = vld [vmem:[%s6458_s3 + $0x8] sm:$0xff]  ;;  %v225_v8 = vld [vmem:[%s6458_s3 + $0x20] sm:$0xff]  ;;  %v228_v10 = vld [vmem:[%s6458_s3 + $0x38] sm:$0xff] }
  0xbb   :  { %v226_v7 = vld [vmem:[%s6458_s3 + $0x28] sm:$0xff]  ;;  %v227_v11 = vld [vmem:[%s6458_s3 + $0x30] sm:$0xff]  ;;  %v3463_v17 = vld [vmem:[%s6459_s18] ss:$0 sm:$0xff] }
  0xbc   :  { %v230_v16 = vld [vmem:[%s6458_s3 + $0x48] sm:$0xff]  ;;  %v3464_v18 = vld [vmem:[%s6460_s2] ss:$0 sm:$0xff]  ;;  %vm201_vm1 = vcmp.eq.s32.totalorder %v3463_v17, %v5011_v12  ;;  %vm200_vm2 = vcmp.eq.s32.totalorder %v3463_v17, %v5002_v9  ;;  %vm202_vm3 = vcmp.eq.s32.totalorder %v3463_v17, %v5014_v13  ;;  %vm203_vm4 = vcmp.eq.s32.totalorder %v3463_v17, %v5017_v14  ;;  %v704_v27 = vld [vmem:[%s6461_s0 + $0x10] sm:$0xff] }
  0xbd   :  { %v229_v20 = vld [vmem:[%s6458_s3 + $0x40] sm:$0xff]  ;;  %v703_v22 = vld [vmem:[%s6461_s0 + $0x8] sm:$0xff]  ;;  %v5047_v23 = vsel %vm201_vm1, %v3464_v18, 0.0  ;;  %v5049_v24 = vsel %vm200_vm2, %v3464_v18, 0.0  ;;  %v5051_v25 = vsel %vm202_vm3, %v3464_v18, 0.0  ;;  %v5053_v26 = vsel %vm203_vm4, %v3464_v18, 0.0 }
  0xbe   :  { %244 = vperm.xlu1 %4479, %v224_v4   ;;  %238 = vperm.xlu0 %4478, %v222_v5   ;;  %v702_v21 = vld [vmem:[%s6461_s0] sm:$0xff]  ;;  %v705_v28 = vld [vmem:[%s6461_s0 + $0x18] sm:$0xff]  ;;  %vm204_vm5 = vcmp.eq.s32.totalorder %v3463_v17, %v5020_v15  ;;  %vm205_vm6 = vcmp.eq.s32.totalorder %v3463_v17, %v5032_v19  ;;  %v231_v31 = vld [vmem:[%s6458_s3 + $0x50] sm:$0xff]  ;;  %v451_v17 = vsel %vm330_vm0, %v5047_v23, 0.0 }
  0xbf   :  { %3981 = vmatprep.mubr.msk.f32.mxu0 %vm330_vm0, %v5049_v24  ;;  %v4131_v29 = vpack.c.bf16 %v703_v22, %v702_v21  ;;  %v232_v30 = vld [vmem:[%s6458_s3 + $0x58] sm:$0xff]  ;;  %v5071_v32 = vsel %vm204_vm5, %v3464_v18, 0.0  ;;  %v5073_v33 = vsel %vm205_vm6, %v3464_v18, 0.0  ;;  %v4135_v34 = vpack.c.bf16 %v705_v28, %v704_v27  ;;  %v706_v35 = vld [vmem:[%s6461_s0 + $0x20] sm:$0xff]  ;;  %v707_v36 = vld [vmem:[%s6461_s0 + $0x28] sm:$0xff] }
  0xc0   :  { %v473_v37 = vld [vmem:[%s6462_s28] sm:$0xff]  ;;  %v4139_v39 = vpack.c.bf16 %v707_v36, %v706_v35  ;;  %v708_v40 = vld [vmem:[%s6461_s0 + $0x30] sm:$0xff]  ;;  %v709_v41 = vld [vmem:[%s6461_s0 + $0x38] sm:$0xf]  ;;  %v448_v18 = vsel %vm330_vm0, %v5049_v24, 0.0  ;;  %v457_v21 = vsel %vm330_vm0, %v5053_v26, 0.0 }
  0xc1   :  { %4132 = vmatprep.subr.bf16.mxu1 %v4131_v29  ;;  %v233_v38 = vld [vmem:[%s6458_s3 + $0x60] sm:$0xf]  ;;  %v474_v44 = vld [vmem:[%s6462_s28 + $0x8] sm:$0xff]  ;;  %v4143_v45 = vpack.c.bf16 %v709_v41, %v708_v40  ;;  %v475_v47 = vld [vmem:[%s6462_s28 + $0x10] sm:$0xff]  ;;  %v460_v22 = vsel %vm330_vm0, %v5071_v32, 0.0  ;;  %v464_v27 = vsel %vm463_vm11, %v5073_v33, 0.0 }
  0xc2   :  { %250 = vperm.xlu1 %4479, %v226_v7   ;;  %247 = vperm.xlu0 %4478, %v225_v8   ;;  %v696_v42 = vld [vmem:[%s6463_s1] sm:$0xff]  ;;  %v539_v48 = vld [vmem:[%s6464_s19 + $0x8] sm:$0xff]  ;;  %v698_v50 = vld [vmem:[%s6463_s1 + $0x10] sm:$0xff]  ;;  %v6426_v35 = vmov 1.0|1.0  }
  0xc3   :  { %4134 = vmatpush3.bf16.msra.mxu1 %v4131_v29  ;;  %4006 = vmatprep.mubr.msk.f32.mxu1 %vm6444_vm7, %v696_v42  ;;  %v538_v43 = vld [vmem:[%s6464_s19] sm:$0xff]  ;;  %v697_v49 = vld [vmem:[%s6463_s1 + $0x8] sm:$0xff]  ;;  %v476_v51 = vld [vmem:[%s6462_s28 + $0x18] sm:$0xff]  ;;  %v5213_v29 = vand.u32 127, %v188_v6 }
  0xc4   :  { %4136 = vmatprep.subr.bf16.mxu1 %v4135_v34  ;;  %v540_v52 = vld [vmem:[%s6464_s19 + $0x10] sm:$0xff]  ;;  %v699_v53 = vld [vmem:[%s6463_s1 + $0x18] sm:$0xff]  ;;  %v700_v54 = vld [vmem:[%s6463_s1 + $0x20] sm:$0xff] }
  0xc5   :  { %v477_v55 = vld [vmem:[%s6462_s28 + $0x20] sm:$0xff]  ;;  %v541_v56 = vld [vmem:[%s6464_s19 + $0x18] sm:$0xff]  ;;  %v701_v57 = vld [vmem:[%s6463_s1 + $0x28] sm:$0xf] }
  0xc6   :  { %256 = vperm.xlu1 %4479, %v228_v10   ;;  %253 = vperm.xlu0 %4478, %v227_v11   ;;  %v478_v58 = vld [vmem:[%s6462_s28 + $0x28] sm:$0xff]  ;;  %v542_v59 = vld [vmem:[%s6464_s19 + $0x20] sm:$0xff]  ;;  %v479_v60 = vld [vmem:[%s6462_s28 + $0x30] sm:$0xff] }
  0xc7   :  { %4138 = vmatpush3.bf16.msra.mxu1 %v4135_v34  ;;  %v543_v61 = vld [vmem:[%s6464_s19 + $0x28] sm:$0xff]  ;;  %v480_v62 = vld [vmem:[%s6462_s28 + $0x38] sm:$0xff]  ;;  %v544_v63 = vld [vmem:[%s6464_s19 + $0x30] sm:$0xff] }
  0xc8   :  { %4140 = vmatprep.subr.bf16.mxu1 %v4139_v39  ;;  %v481_v0 = vld [vmem:[%s6462_s28 + $0x40] sm:$0xff]  ;;  %v545_v1 = vld [vmem:[%s6464_s19 + $0x38] sm:$0xff]  ;;  %v482_v2 = vld [vmem:[%s6462_s28 + $0x48] sm:$0xff] }
  0xc9   :  { %v546_v3 = vld [vmem:[%s6464_s19 + $0x40] sm:$0xff]  ;;  %v483_v4 = vld [vmem:[%s6462_s28 + $0x50] sm:$0xff]  ;;  %v547_v5 = vld [vmem:[%s6464_s19 + $0x48] sm:$0xff] }
  0xca   :  { %262 = vperm.xlu1 %4479, %v230_v16   ;;  %259 = vperm.xlu0 %4478, %v229_v20   ;;  %v484_v7 = vld [vmem:[%s6462_s28 + $0x58] sm:$0xff]  ;;  %v548_v8 = vld [vmem:[%s6464_s19 + $0x50] sm:$0xff]  ;;  %v485_v10 = vld [vmem:[%s6462_s28 + $0x60] sm:$0xf]  ;;  %v454_v20 = vsel %vm330_vm0, %v5051_v25, 0.0 }
  0xcb   :  { %4142 = vmatpush3.bf16.msra.mxu1 %v4139_v39  ;;  %v549_v11 = vld [vmem:[%s6464_s19 + $0x58] sm:$0xff]  ;;  %v550_v16 = vld [vmem:[%s6464_s19 + $0x60] sm:$0xf] }
  0xcc   :  { %4145 = vmatprep.subr.msk.bf16.mxu1 %vm5104_vm10, %v4143_v45  ;;  %v1923_v6 = vld [vmem:[%s6409_s13] sm:$0xff]  ;;  %v1926_v39 = vld [vmem:[%s6409_s13 + $0x18] sm:$0xff] }
  0xcd   :  { %v1927_v42 = vld [vmem:[%s6409_s13 + $0x20] sm:$0xff] }
  0xce   :  { %268 = vperm.xlu1 %4479, %v232_v30   ;;  %265 = vperm.xlu0 %4478, %v231_v31   ;;  %v1924_v30 = vld [vmem:[%s6409_s13 + $0x8] sm:$0xff] }
  0xcf   :  { %4148 = vmatpush3.bf16.msk.msra.mxu1 %vm5104_vm10, %v4143_v45 }
  0xd2   :  { %487 = vperm.xlu1 %4479, %v473_v37   ;;  %271 = vperm.xlu0 %4478, %v233_v38   ;;  %v1925_v38 = vld [vmem:[%s6409_s13 + $0x10] sm:$0xff] }
  0xd3   :  { %4007 = vmatmul.mubr.msk.f32.vlgmr.msra.gmra.mrb[0].mxu1 %vm6444_vm7, %v697_v49 }
  0xd4   :  { %4009 = vmatprep.mubr.msk.f32.mxu1 %vm6444_vm7, %v698_v50 }
  0xd6   :  { %553 = vperm.xlu1 %4479, %v538_v43   ;;  %490 = vperm.xlu0 %4478, %v474_v44   ;;  %v1928_v43 = vld [vmem:[%s6409_s13 + $0x28] sm:$0xf] }
  0xd7   :  { %4010 = vmatmul.mubr.msk.f32.gmra.mrb[2].mxu1 %vm6444_vm7, %v699_v53 }
  0xd8   :  { %4012 = vmatprep.mubr.msk.f32.mxu1 %vm6444_vm7, %v700_v54  ;;  %v2369_v54 = vld [vmem:[#allocation10 + $0x90] sm:$0xff] }
  0xda   :  { %493 = vperm.xlu1 %4479, %v475_v47   ;;  %558 = vperm.xlu0 %4478, %v539_v48   ;;  %v2367_v47 = vld [vmem:[#allocation10 + $0x80] sm:$0xff]  ;;  %v2368_v48 = vld [vmem:[#allocation10 + $0x88] sm:$0xff] }
  0xdb   :  { %4013 = vmatmul.mubr.msk.f32.gmra.mrb[4].mxu1 %vm6444_vm7, %v701_v57  ;;  %v6428_v57 = vmov 0.0  }
  0xde   :  { %496 = vperm.xlu1 %4479, %v476_v51   ;;  %563 = vperm.xlu0 %4478, %v540_v52   ;;  %v2351_v51 = vld [vmem:[#allocation10] sm:$0xff]  ;;  %v2352_v52 = vld [vmem:[#allocation10 + $0x8] sm:$0xff] }
  0xe2   :  { %499 = vperm.xlu1 %4479, %v477_v55   ;;  %568 = vperm.xlu0 %4478, %v541_v56   ;;  %v2370_v55 = vld [vmem:[#allocation10 + $0x98] sm:$0xff]  ;;  %v2353_v56 = vld [vmem:[#allocation10 + $0x10] sm:$0xff] }
  0xe6   :  { %502 = vperm.xlu1 %4479, %v478_v58   ;;  %573 = vperm.xlu0 %4478, %v542_v59   ;;  %v2354_v59 = vld [vmem:[#allocation10 + $0x18] sm:$0xff] }
  0xea   :  { %505 = vperm.xlu1 %4479, %v479_v60   ;;  %578 = vperm.xlu0 %4478, %v543_v61   ;;  %v2371_v60 = vld [vmem:[#allocation10 + $0xa0] sm:$0xff]  ;;  %v2372_v61 = vld [vmem:[#allocation10 + $0xa8] sm:$0xff] }
  0xee   :  { %508 = vperm.xlu1 %4479, %v480_v62   ;;  %583 = vperm.xlu0 %4478, %v544_v63   ;;  %v2355_v62 = vld [vmem:[#allocation10 + $0x20] sm:$0xff]  ;;  %v2356_v63 = vld [vmem:[#allocation10 + $0x28] sm:$0xff] }
  0xf2   :  { %511 = vperm.xlu1 %4479, %v481_v0   ;;  %588 = vperm.xlu0 %4478, %v545_v1   ;;  %v2373_v0 = vld [vmem:[#allocation10 + $0xb0] sm:$0xff] }
  0xf6   :  { %514 = vperm.xlu1 %4479, %v482_v2   ;;  %593 = vperm.xlu0 %4478, %v546_v3   ;;  %v2375_v3 = vld [vmem:[#allocation10 + $0xc0] sm:$0xff] }
  0xfa   :  { %517 = vperm.xlu1 %4479, %v483_v4   ;;  %598 = vperm.xlu0 %4478, %v547_v5   ;;  %v2376_v4 = vld [vmem:[#allocation10 + $0xc8] sm:$0xff]  ;;  %v2359_v5 = vld [vmem:[#allocation10 + $0x40] sm:$0xff] }
  0xfe   :  { %520 = vperm.xlu1 %4479, %v484_v7   ;;  %603 = vperm.xlu0 %4478, %v548_v8   ;;  %v2360_v7 = vld [vmem:[#allocation10 + $0x48] sm:$0xff]  ;;  %v2377_v8 = vld [vmem:[#allocation10 + $0xd0] sm:$0xff] }
 0x102   :  { %523 = vperm.xlu1 %4479, %v485_v10   ;;  %608 = vperm.xlu0 %4478, %v549_v11  }
 0x106   :  { %613 = vperm.xlu0 %4478, %v550_v16   ;;  %v2378_v16 = vld [vmem:[#allocation10 + $0xd8] sm:$0xff] }
 0x125   :  { %452 = vadd.xlane.f32.xlu0 %v451_v17  ;;  %v2361_v17 = vld [vmem:[#allocation10 + $0x50] sm:$0xff] }
 0x126   :  { %449 = vadd.xlane.f32.xlu1 %v448_v18 }
 0x129   :  { %455 = vadd.xlane.f32.xlu0 %v454_v20  ;;  %v2362_v20 = vld [vmem:[#allocation10 + $0x58] sm:$0xff] }
 0x12a   :  { %458 = vadd.xlane.f32.xlu1 %v457_v21 }
 0x12d   :  { %461 = vadd.xlane.f32.xlu0 %v460_v22  ;;  %v2379_v22 = vld [vmem:[#allocation10 + $0xe0] sm:$0xff] }
 0x12e   :  { %465 = vadd.xlane.f32.xlu1 %v464_v27  ;;  %v2380_v27 = vld [vmem:[#allocation10 + $0xe8] sm:$0xff] }
 0x139   :  { %v242_v28 = vpop.permute.xlu1 %241  ;;  %v236_v24 = vpop.permute.xlu0 %235 }
 0x13a   :  { %vm275_vm13 = vcmp.eq.s32.totalorder %v242_v28, %v5213_v29  ;;  %vm273_vm15 = vcmp.eq.s32.totalorder %v236_v24, %v5213_v29  ;;  %v2363_v28 = vld [vmem:[#allocation10 + $0x60] sm:$0xff] }
 0x13d   :  { %v245_v31 = vpop.permute.xlu1 %244  ;;  %v239_v34 = vpop.permute.xlu0 %238 }
 0x13e   :  { %vm274_vm12 = vcmp.eq.s32.totalorder %v239_v34, %v5213_v29  ;;  %vm276_vm14 = vcmp.eq.s32.totalorder %v245_v31, %v5213_v29  ;;  %v2364_v31 = vld [vmem:[#allocation10 + $0x68] sm:$0xff]  ;;  %v2381_v34 = vld [vmem:[#allocation10 + $0xf0] sm:$0xff] }
 0x13f   :  { %1934 = vperm.xlu1 %4479, %v1924_v30   ;;  %vm4107_vm1 = vmpackc.low %vm274_vm12, %vm273_vm15 }
 0x140   :  { %4108 = vmatprep.subr.msk.bf16.mxu0 %vm4107_vm1, %v6426_v35  ;;  %vm4111_vm2 = vmpackc.low %vm276_vm14, %vm275_vm13 }
 0x141   :  { %v251_v36 = vpop.permute.xlu1 %250  ;;  %v248_v37 = vpop.permute.xlu0 %247  ;;  %4110 = vmatpush3.bf16.msk.msra.mxu0 %vm4107_vm1, %v6426_v35 }
 0x142   :  { %vm278_vm3 = vcmp.eq.s32.totalorder %v251_v36, %v5213_v29  ;;  %vm277_vm4 = vcmp.eq.s32.totalorder %v248_v37, %v5213_v29  ;;  %4112 = vmatprep.subr.msk.bf16.mxu0 %vm4111_vm2, %v6426_v35  ;;  %v2382_v36 = vld [vmem:[#allocation10 + $0xf8] sm:$0xff] }
 0x143   :  { %1931 = vperm.xlu0 %4478, %v1923_v6   ;;  %1937 = vperm.xlu1 %4479, %v1925_v38   ;;  %vm4115_vm5 = vmpackc.low %vm278_vm3, %vm277_vm4  ;;  %v2365_v38 = vld [vmem:[#allocation10 + $0x70] sm:$0xff] }
 0x145   :  { %v257_v40 = vpop.permute.xlu1 %256  ;;  %v254_v41 = vpop.permute.xlu0 %253  ;;  %4114 = vmatpush3.bf16.msk.msra.mxu0 %vm4111_vm2, %v6426_v35 }
 0x146   :  { %vm280_vm6 = vcmp.eq.s32.totalorder %v257_v40, %v5213_v29  ;;  %vm279_vm9 = vcmp.eq.s32.totalorder %v254_v41, %v5213_v29  ;;  %4116 = vmatprep.subr.msk.bf16.mxu0 %vm4115_vm5, %v6426_v35  ;;  %v2415_v40 = vld [vmem:[#allocation10 + $0x200] sm:$0xff] }
 0x147   :  { %1940 = vperm.xlu0 %4478, %v1926_v39   ;;  %1943 = vperm.xlu1 %4479, %v1927_v42   ;;  %vm4119_vm11 = vmpackc.low %vm280_vm6, %vm279_vm9  ;;  %v2366_v39 = vld [vmem:[#allocation10 + $0x78] sm:$0xff] }
 0x149   :  { %v263_v44 = vpop.permute.xlu1 %262  ;;  %v260_v45 = vpop.permute.xlu0 %259  ;;  %4118 = vmatpush3.bf16.msk.msra.mxu0 %vm4115_vm5, %v6426_v35  ;;  %vm6447_vm5 = vcmask 359424  }
 0x14a   :  { %vm282_vm12 = vcmp.eq.s32.totalorder %v263_v44, %v5213_v29  ;;  %vm281_vm13 = vcmp.eq.s32.totalorder %v260_v45, %v5213_v29  ;;  %4120 = vmatprep.subr.msk.bf16.mxu0 %vm4119_vm11, %v6426_v35  ;;  %v2417_v44 = vld [vmem:[#allocation10 + $0x210] sm:$0xff] }
 0x14b   :  { %1946 = vperm.xlu0 %4478, %v1928_v43   ;;  %2488 = vperm.xlu1 %4479, %v2367_v47   ;;  %vm4123_vm14 = vmpackc.low %vm282_vm12, %vm281_vm13  ;;  %v2416_v43 = vld [vmem:[#allocation10 + $0x208] sm:$0xff]  ;;  %v2418_v47 = vld [vmem:[#allocation10 + $0x218] sm:$0xff] }
 0x14d   :  { %v269_v49 = vpop.permute.xlu1 %268  ;;  %v266_v50 = vpop.permute.xlu0 %265  ;;  %4122 = vmatpush3.bf16.msk.msra.mxu0 %vm4119_vm11, %v6426_v35 }
 0x14e   :  { %vm284_vm15 = vcmp.eq.s32.totalorder %v269_v49, %v5213_v29  ;;  %vm283_vm1 = vcmp.eq.s32.totalorder %v266_v50, %v5213_v29  ;;  %4124 = vmatprep.subr.msk.bf16.mxu0 %vm4123_vm14, %v6426_v35  ;;  %v2419_v49 = vld [vmem:[#allocation10 + $0x220] sm:$0xff]  ;;  %v2420_v50 = vld [vmem:[#allocation10 + $0x228] sm:$0xff] }
 0x14f   :  { %2491 = vperm.xlu0 %4478, %v2368_v48   ;;  %2440 = vperm.xlu1 %4479, %v2351_v51   ;;  %vm4127_vm2 = vmpackc.low %vm284_vm15, %vm283_vm1  ;;  %v2399_v51 = vld [vmem:[#allocation10 + $0x180] sm:$0xff] }
 0x151   :  { %v272_v53 = vpop.permute.xlu0 %271  ;;  %4126 = vmatpush3.bf16.msk.msra.mxu0 %vm4123_vm14, %v6426_v35  ;;  %v5274_v2 = vpop.permute.xlu1 %487 }
 0x152   :  { %vm285_vm3 = vcmp.eq.s32.totalorder %v272_v53, %v5213_v29  ;;  %4128 = vmatprep.subr.msk.bf16.mxu0 %vm4127_vm2, %v6426_v35 }
 0x153   :  { %2443 = vperm.xlu0 %4478, %v2352_v52   ;;  %2494 = vperm.xlu1 %4479, %v2369_v54   ;;  %v3477_v58 = vsel %vm285_vm3, 1.0, %v6428_v57  ;;  %v2400_v54 = vld [vmem:[#allocation10 + $0x188] sm:$0xff] }
 0x155   :  { %4130 = vmatpush3.bf16.msk.msra.mxu0 %vm4127_vm2, %v6426_v35  ;;  %v5272_v1 = vpop.permute.xlu0 %490 }
 0x156   :  { %3979 = vmatprep.subr.msk.mxu0 %vm349_vm8, %v3477_v58 }
 0x157   :  { %2497 = vperm.xlu0 %4478, %v2370_v55   ;;  %2446 = vperm.xlu1 %4479, %v2353_v56   ;;  %v2383_v55 = vld [vmem:[#allocation10 + $0x100] sm:$0xff] }
 0x159   :  { %3980 = vmatpush3.msk.msra.mxu0 %vm349_vm8, %v3477_v58  ;;  %v2384_v58 = vld [vmem:[#allocation10 + $0x108] sm:$0xff]  ;;  %vm525_vm8 = vcmp.eq.s32.totalorder %v5274_v2, %v5213_v29 }
 0x15a   :  { %3982 = vmatmul.mubr.msk.f32.vlgmr.msra.gmra.mrb[0].mxu0 %vm330_vm0, %v5047_v23  ;;  %v2374_v23 = vld [vmem:[#allocation10 + $0xb8] sm:$0xff] }
 0x15b   :  { %2449 = vperm.xlu0 %4478, %v2354_v59   ;;  %2500 = vperm.xlu1 %4479, %v2371_v60   ;;  %v2421_v60 = vld [vmem:[#allocation10 + $0x230] sm:$0xff] }
 0x15c   :  { %3984 = vmatprep.mubr.msk.f32.mxu0 %vm330_vm0, %v5051_v25  ;;  %v2357_v25 = vld [vmem:[#allocation10 + $0x30] sm:$0xff] }
 0x15e   :  { %3985 = vmatmul.mubr.msk.f32.gmra.mrb[2].mxu0 %vm330_vm0, %v5053_v26  ;;  %v2358_v26 = vld [vmem:[#allocation10 + $0x38] sm:$0xff] }
 0x15f   :  { %2503 = vperm.xlu0 %4478, %v2372_v61   ;;  %2452 = vperm.xlu1 %4479, %v2355_v62   ;;  %v2422_v61 = vld [vmem:[#allocation10 + $0x238] sm:$0xff]  ;;  %v2401_v62 = vld [vmem:[#allocation10 + $0x190] sm:$0xff] }
 0x160   :  { %3987 = vmatprep.mubr.msk.f32.mxu0 %vm330_vm0, %v5071_v32  ;;  %v5276_v32 = vpop.permute.xlu0 %558 }
 0x162   :  { %3988 = vmatmul.mubr.msk.f32.gmra.mrb[4].mxu0 %vm330_vm0, %v5073_v33  ;;  %v5278_v33 = vpop.permute.xlu1 %553  ;;  %vm526_vm0 = vcmp.eq.s32.totalorder %v5272_v1, %v5213_v29  ;;  %v2414_v1 = vld [vmem:[#allocation10 + $0x1f8] sm:$0xff] }
 0x163   :  { %2455 = vperm.xlu0 %4478, %v2356_v63   ;;  %2506 = vperm.xlu1 %4479, %v2373_v0  }
 0x164   :  { %1363 = vmatprep.mubr.f32.mxu0 %v6428_v57  ;;  %v5280_v10 = vpop.permute.xlu0 %563  ;;  %v2395_v57 = vld [vmem:[#allocation10 + $0x160] sm:$0xff] }
 0x166   :  { %v5282_v11 = vpop.permute.xlu1 %493 }
 0x167   :  { %2509 = vperm.xlu0 %4478, %v2374_v23   ;;  %2458 = vperm.xlu1 %4479, %v2357_v25   ;;  %v2402_v23 = vld [vmem:[#allocation10 + $0x198] sm:$0xff]  ;;  %v2385_v25 = vld [vmem:[#allocation10 + $0x110] sm:$0xff]  ;;  %vm527_vm4 = vcmp.eq.s32.totalorder %v5282_v11, %v5213_v29 }
 0x168   :  { %v5284_v18 = vpop.permute.xlu0 %568 }
 0x16a   :  { %v5286_v21 = vpop.permute.xlu1 %496 }
 0x16b   :  { %2461 = vperm.xlu0 %4478, %v2358_v26   ;;  %2512 = vperm.xlu1 %4479, %v2375_v3   ;;  %v2386_v3 = vld [vmem:[#allocation10 + $0x118] sm:$0xff]  ;;  %vm528_vm6 = vcmp.eq.s32.totalorder %v5286_v21, %v5213_v29 }
 0x16c   :  { %v5288_v24 = vpop.permute.xlu0 %573  ;;  %v619_v2 = vsel %vm528_vm6, %v5284_v18, 0.0  ;;  %v2398_v21 = vld [vmem:[#allocation10 + $0x178] sm:$0xff]  ;;  %v2435_v18 = vld [vmem:[#allocation10 + $0x2a0] sm:$0xff] }
 0x16e   :  { %v5290_v30 = vpop.permute.xlu1 %499 }
 0x16f   :  { %2515 = vperm.xlu0 %4478, %v2376_v4   ;;  %2464 = vperm.xlu1 %4479, %v2359_v5   ;;  %v2423_v5 = vld [vmem:[#allocation10 + $0x240] sm:$0xff]  ;;  %vm529_vm9 = vcmp.eq.s32.totalorder %v5290_v30, %v5213_v29 }
 0x170   :  { %v5292_v6 = vpop.permute.xlu0 %578 }
 0x172   :  { %v5294_v37 = vpop.permute.xlu1 %502 }
 0x173   :  { %2467 = vperm.xlu0 %4478, %v2360_v7   ;;  %2518 = vperm.xlu1 %4479, %v2377_v8   ;;  %v2424_v7 = vld [vmem:[#allocation10 + $0x248] sm:$0xff]  ;;  %v2403_v8 = vld [vmem:[#allocation10 + $0x1a0] sm:$0xff]  ;;  %vm530_vm11 = vcmp.eq.s32.totalorder %v5294_v37, %v5213_v29 }
 0x174   :  { %v5296_v41 = vpop.permute.xlu0 %583 }
 0x176   :  { %v5298_v42 = vpop.permute.xlu1 %505 }
 0x177   :  { %2521 = vperm.xlu0 %4478, %v2378_v16   ;;  %2470 = vperm.xlu1 %4479, %v2361_v17   ;;  %vm531_vm12 = vcmp.eq.s32.totalorder %v5298_v42, %v5213_v29 }
 0x178   :  { %v5300_v45 = vpop.permute.xlu0 %588 }
 0x17a   :  { %v5302_v48 = vpop.permute.xlu1 %508 }
 0x17b   :  { %2473 = vperm.xlu0 %4478, %v2362_v20   ;;  %2524 = vperm.xlu1 %4479, %v2379_v22   ;;  %v2404_v22 = vld [vmem:[#allocation10 + $0x1a8] sm:$0xff]  ;;  %vm532_vm13 = vcmp.eq.s32.totalorder %v5302_v48, %v5213_v29 }
 0x17c   :  { %v5304_v52 = vpop.permute.xlu0 %593 }
 0x17e   :  { %v5306_v53 = vpop.permute.xlu1 %511 }
 0x17f   :  { %2527 = vperm.xlu0 %4478, %v2380_v27   ;;  %2476 = vperm.xlu1 %4479, %v2363_v28   ;;  %v2387_v28 = vld [vmem:[#allocation10 + $0x120] sm:$0xff]  ;;  %vm533_vm14 = vcmp.eq.s32.totalorder %v5306_v53, %v5213_v29 }
 0x180   :  { %v5308_v56 = vpop.permute.xlu0 %598 }
 0x182   :  { %v5310_v59 = vpop.permute.xlu1 %514 }
 0x183   :  { %2479 = vperm.xlu0 %4478, %v2364_v31   ;;  %2530 = vperm.xlu1 %4479, %v2381_v34   ;;  %vm534_vm15 = vcmp.eq.s32.totalorder %v5310_v59, %v5213_v29 }
 0x184   :  { %v5312_v63 = vpop.permute.xlu0 %603 }
 0x186   :  { %v5314_v0 = vpop.permute.xlu1 %517 }
 0x187   :  { %2533 = vperm.xlu0 %4478, %v2382_v36   ;;  %2482 = vperm.xlu1 %4479, %v2365_v38   ;;  %vm535_vm1 = vcmp.eq.s32.totalorder %v5314_v0, %v5213_v29 }
 0x188   :  { %v5316_v26 = vpop.permute.xlu0 %608 }
 0x18a   :  { %v5318_v4 = vpop.permute.xlu1 %520 }
 0x18b   :  { %2485 = vperm.xlu0 %4478, %v2366_v39   ;;  %2632 = vperm.xlu1 %4479, %v2415_v40   ;;  %v2388_v39 = vld [vmem:[#allocation10 + $0x128] sm:$0xff]  ;;  %vm536_vm2 = vcmp.eq.s32.totalorder %v5318_v4, %v5213_v29 }
 0x18c   :  { %v5320_v16 = vpop.permute.xlu0 %613 }
 0x18e   :  { %v5322_v17 = vpop.permute.xlu1 %523 }
 0x18f   :  { %2635 = vperm.xlu0 %4478, %v2416_v43   ;;  %2638 = vperm.xlu1 %4479, %v2417_v44   ;;  %v2425_v43 = vld [vmem:[#allocation10 + $0x250] sm:$0xff]  ;;  %vm537_vm3 = vcmp.eq.s32.totalorder %v5322_v17, %v5213_v29 }
 0x193   :  { %2641 = vperm.xlu0 %4478, %v2418_v47   ;;  %2644 = vperm.xlu1 %4479, %v2419_v49  }
 0x197   :  { %2647 = vperm.xlu0 %4478, %v2420_v50   ;;  %2584 = vperm.xlu1 %4479, %v2399_v51   ;;  %v2426_v51 = vld [vmem:[#allocation10 + $0x258] sm:$0xff] }
 0x19b   :  { %2587 = vperm.xlu0 %4478, %v2400_v54   ;;  %2536 = vperm.xlu1 %4479, %v2383_v55   ;;  %v2405_v55 = vld [vmem:[#allocation10 + $0x1b0] sm:$0xff] }
 0x19f   :  { %2539 = vperm.xlu0 %4478, %v2384_v58   ;;  %2650 = vperm.xlu1 %4479, %v2421_v60  }
 0x1a3   :  { %2653 = vperm.xlu0 %4478, %v2422_v61   ;;  %2590 = vperm.xlu1 %4479, %v2401_v62   ;;  %v2406_v62 = vld [vmem:[#allocation10 + $0x1b8] sm:$0xff] }
 0x1a6   :  { %v4008_v20 = vpop.f32.mrb[0].mxu1 }
 0x1a7   :  { %2593 = vperm.xlu0 %4478, %v2402_v23   ;;  %2542 = vperm.xlu1 %4479, %v2385_v25   ;;  %v798_v27 = vpop.f32.mrb[1].mxu1  ;;  %v2389_v23 = vld [vmem:[#allocation10 + $0x130] sm:$0xff] }
 0x1a8   :  { %v4149_v31 = vpack.c.bf16 %v4008_v20, %v798_v27  ;;  %v2428_v20 = vld [vmem:[#allocation10 + $0x268] sm:$0xff] }
 0x1aa   :  { %v4011_v38 = vpop.f32.mrb[2].mxu1  ;;  %4150 = vmatprep.subr.bf16.mxu1 %v4149_v31 }
 0x1ab   :  { %2545 = vperm.xlu0 %4478, %v2386_v3   ;;  %2656 = vperm.xlu1 %4479, %v2423_v5   ;;  %v808_v40 = vpop.f32.mrb[3].mxu1  ;;  %v2390_v3 = vld [vmem:[#allocation10 + $0x138] sm:$0xff]  ;;  %v2427_v5 = vld [vmem:[#allocation10 + $0x260] sm:$0xff] }
 0x1ac   :  { %4152 = vmatpush3.bf16.msra.mxu1 %v4149_v31  ;;  %v4153_v44 = vpack.c.bf16 %v4011_v38, %v808_v40  ;;  %v2408_v31 = vld [vmem:[#allocation10 + $0x1c8] sm:$0xff]  ;;  %v2391_v38 = vld [vmem:[#allocation10 + $0x140] sm:$0xff] }
 0x1ae   :  { %v4014_v50 = vpop.f32.mrb[4].mxu1  ;;  %4154 = vmatprep.subr.bf16.mxu1 %v4153_v44 }
 0x1af   :  { %2659 = vperm.xlu0 %4478, %v2424_v7   ;;  %2596 = vperm.xlu1 %4479, %v2403_v8   ;;  %v818_v54 = vpop.f32.mrb[5].mxu1 }
 0x1b0   :  { %4156 = vmatpush3.bf16.msra.mxu1 %v4153_v44  ;;  %v4157_v58 = vpack.c.bf16 %v4014_v50, %v818_v54  ;;  %v2429_v44 = vld [vmem:[#allocation10 + $0x270] sm:$0xff]  ;;  %v2430_v54 = vld [vmem:[#allocation10 + $0x278] sm:$0xff] }
 0x1b2   :  { %v5324_v34 = vpop.xlane.xlu0 %452  ;;  %4159 = vmatprep.subr.msk.bf16.mxu1 %vm5104_vm10, %v4157_v58 }
 0x1b3   :  { %2599 = vperm.xlu0 %4478, %v2404_v22   ;;  %v5326_v36 = vpop.xlane.xlu1 %449  ;;  %2548 = vperm.xlu1 %4479, %v2387_v28   ;;  %v2407_v22 = vld [vmem:[#allocation10 + $0x1c0] sm:$0xff] }
 0x1b4   :  { %4162 = vmatpush3.bf16.msk.msra.mxu1 %vm5104_vm10, %v4157_v58 }
 0x1b6   :  { %v5328_v47 = vpop.xlane.xlu0 %455 }
 0x1b7   :  { %2551 = vperm.xlu0 %4478, %v2388_v39   ;;  %v5330_v49 = vpop.xlane.xlu1 %458  ;;  %2662 = vperm.xlu1 %4479, %v2425_v43   ;;  %v2392_v43 = vld [vmem:[#allocation10 + $0x148] sm:$0xff] }
 0x1ba   :  { %v5336_v61 = vpop.xlane.xlu0 %461 }
 0x1bb   :  { %2665 = vperm.xlu0 %4478, %v2426_v51   ;;  %v5332_v60 = vpop.xlane.xlu1 %465  ;;  %2602 = vperm.xlu1 %4479, %v2405_v55   ;;  %v2409_v55 = vld [vmem:[#allocation10 + $0x1d0] sm:$0xff] }
 0x1bf   :  { %2605 = vperm.xlu0 %4478, %v2406_v62   ;;  %v5340_v25 = vpop.permute.xlu1 %1934  ;;  %2554 = vperm.xlu1 %4479, %v2389_v23   ;;  %v2410_v23 = vld [vmem:[#allocation10 + $0x1d8] sm:$0xff] }
 0x1c0   :  { %6467 = vst [vmem:[#allocation22_spill] sm:$0xff] %v5340_v25 }
 0x1c2   :  { %v5342_v7 = vpop.permute.xlu0 %1931 }
 0x1c3   :  { %6468 = vst [vmem:[#allocation23_spill] sm:$0xff] %v5342_v7  ;;  %2557 = vperm.xlu0 %4478, %v2390_v3   ;;  %v5344_v8 = vpop.permute.xlu1 %1937  ;;  %2668 = vperm.xlu1 %4479, %v2427_v5   ;;  %v2393_v3 = vld [vmem:[#allocation10 + $0x150] sm:$0xff] }
 0x1c4   :  { %6469 = vst [vmem:[#allocation24_spill] sm:$0xff] %v5344_v8  ;;  %v617_v8 = vsel %vm526_vm0, %v5276_v32, 0.0  ;;  %vm653_vm0 = vcmask 355328  }
 0x1c5   :  { %v631_v32 = vsel %vm6447_vm5, %v617_v8, 0.0  ;;  %v620_v8 = vsel %vm529_vm9, %v5288_v24, 0.0 }
 0x1c6   :  { %v5346_v27 = vpop.permute.xlu0 %1940  ;;  %v637_v30 = vsel %vm6447_vm5, %v620_v8, 0.0  ;;  %v624_v8 = vsel %vm533_vm14, %v5304_v52, 0.0 }
 0x1c7   :  { %6470 = vst [vmem:[#allocation25_spill] sm:$0xff] %v5346_v27  ;;  %2671 = vperm.xlu0 %4478, %v2428_v20   ;;  %v5348_v28 = vpop.permute.xlu1 %1943  ;;  %2608 = vperm.xlu1 %4479, %v2407_v22   ;;  %v2394_v22 = vld [vmem:[#allocation10 + $0x158] sm:$0xff]  ;;  %v645_v53 = vsel %vm6447_vm5, %v624_v8, 0.0 }
 0x1c8   :  { %6471 = vst [vmem:[#allocation26_spill] sm:$0xff] %v5348_v28  ;;  %v2433_v28 = vld [vmem:[#allocation10 + $0x290] sm:$0xff] }
 0x1ca   :  { %v5350_v39 = vpop.permute.xlu0 %1946 }
 0x1cb   :  { %6472 = vst [vmem:[#allocation27_spill] sm:$0xff] %v5350_v39  ;;  %2611 = vperm.xlu0 %4478, %v2408_v31   ;;  %v5352_v40 = vpop.permute.xlu1 %2488  ;;  %2560 = vperm.xlu1 %4479, %v2391_v38   ;;  %v2431_v31 = vld [vmem:[#allocation10 + $0x280] sm:$0xff] }
 0x1ce   :  { %v5354_v50 = vpop.permute.xlu0 %2491 }
 0x1cf   :  { %2563 = vperm.xlu0 %4478, %v2392_v43   ;;  %v5356_v51 = vpop.permute.xlu1 %2440  ;;  %2674 = vperm.xlu1 %4479, %v2429_v44   ;;  %v2432_v44 = vld [vmem:[#allocation10 + $0x288] sm:$0xff] }
 0x1d2   :  { %v5358_v58 = vpop.permute.xlu0 %2443 }
 0x1d3   :  { %2677 = vperm.xlu0 %4478, %v2430_v54   ;;  %v5360_v62 = vpop.permute.xlu1 %2494  ;;  %2614 = vperm.xlu1 %4479, %v2409_v55   ;;  %v2411_v54 = vld [vmem:[#allocation10 + $0x1e0] sm:$0xff] }
 0x1d6   :  { %v5362_v5 = vpop.permute.xlu0 %2497 }
 0x1d7   :  { %2617 = vperm.xlu0 %4478, %v2410_v23   ;;  %v5364_v20 = vpop.permute.xlu1 %2446  ;;  %2566 = vperm.xlu1 %4479, %v2393_v3   ;;  %v2412_v23 = vld [vmem:[#allocation10 + $0x1e8] sm:$0xff] }
 0x1da   :  { %v5366_v38 = vpop.permute.xlu0 %2449 }
 0x1db   :  { %2569 = vperm.xlu0 %4478, %v2394_v22   ;;  %v5368_v43 = vpop.permute.xlu1 %2500  ;;  %2680 = vperm.xlu1 %4479, %v2431_v31   ;;  %v2396_v22 = vld [vmem:[#allocation10 + $0x168] sm:$0xff] }
 0x1de   :  { %v5370_v35 = vpop.permute.xlu0 %2503 }
 0x1df   :  { %2683 = vperm.xlu0 %4478, %v2432_v44   ;;  %v5372_v55 = vpop.permute.xlu1 %2452  ;;  %2620 = vperm.xlu1 %4479, %v2411_v54   ;;  %v2434_v44 = vld [vmem:[#allocation10 + $0x298] sm:$0xff]  ;;  %v2413_v54 = vld [vmem:[#allocation10 + $0x1f0] sm:$0xff] }
 0x1e2   :  { %v5374_v39 = vpop.permute.xlu0 %2455 }
 0x1e3   :  { %2623 = vperm.xlu0 %4478, %v2412_v23   ;;  %v5376_v3 = vpop.permute.xlu1 %2506  ;;  %2572 = vperm.xlu1 %4479, %v2395_v57   ;;  %v618_v23 = vsel %vm527_vm4, %v5280_v10, 0.0 }
 0x1e6   :  { %v5378_v27 = vpop.permute.xlu0 %2509 }
 0x1e7   :  { %2575 = vperm.xlu0 %4478, %v2396_v22   ;;  %v5380_v31 = vpop.permute.xlu1 %2458  ;;  %2686 = vperm.xlu1 %4479, %v2433_v28   ;;  %v616_v28 = vsel %vm525_vm8, %v5278_v33, 0.0  ;;  %v2397_v22 = vld [vmem:[#allocation10 + $0x170] sm:$0xff] }
 0x1e8   :  { %v630_v11 = vsel %vm6447_vm5, %v616_v28, 0.0 }
 0x1e9   :  { %v632_v10 = vadd.f32 %v631_v32, %v630_v11  ;;  %v622_v32 = vsel %vm531_vm12, %v5296_v41, 0.0  ;;  %v623_v11 = vsel %vm532_vm13, %v5300_v45, 0.0 }
 0x1ea   :  { %v5385_v25 = vpop.permute.xlu0 %2461  ;;  %v641_v42 = vsel %vm6447_vm5, %v622_v32, 0.0  ;;  %v643_v48 = vsel %vm6447_vm5, %v623_v11, 0.0 }
 0x1eb   :  { %2689 = vperm.xlu0 %4478, %v2434_v44   ;;  %v5391_v57 = vpop.permute.xlu1 %2512  ;;  %2626 = vperm.xlu1 %4479, %v2413_v54   ;;  %v633_v44 = vsel %vm6447_vm5, %v618_v23, 0.0  ;;  %v635_v54 = vsel %vm6447_vm5, %v619_v2, 0.0  ;;  %v621_v23 = vsel %vm530_vm11, %v5292_v6, 0.0  ;;  %v2437_v6 = vld [vmem:[#allocation10 + $0x2b0] sm:$0xff] }
 0x1ec   :  { %6473 = vst [vmem:[#allocation28_spill] sm:$0xff] %v5391_v57  ;;  %v634_v28 = vadd.f32 %v633_v44, %v632_v10  ;;  %v639_v37 = vsel %vm6447_vm5, %v621_v23, 0.0  ;;  %v626_v23 = vsel %vm535_vm1, %v5312_v63, 0.0  ;;  %v628_v63 = vsel %vm537_vm3, %v5320_v16, 0.0 }
 0x1ed   :  { %v649_v32 = vsel %vm6447_vm5, %v626_v23, 0.0 }
 0x1ee   :  { %v5399_v7 = vpop.permute.xlu0 %2515 }
 0x1ef   :  { %2629 = vperm.xlu0 %4478, %v2414_v1   ;;  %v5405_v33 = vpop.permute.xlu1 %2464  ;;  %2578 = vperm.xlu1 %4479, %v2397_v22   ;;  %v636_v1 = vadd.f32 %v635_v54, %v634_v28  ;;  %v2436_v22 = vld [vmem:[#allocation10 + $0x2a8] sm:$0xff]  ;;  %v625_v54 = vsel %vm534_vm15, %v5308_v56, 0.0  ;;  %v627_v56 = vsel %vm536_vm2, %v5316_v26, 0.0 }
 0x1f1   :  { %v638_v2 = vadd.f32 %v637_v30, %v636_v1  ;;  %v647_v30 = vsel %vm6447_vm5, %v625_v54, 0.0 }
 0x1f2   :  { %v5412_v57 = vpop.permute.xlu0 %2467 }
 0x1f3   :  { %2581 = vperm.xlu0 %4478, %v2398_v21   ;;  %v5417_v24 = vpop.permute.xlu1 %2518  ;;  %2692 = vperm.xlu1 %4479, %v2435_v18   ;;  %v640_v10 = vadd.f32 %v639_v37, %v638_v2  ;;  %v2438_v21 = vld [vmem:[#allocation10 + $0x2b8] sm:$0xff]  ;;  %v651_v37 = vsel %vm6447_vm5, %v627_v56, 0.0  ;;  %v654_v2 = vsel %vm653_vm0, %v628_v63, 0.0  ;;  %v6480_v63 = vmov 0 }
 0x1f4   :  { %vm313_vm0 = vcmp.eq.s32.totalorder %v5011_v12, %v5213_v29 }
 0x1f5   :  { %v642_v45 = vadd.f32 %v641_v42, %v640_v10 }
 0x1f6   :  { %v5424_v44 = vpop.permute.xlu0 %2521 }
 0x1f7   :  { %2695 = vperm.xlu0 %4478, %v2436_v22   ;;  %v5429_v41 = vpop.permute.xlu1 %2470  ;;  %2698 = vperm.xlu1 %4479, %v2437_v6   ;;  %v644_v52 = vadd.f32 %v643_v48, %v642_v45 }
 0x1f9   :  { %v646_v59 = vadd.f32 %v645_v53, %v644_v52  ;;  %v6474_v53 = vmov 0 }
 0x1fa   :  { %v5436_v18 = vpop.permute.xlu0 %2473 }
 0x1fb   :  { %2701 = vperm.xlu0 %4478, %v2438_v21   ;;  %v5441_v28 = vpop.permute.xlu1 %2524  ;;  %v648_v22 = vadd.f32 %v647_v30, %v646_v59  ;;  %v6477_v59 = vmov 0 }
 0x1fd   :  { %v650_v6 = vadd.f32 %v649_v32, %v648_v22 }
 0x1fe   :  { %v5448_v1 = vpop.permute.xlu0 %2527 }
 0x1ff   :  { %v5453_v0 = vpop.permute.xlu1 %2476  ;;  %v652_v11 = vadd.f32 %v651_v37, %v650_v6 }
 0x201   :  { %v655_v42 = vadd.f32 %v654_v2, %v652_v11 }
 0x202   :  { %v5457_v4 = vpop.permute.xlu0 %2479 }
 0x203   :  { %v5459_v26 = vpop.permute.xlu1 %2530  ;;  %v656_v17 = vrot.slane %v655_v42, 4 }
 0x205   :  { %v657_v45 = vadd.f32 %v656_v17, %v655_v42  ;;  %v468_v17 = vadd.f32 1.0, %v5324_v34 }
 0x206   :  { %v5461_v10 = vpop.permute.xlu0 %2533 }
 0x207   :  { %v5463_v8 = vpop.permute.xlu1 %2482  ;;  %v658_v52 = vrot.slane %v657_v45, 2  ;;  %4480 = vrsqrt.f32 %v468_v17 }
 0x209   :  { %v659_v56 = vadd.f32 %v658_v52, %v657_v45  ;;  %v467_v45 = vadd.f32 1.0, %v5326_v36  ;;  %v470_v52 = vadd.f32 1.0, %v5330_v49  ;;  %v5508_v36 = vadd.f32 1.0, %v5332_v60 }
 0x20a   :  { %v5465_v21 = vpop.permute.xlu0 %2485  ;;  %v6491_v60 = vmov 0.0  }
 0x20b   :  { %v2633_v48 = vpop.permute.xlu1 %2632  ;;  %v660_v37 = vrot.slane %v659_v56, 1  ;;  %4482 = vrsqrt.f32 %v467_v45 }
 0x20c   :  { %vm2767_vm8 = vcmp.eq.s32.totalorder %v2633_v48, %v5213_v29 }
 0x20d   :  { %v661_v11 = vadd.f32 %v660_v37, %v659_v56  ;;  %v6485_v56 = vmov 0 }
 0x20e   :  { %v2636_v16 = vpop.permute.xlu0 %2635 }
 0x20f   :  { %vm2768_vm4 = vcmp.eq.s32.totalorder %v2636_v16, %v5213_v29  ;;  %v2639_v54 = vpop.permute.xlu1 %2638  ;;  %v662_v16 = vadd.f32 1.0, %v661_v11  ;;  %v3479_v11 = vsel %vm313_vm0, 1.0, %v6491_v60  ;;  %vm317_vm0 = vcmp.eq.s32.totalorder %v5032_v19, %v5213_v29 }
 0x210   :  { %vm5469_vm6 = vmpackc.low %vm2768_vm4, %vm2767_vm8  ;;  %vm2769_vm9 = vcmp.eq.s32.totalorder %v2639_v54, %v5213_v29  ;;  %vm312_vm8 = vcmp.eq.s32.totalorder %v5002_v9, %v5213_v29  ;;  %vm315_vm4 = vcmp.eq.s32.totalorder %v5017_v14, %v5213_v29 }
 0x211   :  { %v6475_v53 = vsel %vm5469_vm6, 4294967295, %v6474_v53  ;;  %4484 = vrsqrt.f32 %v662_v16  ;;  %v3481_v14 = vsel %vm315_vm4, 1.0, %v6491_v60  ;;  %vm316_vm4 = vcmp.eq.s32.totalorder %v5020_v15, %v5213_v29 }
 0x212   :  { %6476 = vst [vmem:[#allocation29_spill] sm:$0xff] %v6475_v53  ;;  %v2642_v23 = vpop.permute.xlu0 %2641  ;;  %4486 = vrsqrt.f32 %v470_v52 }
 0x213   :  { %vm2770_vm11 = vcmp.eq.s32.totalorder %v2642_v23, %v5213_v29  ;;  %v2645_v30 = vpop.permute.xlu1 %2644 }
 0x214   :  { %vm5475_vm12 = vmpackc.low %vm2770_vm11, %vm2769_vm9  ;;  %vm2771_vm13 = vcmp.eq.s32.totalorder %v2645_v30, %v5213_v29  ;;  %v469_v30 = vadd.f32 1.0, %v5328_v47  ;;  %vm664_vm9 = vcmp.gt.f32.partialorder %v468_v17, 0.0  ;;  %vm314_vm11 = vcmp.eq.s32.totalorder %v5014_v13, %v5213_v29 }
 0x215   :  { %v6478_v59 = vsel %vm5475_vm12, 4294967295, %v6477_v59 }
 0x216   :  { %6479 = vst [vmem:[#allocation30_spill] sm:$0xff] %v6478_v59  ;;  %v2648_v32 = vpop.permute.xlu0 %2647  ;;  %4488 = vrsqrt.f32 %v469_v30 }
 0x217   :  { %vm2772_vm14 = vcmp.eq.s32.totalorder %v2648_v32, %v5213_v29  ;;  %v5481_v22 = vpop.permute.xlu1 %2584  ;;  %v5513_v32 = vadd.f32 1.0, %v5336_v61  ;;  %4490 = vrsqrt.f32 %v5508_v36  ;;  %v4481_v61 = vpop.eup %4480 }
 0x218   :  { %vm5483_vm15 = vmpackc.low %vm2772_vm14, %vm2771_vm13  ;;  %v4483_v12 = vpop.eup %4482  ;;  %vm663_vm13 = vcmp.gt.f32.partialorder %v467_v45, 0.0 }
 0x219   :  { %v6481_v63 = vsel %vm5483_vm15, 4294967295, %v6480_v63  ;;  %4492 = vrsqrt.f32 %v5513_v32 }
 0x21a   :  { %6482 = vst [vmem:[#allocation31_spill] sm:$0xff] %v6481_v63  ;;  %v5487_v6 = vpop.permute.xlu0 %2587 }
 0x21b   :  { %v5489_v2 = vpop.permute.xlu1 %2536  ;;  %v4485_v17 = vpop.eup %4484 }
 0x21c   :  { %6483 = vst [vmem:[#allocation32_spill] sm:$0xff] %v5489_v2 }
 0x21e   :  { %v5491_v42 = vpop.permute.xlu0 %2539 }
 0x21f   :  { %v2651_v48 = vpop.permute.xlu1 %2650 }
 0x220   :  { %vm2773_vm1 = vcmp.eq.s32.totalorder %v2651_v48, %v5213_v29  ;;  %v3478_v48 = vsel %vm312_vm8, 1.0, %v6491_v60  ;;  %vm666_vm8 = vcmp.gt.f32.partialorder %v470_v52, 0.0 }
 0x222   :  { %v2654_v54 = vpop.permute.xlu0 %2653 }
 0x223   :  { %vm2774_vm2 = vcmp.eq.s32.totalorder %v2654_v54, %v5213_v29  ;;  %v5498_v23 = vpop.permute.xlu1 %2590 }
 0x224   :  { %6484 = vst [vmem:[#allocation33_spill] sm:$0xff] %v5498_v23  ;;  %vm5501_vm3 = vmpackc.low %vm2774_vm2, %vm2773_vm1  ;;  %v3480_v23 = vsel %vm314_vm11, 1.0, %v6491_v60  ;;  %vm668_vm11 = vcmp.gt.f32.partialorder %v5508_v36, 0.0 }
 0x225   :  { %v6486_v56 = vsel %vm5501_vm3, 4294967295, %v6485_v56 }
 0x226   :  { %6487 = vst [vmem:[#allocation34_spill] sm:$0xff] %v6486_v56  ;;  %v5505_v34 = vpop.permute.xlu0 %2593 }
 0x227   :  { %6488 = vst [vmem:[#allocation35_spill] sm:$0xff] %v5505_v34  ;;  %v5510_v49 = vpop.permute.xlu1 %2542 }
 0x228   :  { %6489 = vst [vmem:[#allocation36_spill] sm:$0xff] %v5510_v49  ;;  %v676_v49 = vsel %vm664_vm9, %v4481_v61, 0.0  ;;  %vm681_vm9 = vcmp.gt.f32.partialorder %v662_v16, 0.0 }
 0x22a   :  { %v5517_v47 = vpop.permute.xlu0 %2545 }
 0x22b   :  { %6490 = vst [vmem:[#allocation37_spill] sm:$0xff] %v5517_v47  ;;  %v2657_v37 = vpop.permute.xlu1 %2656  ;;  %v6493_v47 = vmov 0 }
 0x22c   :  { %vm2775_vm14 = vcmp.eq.s32.totalorder %v2657_v37, %v5213_v29  ;;  %v4487_v37 = vpop.eup %4486 }
 0x22d   :  { %v3983_v54 = vpop.f32.mrb[0].mxu0  ;;  %v678_v15 = vsel %vm666_vm8, %v4487_v37, 0.0 }
 0x22e   :  { %v2660_v56 = vpop.permute.xlu0 %2659  ;;  %v425_v63 = vadd.f32 %v3983_v54, %v3479_v11  ;;  %v419_v59 = vpop.f32.mrb[1].mxu0  ;;  %v675_v11 = vsel %vm663_vm13, %v4483_v12, 0.0  ;;  %vm667_vm13 = vcmp.gt.f32.partialorder %v5513_v32, 0.0 }
 0x22f   :  { %vm2776_vm1 = vcmp.eq.s32.totalorder %v2660_v56, %v5213_v29  ;;  %v5531_v53 = vpop.permute.xlu1 %2596  ;;  %v420_v13 = vadd.f32 %v3478_v48, %v419_v59  ;;  %v4489_v54 = vpop.eup %4488  ;;  %v683_v59 = vsel %vm681_vm9, %v4485_v17, 0.0  ;;  %v6572_v46 = vld [vmem:[#allocation36_spill] sm:$0xff] }
 0x230   :  { %6492 = vst [vmem:[#allocation38_spill] sm:$0xff] %v5531_v53  ;;  %vm5534_vm2 = vmpackc.low %vm2776_vm1, %vm2775_vm14  ;;  %v685_v56 = vmul.f32 %v676_v49, %v425_v63  ;;  %vm665_vm14 = vcmp.gt.f32.partialorder %v469_v30, 0.0  ;;  %v3483_v63 = vsel %vm317_vm0, 1.0, %v6491_v60  ;;  %v3482_v49 = vsel %vm316_vm4, 1.0, %v6491_v60  ;;  %v4491_v12 = vpop.eup %4490 }
 0x231   :  { %v6494_v47 = vsel %vm5534_vm2, 4294967295, %v6493_v47  ;;  %v684_v61 = vmul.f32 %v675_v11, %v420_v13  ;;  %v3986_v53 = vpop.f32.mrb[2].mxu0  ;;  %v4493_v13 = vpop.eup %4492  ;;  %v680_v30 = vsel %vm668_vm11, %v4491_v12, 0.0 }
 0x232   :  { %6495 = vst [vmem:[#allocation39_spill] sm:$0xff] %v6494_v47  ;;  %v5544_v47 = vpop.permute.xlu0 %2599  ;;  %v435_v48 = vadd.f32 %v3986_v53, %v3481_v14  ;;  %v429_v2 = vpop.f32.mrb[3].mxu0  ;;  %v5557_v17 = vmul.f32 %v685_v56, %v683_v59  ;;  %v677_v14 = vsel %vm665_vm14, %v4489_v54, 0.0 }
 0x233   :  { %v5546_v34 = vpop.permute.xlu1 %2548  ;;  %v5552_v45 = vmul.f32 %v684_v61, %v683_v59  ;;  %v430_v16 = vadd.f32 %v3480_v23, %v429_v2  ;;  %v679_v61 = vsel %vm667_vm13, %v4493_v13, 0.0 }
 0x234   :  { %6496 = vst [vmem:[#allocation40_spill] sm:$0xff] %v5546_v34  ;;  %v687_v53 = vmul.f32 %v678_v15, %v435_v48 }
 0x235   :  { %v686_v19 = vmul.f32 %v677_v14, %v430_v16  ;;  %v3989_v11 = vpop.f32.mrb[4].mxu0  ;;  %4027 = vmatprep.mubr.msk.f32.mxu1 %vm6447_vm5, %v5552_v45 }
 0x236   :  { %v5563_v52 = vpop.permute.xlu0 %2551  ;;  %v445_v2 = vadd.f32 %v3989_v11, %v3483_v63  ;;  %v439_v23 = vpop.f32.mrb[5].mxu0  ;;  %4028 = vmatmul.mubr.msk.f32.vlgmr.msra.gmra.mrb[6].mxu1 %vm6447_vm5, %v5557_v17  ;;  %v5569_v54 = vmul.f32 %v687_v53, %v683_v59 }
 0x237   :  { %6497 = vst [vmem:[#allocation41_spill] sm:$0xff] %v5563_v52  ;;  %v2663_v36 = vpop.permute.xlu1 %2662  ;;  %v5567_v37 = vmul.f32 %v686_v19, %v683_v59  ;;  %v440_v56 = vadd.f32 %v3482_v49, %v439_v23  ;;  %v6499_v49 = vmov 0 }
 0x238   :  { %v689_v32 = vmul.f32 %v680_v30, %v445_v2  ;;  %vm2777_vm1 = vcmp.eq.s32.totalorder %v2663_v36, %v5213_v29  ;;  %v6506_v2 = vmov 0 }
 0x239   :  { %v688_v48 = vmul.f32 %v679_v61, %v440_v56  ;;  %4030 = vmatprep.mubr.msk.f32.mxu1 %vm6447_vm5, %v5567_v37 }
 0x23a   :  { %v2666_v15 = vpop.permute.xlu0 %2665  ;;  %4031 = vmatmul.mubr.msk.f32.gmra.mrb[8].mxu1 %vm6447_vm5, %v5569_v54  ;;  %v5585_v12 = vmul.f32 %v689_v32, %v683_v59 }
 0x23b   :  { %vm2778_vm0 = vcmp.eq.s32.totalorder %v2666_v15, %v5213_v29  ;;  %v5577_v63 = vpop.permute.xlu1 %2602  ;;  %v5579_v16 = vmul.f32 %v688_v48, %v683_v59  ;;  %v6513_v48 = vmov 0 }
 0x23c   :  { %6498 = vst [vmem:[#allocation42_spill] sm:$0xff] %v5577_v63  ;;  %vm5581_vm8 = vmpackc.low %vm2778_vm0, %vm2777_vm1 }
 0x23d   :  { %v6500_v49 = vsel %vm5581_vm8, 4294967295, %v6499_v49  ;;  %4033 = vmatprep.mubr.msk.f32.mxu1 %vm6447_vm5, %v5579_v16  ;;  %vm2734_vm8 = vcmp.eq.s32.totalorder %v5461_v10, %v5213_v29 }
 0x23e   :  { %6501 = vst [vmem:[#allocation43_spill] sm:$0xff] %v6500_v49  ;;  %v5589_v53 = vpop.permute.xlu0 %2605  ;;  %4034 = vmatmul.mubr.msk.f32.gmra.mrb[10].mxu1 %vm6447_vm5, %v5585_v12 }
 0x23f   :  { %6502 = vst [vmem:[#allocation44_spill] sm:$0xff] %v5589_v53  ;;  %v5593_v14 = vpop.permute.xlu1 %2554 }
 0x240   :  { %6503 = vst [vmem:[#allocation45_spill] sm:$0xff] %v5593_v14 }
 0x242   :  { %v5595_v13 = vpop.permute.xlu0 %2557 }
 0x243   :  { %6504 = vst [vmem:[#allocation46_spill] sm:$0xff] %v5595_v13  ;;  %v2669_v19 = vpop.permute.xlu1 %2668 }
 0x244   :  { %vm2779_vm4 = vcmp.eq.s32.totalorder %v2669_v19, %v5213_v29 }
 0x246   :  { %v2672_v11 = vpop.permute.xlu0 %2671 }
 0x247   :  { %vm2780_vm9 = vcmp.eq.s32.totalorder %v2672_v11, %v5213_v29  ;;  %v5599_v59 = vpop.permute.xlu1 %2608 }
 0x248   :  { %6505 = vst [vmem:[#allocation47_spill] sm:$0xff] %v5599_v59  ;;  %vm5601_vm14 = vmpackc.low %vm2780_vm9, %vm2779_vm4 }
 0x249   :  { %v6507_v2 = vsel %vm5601_vm14, 4294967295, %v6506_v2  ;;  %vm2724_vm14 = vcmp.eq.s32.totalorder %v5370_v35, %v5213_v29  ;;  %v6555_v35 = vld [vmem:[#allocation28_spill] sm:$0xff] }
 0x24a   :  { %6508 = vst [vmem:[#allocation48_spill] sm:$0xff] %v6507_v2  ;;  %v5605_v23 = vpop.permute.xlu0 %2611 }
 0x24b   :  { %6509 = vst [vmem:[#allocation49_spill] sm:$0xff] %v5605_v23  ;;  %v5607_v36 = vpop.permute.xlu1 %2560 }
 0x24c   :  { %6510 = vst [vmem:[#allocation50_spill] sm:$0xff] %v5607_v36 }
 0x24e   :  { %v5609_v30 = vpop.permute.xlu0 %2563 }
 0x24f   :  { %6511 = vst [vmem:[#allocation51_spill] sm:$0xff] %v5609_v30  ;;  %v2675_v56 = vpop.permute.xlu1 %2674 }
 0x250   :  { %vm2781_vm11 = vcmp.eq.s32.totalorder %v2675_v56, %v5213_v29 }
 0x252   :  { %v2678_v32 = vpop.permute.xlu0 %2677 }
 0x253   :  { %vm2782_vm13 = vcmp.eq.s32.totalorder %v2678_v32, %v5213_v29  ;;  %v5613_v61 = vpop.permute.xlu1 %2614  ;;  %v6520_v32 = vmov 0 }
 0x254   :  { %6512 = vst [vmem:[#allocation52_spill] sm:$0xff] %v5613_v61  ;;  %vm5615_vm1 = vmpackc.low %vm2782_vm13, %vm2781_vm11 }
 0x255   :  { %v6514_v48 = vsel %vm5615_vm1, 4294967295, %v6513_v48  ;;  %vm2706_vm1 = vcmp.eq.s32.totalorder %v5366_v38, %v5213_v29  ;;  %v6559_v38 = vld [vmem:[#allocation23_spill] sm:$0xff] }
 0x256   :  { %6515 = vst [vmem:[#allocation53_spill] sm:$0xff] %v6514_v48  ;;  %v5619_v15 = vpop.permute.xlu0 %2617 }
 0x257   :  { %6516 = vst [vmem:[#allocation54_spill] sm:$0xff] %v5619_v15  ;;  %v5621_v19 = vpop.permute.xlu1 %2566 }
 0x258   :  { %6517 = vst [vmem:[#allocation55_spill] sm:$0xff] %v5621_v19 }
 0x25a   :  { %v5623_v11 = vpop.permute.xlu0 %2569 }
 0x25b   :  { %6518 = vst [vmem:[#allocation56_spill] sm:$0xff] %v5623_v11  ;;  %v2681_v2 = vpop.permute.xlu1 %2680 }
 0x25c   :  { %vm2783_vm0 = vcmp.eq.s32.totalorder %v2681_v2, %v5213_v29  ;;  %v968_v2 = vld [vmem:[%s6404_s8] sm:$0xff] }
 0x25e   :  { %v2684_v49 = vpop.permute.xlu0 %2683 }
 0x25f   :  { %vm2784_vm4 = vcmp.eq.s32.totalorder %v2684_v49, %v5213_v29  ;;  %v5627_v56 = vpop.permute.xlu1 %2620  ;;  %v6526_v49 = vmov 0 }
 0x260   :  { %6519 = vst [vmem:[#allocation57_spill] sm:$0xff] %v5627_v56  ;;  %vm5629_vm9 = vmpackc.low %vm2784_vm4, %vm2783_vm0 }
 0x261   :  { %v6521_v32 = vsel %vm5629_vm9, 4294967295, %v6520_v32 }
 0x262   :  { %6522 = vst [vmem:[#allocation58_spill] sm:$0xff] %v6521_v32  ;;  %v5633_v61 = vpop.permute.xlu0 %2623  ;;  %v969_v32 = vld [vmem:[%s6404_s8 + $0x8] sm:$0xff] }
 0x263   :  { %6523 = vst [vmem:[#allocation59_spill] sm:$0xff] %v5633_v61  ;;  %v5635_v48 = vpop.permute.xlu1 %2572 }
 0x264   :  { %6524 = vst [vmem:[#allocation60_spill] sm:$0xff] %v5635_v48  ;;  %v4163_v48 = vpack.c.bf16 %v969_v32, %v968_v2 }
 0x266   :  { %v5637_v36 = vpop.permute.xlu0 %2575  ;;  %4164 = vmatprep.subr.bf16.mxu1 %v4163_v48 }
 0x267   :  { %6525 = vst [vmem:[#allocation61_spill] sm:$0xff] %v5637_v36  ;;  %v2687_v19 = vpop.permute.xlu1 %2686  ;;  %4166 = vmatpush3.bf16.msra.mxu1 %v4163_v48  ;;  %v3510_v36 = vld [vmem:[#allocation3] ss:$0 sm:$0xff] }
 0x268   :  { %vm2785_vm11 = vcmp.eq.s32.totalorder %v2687_v19, %v5213_v29  ;;  %v970_v19 = vld [vmem:[%s6404_s8 + $0x10] sm:$0xff] }
 0x26a   :  { %v2690_v11 = vpop.permute.xlu0 %2689 }
 0x26b   :  { %vm2786_vm13 = vcmp.eq.s32.totalorder %v2690_v11, %v5213_v29  ;;  %v971_v11 = vld [vmem:[%s6404_s8 + $0x18] sm:$0xff] }
 0x26c   :  { %vm5641_vm7 = vmpackc.low %vm2786_vm13, %vm2785_vm11  ;;  %vm6448_vm11 = vcmask 261120  }
 0x26d   :  { %v6527_v49 = vsel %vm5641_vm7, 4294967295, %v6526_v49 }
 0x26e   :  { %6528 = vst [vmem:[#allocation62_spill] sm:$0xff] %v6527_v49  ;;  %v4167_v49 = vpack.c.bf16 %v971_v11, %v970_v19 }
 0x270   :  { %4168 = vmatprep.subr.bf16.mxu1 %v4167_v49 }
 0x271   :  { %4170 = vmatpush3.bf16.msra.mxu1 %v4167_v49 }
 0x309   :  { %v4029_v56 = vpop.f32.mrb[6].mxu1 }
 0x30a   :  { %v927_v61 = vadd.f32 %v4029_v56, %v3510_v36  ;;  %v921_v15 = vpop.f32.mrb[7].mxu1 }
 0x30b   :  { %v922_v30 = vadd.f32 %v3510_v36, %v921_v15 }
 0x30c   :  { %v957_v59 = vmul.f32 0.01, %v927_v61  ;;  %vm951_vm0 = vcmp.gt.f32.partialorder %v927_v61, 0.0 }
 0x30d   :  { %vm950_vm4 = vcmp.gt.f32.partialorder %v922_v30, 0.0  ;;  %v956_v48 = vmul.f32 0.01, %v922_v30  ;;  %v4032_v32 = vpop.f32.mrb[8].mxu1 }
 0x30e   :  { %v937_v2 = vadd.f32 %v4032_v32, %v3510_v36  ;;  %v931_v14 = vpop.f32.mrb[9].mxu1  ;;  %v963_v63 = vsel %vm951_vm0, %v927_v61, %v957_v59  ;;  %vm6529_vm0 = vcmask 359424  }
 0x30f   :  { %v932_v23 = vadd.f32 %v3510_v36, %v931_v14  ;;  %v962_v13 = vsel %vm950_vm4, %v922_v30, %v956_v48  ;;  %v1245_v48 = vld [vmem:[%s6407_s11 + $0x60] sm:$0xff] }
 0x310   :  { %v959_v34 = vmul.f32 0.01, %v937_v2  ;;  %4044 = vmatprep.mubr.msk.f32.mxu1 %vm6448_vm11, %v962_v13  ;;  %vm953_vm13 = vcmp.gt.f32.partialorder %v937_v2, 0.0 }
 0x311   :  { %vm952_vm5 = vcmp.gt.f32.partialorder %v932_v23, 0.0  ;;  %v958_v49 = vmul.f32 0.01, %v932_v23  ;;  %v4035_v56 = vpop.f32.mrb[10].mxu1  ;;  %4045 = vmatmul.mubr.msk.f32.vlgmr.msra.gmra.mrb[12].mxu1 %vm6448_vm11, %v963_v63  ;;  %v1234_v63 = vld [vmem:[%s6407_s11 + $0x8] sm:$0xff] }
 0x312   :  { %v947_v15 = vadd.f32 %v4035_v56, %v3510_v36  ;;  %v941_v19 = vpop.f32.mrb[11].mxu1  ;;  %v965_v32 = vsel %vm953_vm13, %v937_v2, %v959_v34  ;;  %v1240_v34 = vld [vmem:[%s6407_s11 + $0x38] sm:$0xff]  ;;  %v1251_v2 = vld [vmem:[%s6407_s11 + $0x90] sm:$0xff] }
 0x313   :  { %v942_v11 = vadd.f32 %v3510_v36, %v941_v19  ;;  %v964_v53 = vsel %vm952_vm5, %v932_v23, %v958_v49  ;;  %v4185_v23 = vpack.c.bf16 %v1240_v34, %v1234_v63  ;;  %v1252_v36 = vld [vmem:[%s6407_s11 + $0x98] sm:$0xff]  ;;  %v1258_v49 = vld [vmem:[%s6407_s11 + $0xc8] sm:$0xff]  ;;  %v1269_v34 = vld [vmem:[%s6407_s11 + $0x120] sm:$0xff] }
 0x314   :  { %v961_v52 = vmul.f32 0.01, %v947_v15  ;;  %4047 = vmatprep.mubr.msk.f32.mxu1 %vm6448_vm11, %v964_v53  ;;  %vm955_vm7 = vcmp.gt.f32.partialorder %v947_v15, 0.0  ;;  %v1233_v53 = vld [vmem:[%s6407_s11] sm:$0xff]  ;;  %v1264_v56 = vld [vmem:[%s6407_s11 + $0xf8] sm:$0xff] }
 0x315   :  { %vm954_vm4 = vcmp.gt.f32.partialorder %v942_v11, 0.0  ;;  %v960_v14 = vmul.f32 0.01, %v942_v11  ;;  %4048 = vmatmul.mubr.msk.f32.gmra.mrb[14].mxu1 %vm6448_vm11, %v965_v32  ;;  %4186 = vmatprep.subr.bf16.mxu0 %v4185_v23  ;;  %v4193_v19 = vpack.c.bf16 %v1264_v56, %v1258_v49  ;;  %v1263_v32 = vld [vmem:[%s6407_s11 + $0xf0] sm:$0xff]  ;;  %v1238_v23 = vld [vmem:[%s6407_s11 + $0x28] sm:$0xff] }
 0x316   :  { %v967_v59 = vsel %vm955_vm7, %v947_v15, %v961_v52  ;;  %v1239_v52 = vld [vmem:[%s6407_s11 + $0x30] sm:$0xff]  ;;  %v4191_v15 = vpack.c.bf16 %v1251_v2, %v1245_v48  ;;  %v1250_v48 = vld [vmem:[%s6407_s11 + $0x88] sm:$0xff]  ;;  %v1256_v2 = vld [vmem:[%s6407_s11 + $0xb8] sm:$0xff]  ;;  %vm6530_vm7 = vcmask 490496  }
 0x317   :  { %v966_v13 = vsel %vm954_vm4, %v942_v11, %v960_v14  ;;  %v4187_v30 = vpack.c.bf16 %v1239_v52, %v1233_v53  ;;  %v1257_v11 = vld [vmem:[%s6407_s11 + $0xc0] sm:$0xff]  ;;  %v1270_v14 = vld [vmem:[%s6407_s11 + $0x128] sm:$0xff]  ;;  %v1275_v53 = vld [vmem:[%s6407_s11 + $0x150] sm:$0xf]  ;;  %v4225_v56 = vpack.c.bf16 %v1256_v2, %v1250_v48 }
 0x318   :  { %4050 = vmatprep.mubr.msk.f32.mxu1 %vm6448_vm11, %v966_v13  ;;  %v1276_v13 = vld [vmem:[%s6407_s11 + $0x158] sm:$0xf]  ;;  %vm6531_vm5 = vmmov %vm6530_vm7  ;;  %v1210_v48 = vld [vmem:[#allocation7 + $0x8] sm:$0xff] }
 0x319   :  { %4051 = vmatmul.mubr.msk.f32.gmra.mrb[16].mxu1 %vm6448_vm11, %v967_v59  ;;  %4188 = vmatpush1.bf16.msra.mxu0 %v4187_v30  ;;  %v4195_v59 = vpack.c.bf16 %v1263_v32, %v1257_v11  ;;  %v4197_v63 = vpack.c.bf16 %v1276_v13, %v1270_v14  ;;  %v1244_v52 = vld [vmem:[%s6407_s11 + $0x58] sm:$0xff]  ;;  %v1237_v30 = vld [vmem:[%s6407_s11 + $0x20] sm:$0xff]  ;;  %v1262_v11 = vld [vmem:[%s6407_s11 + $0xe8] sm:$0xff] }
 0x31a   :  { %4065 = vmatprep.mubr.msk.f32.mxu1 %vm6529_vm0, %v5552_v45  ;;  %v1246_v45 = vld [vmem:[%s6407_s11 + $0x68] sm:$0xff]  ;;  %v1268_v32 = vld [vmem:[%s6407_s11 + $0x118] sm:$0xff]  ;;  %v5750_v14 = vld [vmem:[%s6463_s1] sm:$0xff] }
 0x31b   :  { %v4189_v61 = vpack.c.bf16 %v1252_v36, %v1246_v45  ;;  %v4200_v45 = vpack.c.bf16 %v1275_v53, %v1269_v34  ;;  %v4221_v36 = vpack.c.bf16 %v1244_v52, %v1238_v23  ;;  %v1267_v34 = vld [vmem:[%s6407_s11 + $0x110] sm:$0xff]  ;;  %v1274_v53 = vld [vmem:[%s6407_s11 + $0x148] sm:$0xff]  ;;  %v1280_v23 = vld [vmem:[%s6407_s11 + $0x178] sm:$0xf] }
 0x31c   :  { %v5770_v52 = vld [vmem:[%s6463_s1 + $0x8] sm:$0xff]  ;;  %v1216_v2 = vld [vmem:[#allocation7 + $0x38] sm:$0xff]  ;;  %vm6532_vm13 = vmmov %vm6531_vm5 }
 0x31d   :  { %4190 = vmatprep.subr.bf16.mxu0 %v4189_v61  ;;  %v1243_v61 = vld [vmem:[%s6407_s11 + $0x50] sm:$0xff]  ;;  %vm6533_vm4 = vmmov %vm6531_vm5 }
 0x31e   :  { %4192 = vmatpush1.bf16.msra.mxu0 %v4191_v15  ;;  %v4223_v49 = vpack.c.bf16 %v1243_v61, %v1237_v30  ;;  %v1249_v15 = vld [vmem:[%s6407_s11 + $0x80] sm:$0xff]  ;;  %v1279_v61 = vld [vmem:[%s6407_s11 + $0x170] sm:$0xf]  ;;  %vm6534_vm0 = vmmov %vm6533_vm4 }
 0x31f   :  { %4194 = vmatprep.subr.bf16.mxu0 %v4193_v19  ;;  %v1255_v19 = vld [vmem:[%s6407_s11 + $0xb0] sm:$0xff]  ;;  %v1273_v30 = vld [vmem:[%s6407_s11 + $0x140] sm:$0xff] }
 0x320   :  { %v4227_v13 = vpack.c.bf16 %v1255_v19, %v1249_v15  ;;  %v4239_v15 = vpack.c.bf16 %v1216_v2, %v1210_v48  ;;  %v5794_v19 = vld [vmem:[%s6463_s1 + $0x18] sm:$0xff] }
 0x322   :  { %4196 = vmatpush1.bf16.msra.mxu0 %v4195_v59  ;;  %v4229_v59 = vpack.c.bf16 %v1268_v32, %v1262_v11  ;;  %v5804_v11 = vld [vmem:[%s6463_s1 + $0x20] sm:$0xff] }
 0x323   :  { %4199 = vmatprep.subr.msk.bf16.mxu0 %vm5104_vm10, %v4197_v63  ;;  %v1261_v63 = vld [vmem:[%s6407_s11 + $0xe0] sm:$0xff] }
 0x324   :  { %v1209_v32 = vld [vmem:[#allocation7] sm:$0xff] }
 0x326   :  { %4202 = vmatpush1.bf16.msk.msra.mxu0 %vm5104_vm10, %v4200_v45  ;;  %v4231_v45 = vpack.c.bf16 %v1267_v34, %v1261_v63  ;;  %v1228_v63 = vld [vmem:[#allocation7 + $0x98] sm:$0xff]  ;;  %v5812_v34 = vld [vmem:[%s6463_s1 + $0x28] sm:$0xf] }
 0x327   :  { %4222 = vmatprep.subr.bf16.mxu0 %v4221_v36  ;;  %v4233_v36 = vpack.c.bf16 %v1280_v23, %v1274_v53 }
 0x329   :  { %3534 = vmatmul.mubr.msk.f32.vlgmr.msra.gmra.mrb[6].mxu0 %vm6530_vm7, %v5750_v14  ;;  %vm6535_vm7 = vmmov %vm6534_vm0 }
 0x32a   :  { %1369 = vmatprep.mubr.f32.mxu0 %v6491_v60  ;;  %4224 = vmatpush1.bf16.msra.mxu0 %v4223_v49  ;;  %v5784_v49 = vld [vmem:[%s6463_s1 + $0x10] sm:$0xff] }
 0x32b   :  { %4226 = vmatprep.subr.bf16.mxu0 %v4225_v56  ;;  %v4236_v56 = vpack.c.bf16 %v1279_v61, %v1273_v30 }
 0x32d   :  { %3535 = vmatmul.mubr.msk.f32.gmra.mrb[8].mxu0 %vm6531_vm5, %v5770_v52  ;;  %vm6536_vm5 = vmmov %vm6534_vm0 }
 0x32e   :  { %1375 = vmatprep.mubr.f32.mxu0 %v6491_v60  ;;  %4228 = vmatpush1.bf16.msra.mxu0 %v4227_v13  ;;  %v1215_v13 = vld [vmem:[#allocation7 + $0x30] sm:$0xff] }
 0x32f   :  { %4230 = vmatprep.subr.bf16.mxu0 %v4229_v59  ;;  %v1222_v59 = vld [vmem:[#allocation7 + $0x68] sm:$0xff]  ;;  %v4241_v53 = vpack.c.bf16 %v1215_v13, %v1209_v32 }
 0x330   :  { %v4243_v23 = vpack.c.bf16 %v1228_v63, %v1222_v59 }
 0x331   :  { %3536 = vmatmul.mubr.msk.f32.gmra.mrb[10].mxu0 %vm6532_vm13, %v5784_v49  ;;  %vm6537_vm13 = vmmov %vm6534_vm0 }
 0x332   :  { %1381 = vmatprep.mubr.f32.mxu0 %v6491_v60  ;;  %4232 = vmatpush1.bf16.msra.mxu0 %v4231_v45 }
 0x333   :  { %4235 = vmatprep.subr.msk.bf16.mxu0 %vm5104_vm10, %v4233_v36 }
 0x335   :  { %3537 = vmatmul.mubr.msk.f32.gmra.mrb[12].mxu0 %vm6533_vm4, %v5794_v19  ;;  %vm6538_vm4 = vmmov %vm6534_vm0 }
 0x336   :  { %1387 = vmatprep.mubr.f32.mxu0 %v6491_v60  ;;  %4238 = vmatpush1.bf16.msk.msra.mxu0 %vm5104_vm10, %v4236_v56  ;;  %v1236_v56 = vld [vmem:[%s6407_s11 + $0x18] sm:$0xff] }
 0x337   :  { %4240 = vmatprep.subr.bf16.mxu0 %v4239_v15  ;;  %v1242_v15 = vld [vmem:[%s6407_s11 + $0x48] sm:$0xff] }
 0x338   :  { %v4203_v63 = vpack.c.bf16 %v1242_v15, %v1236_v56  ;;  %v1260_v56 = vld [vmem:[%s6407_s11 + $0xd8] sm:$0xff]  ;;  %v1266_v15 = vld [vmem:[%s6407_s11 + $0x108] sm:$0xff] }
 0x339   :  { %3538 = vmatmul.mubr.msk.f32.gmra.mrb[14].mxu0 %vm6534_vm0, %v5804_v11 }
 0x33a   :  { %1393 = vmatprep.mubr.f32.mxu0 %v6491_v60 }
 0x33d   :  { %3539 = vmatmul.mubr.msk.f32.gmra.mrb[16].mxu0 %vm6535_vm7, %v5812_v34  ;;  %vm6539_vm7 = vmmov %vm6534_vm0 }
 0x33e   :  { %1565 = vmatprep.mubr.f32.mxu0 %v6491_v60 }
 0x341   :  { %3550 = vmatmul.mubr.msk.f32.vlgmr.msra.gmra.mrb[18].mxu0 %vm6536_vm5, %v5750_v14  ;;  %vm6540_vm5 = vmmov %vm6534_vm0 }
 0x342   :  { %1571 = vmatprep.mubr.f32.mxu0 %v6491_v60  ;;  %4242 = vmatpush1.bf16.msra.mxu0 %v4241_v53  ;;  %v1235_v53 = vld [vmem:[%s6407_s11 + $0x10] sm:$0xff] }
 0x343   :  { %4244 = vmatprep.subr.bf16.mxu0 %v4243_v23  ;;  %v1241_v23 = vld [vmem:[%s6407_s11 + $0x40] sm:$0xff] }
 0x345   :  { %3551 = vmatmul.mubr.msk.f32.gmra.mrb[20].mxu0 %vm6537_vm13, %v5770_v52  ;;  %vm6541_vm13 = vcmask 359424  }
 0x346   :  { %1577 = vmatprep.mubr.f32.mxu0 %v6491_v60 }
 0x349   :  { %3552 = vmatmul.mubr.msk.f32.gmra.mrb[22].mxu0 %vm6538_vm4, %v5784_v49  ;;  %vm6542_vm4 = vmmov %vm6541_vm13 }
 0x34a   :  { %1583 = vmatprep.mubr.f32.mxu0 %v6491_v60 }
 0x34d   :  { %3553 = vmatmul.mubr.msk.f32.gmra.mrb[24].mxu0 %vm6534_vm0, %v5794_v19  ;;  %vm6543_vm0 = vmmov %vm6542_vm4 }
 0x34e   :  { %1589 = vmatprep.mubr.f32.mxu0 %v6491_v60 }
 0x351   :  { %3554 = vmatmul.mubr.msk.f32.gmra.mrb[26].mxu0 %vm6539_vm7, %v5804_v11  ;;  %vm6544_vm7 = vmmov %vm6543_vm0 }
 0x352   :  { %1595 = vmatprep.mubr.f32.mxu0 %v6491_v60 }
 0x355   :  { %3555 = vmatmul.mubr.msk.f32.gmra.mrb[28].mxu0 %vm6540_vm5, %v5812_v34  ;;  %vm6545_vm5 = vmmov %vm6543_vm0 }
 0x356   :  { %1684 = vmatprep.mubr.f32.mxu0 %v6491_v60 }
 0x3e4   :  { %v4046_v45 = vpop.f32.mrb[12].mxu1 }
 0x3e5   :  { %v1057_v36 = vpop.f32.mrb[13].mxu1 }
 0x3e6   :  { %v4171_v30 = vpack.c.bf16 %v4046_v45, %v1057_v36  ;;  %v1248_v45 = vld [vmem:[%s6407_s11 + $0x78] sm:$0xff]  ;;  %v1254_v36 = vld [vmem:[%s6407_s11 + $0xa8] sm:$0xff] }
 0x3e8   :  { %v4049_v61 = vpop.f32.mrb[14].mxu1  ;;  %4172 = vmatprep.subr.bf16.mxu1 %v4171_v30 }
 0x3e9   :  { %v1067_v48 = vpop.f32.mrb[15].mxu1  ;;  %4174 = vmatpush3.bf16.msra.mxu1 %v4171_v30  ;;  %v4205_v30 = vpack.c.bf16 %v1241_v23, %v1235_v53  ;;  %v1272_v53 = vld [vmem:[%s6407_s11 + $0x138] sm:$0xff] }
 0x3ea   :  { %v4175_v2 = vpack.c.bf16 %v4049_v61, %v1067_v48  ;;  %v4207_v61 = vpack.c.bf16 %v1254_v36, %v1248_v45  ;;  %v1247_v48 = vld [vmem:[%s6407_s11 + $0x70] sm:$0xff]  ;;  %v1277_v36 = vld [vmem:[%s6407_s11 + $0x160] sm:$0xf] }
 0x3eb   :  { %v1271_v45 = vld [vmem:[%s6407_s11 + $0x130] sm:$0xff] }
 0x3ec   :  { %v4052_v32 = vpop.f32.mrb[16].mxu1  ;;  %4176 = vmatprep.subr.bf16.mxu1 %v4175_v2 }
 0x3ed   :  { %v1077_v13 = vpop.f32.mrb[17].mxu1  ;;  %4178 = vmatpush3.bf16.msra.mxu1 %v4175_v2  ;;  %v1253_v2 = vld [vmem:[%s6407_s11 + $0xa0] sm:$0xff] }
 0x3ee   :  { %v4179_v59 = vpack.c.bf16 %v4052_v32, %v1077_v13  ;;  %v4209_v32 = vpack.c.bf16 %v1253_v2, %v1247_v48  ;;  %v4211_v13 = vpack.c.bf16 %v1266_v15, %v1260_v56  ;;  %v1227_v48 = vld [vmem:[#allocation7 + $0x90] sm:$0xff]  ;;  %v1230_v56 = vld [vmem:[#allocation7 + $0xa8] sm:$0xff] }
 0x3ef   :  { %v1223_v15 = vld [vmem:[#allocation7 + $0x70] sm:$0xff] }
 0x3f0   :  { %4181 = vmatprep.subr.msk.bf16.mxu1 %vm5104_vm10, %v4179_v59 }
 0x3f1   :  { %4184 = vmatpush3.bf16.msk.msra.mxu1 %vm5104_vm10, %v4179_v59  ;;  %v1259_v59 = vld [vmem:[%s6407_s11 + $0xd0] sm:$0xff] }
 0x3f2   :  { %4204 = vmatprep.subr.bf16.mxu1 %v4203_v63  ;;  %v1265_v63 = vld [vmem:[%s6407_s11 + $0x100] sm:$0xff] }
 0x3f4   :  { %4066 = vmatmul.mubr.msk.f32.vlgmr.msra.gmra.mrb[18].mxu1 %vm6541_vm13, %v5557_v17  ;;  %v1278_v17 = vld [vmem:[%s6407_s11 + $0x168] sm:$0xf]  ;;  %vm6546_vm13 = vcmask 490496  }
 0x3f5   :  { %4068 = vmatprep.mubr.msk.f32.mxu1 %vm6542_vm4, %v5567_v37  ;;  %4206 = vmatpush1.bf16.msra.mxu1 %v4205_v30  ;;  %v4213_v37 = vpack.c.bf16 %v1265_v63, %v1259_v59  ;;  %v4215_v23 = vpack.c.bf16 %v1278_v17, %v1272_v53  ;;  %v1212_v30 = vld [vmem:[#allocation7 + $0x18] sm:$0xff]  ;;  %vm6547_vm4 = vmmov %vm6546_vm13  ;;  %v1214_v59 = vld [vmem:[#allocation7 + $0x28] sm:$0xff] }
 0x3f6   :  { %4208 = vmatprep.subr.bf16.mxu1 %v4207_v61  ;;  %v1218_v61 = vld [vmem:[#allocation7 + $0x48] sm:$0xff]  ;;  %v1220_v63 = vld [vmem:[#allocation7 + $0x58] sm:$0xff] }
 0x3f7   :  { %v3524_v53 = vld [vmem:[#allocation5] ss:$0 sm:$0xff] }
 0x3f8   :  { %4069 = vmatmul.mubr.msk.f32.gmra.mrb[20].mxu1 %vm6543_vm0, %v5569_v54  ;;  %v4218_v54 = vpack.c.bf16 %v1277_v36, %v1271_v45  ;;  %vm6548_vm0 = vmmov %vm6547_vm4  ;;  %v1219_v45 = vld [vmem:[#allocation7 + $0x50] sm:$0xff] }
 0x3f9   :  { %4071 = vmatprep.mubr.msk.f32.mxu1 %vm6544_vm7, %v5579_v16  ;;  %4210 = vmatpush1.bf16.msra.mxu1 %v4209_v32  ;;  %v4247_v16 = vpack.c.bf16 %v1218_v61, %v1212_v30  ;;  %vm6549_vm7 = vmmov %vm6548_vm0  ;;  %v1226_v61 = vld [vmem:[#allocation7 + $0x88] sm:$0xff] }
 0x3fa   :  { %4212 = vmatprep.subr.bf16.mxu1 %v4211_v13  ;;  %v1229_v13 = vld [vmem:[#allocation7 + $0xa0] sm:$0xff] }
 0x3fc   :  { %4072 = vmatmul.mubr.msk.f32.gmra.mrb[22].mxu1 %vm6545_vm5, %v5585_v12  ;;  %vm6550_vm5 = vmmov %vm6548_vm0  ;;  %v1211_v12 = vld [vmem:[#allocation7 + $0x10] sm:$0xff] }
 0x3fd   :  { %4214 = vmatpush1.bf16.msra.mxu1 %v4213_v37  ;;  %1464 = vmatprep.mubr.f32.mxu1 %v6491_v60 }
 0x3fe   :  { %4217 = vmatprep.subr.msk.bf16.mxu1 %vm5104_vm10, %v4215_v23  ;;  %v1213_v23 = vld [vmem:[#allocation7 + $0x20] sm:$0xff] }
 0x401   :  { %4220 = vmatpush1.bf16.msk.msra.mxu1 %vm5104_vm10, %v4218_v54  ;;  %v1232_v54 = vld [vmem:[#allocation7 + $0xb8] sm:$0xff] }
 0x402   :  { %4248 = vmatprep.subr.bf16.mxu1 %v4247_v16 }
 0x404   :  { %3542 = vmatmul.mubr.msk.f32.vlgmr.msra.gmra.mrb[24].mxu1 %vm6546_vm13, %v5750_v14  ;;  %vm6551_vm13 = vmmov %vm6548_vm0  ;;  %v1217_v14 = vld [vmem:[#allocation7 + $0x40] sm:$0xff] }
 0x405   :  { %1470 = vmatprep.mubr.f32.mxu1 %v6491_v60 }
 0x408   :  { %3543 = vmatmul.mubr.msk.f32.gmra.mrb[26].mxu1 %vm6547_vm4, %v5770_v52  ;;  %v4249_v52 = vpack.c.bf16 %v1217_v14, %v1211_v12  ;;  %v4257_v14 = vpack.c.bf16 %v1219_v45, %v1213_v23 }
 0x409   :  { %1476 = vmatprep.mubr.f32.mxu1 %v6491_v60 }
 0x40a   :  { %4250 = vmatpush1.bf16.msra.mxu1 %v4249_v52 }
 0x40c   :  { %3544 = vmatmul.mubr.msk.f32.gmra.mrb[28].mxu1 %vm6548_vm0, %v5784_v49  ;;  %v1221_v49 = vld [vmem:[#allocation7 + $0x60] sm:$0xff] }
 0x40d   :  { %1482 = vmatprep.mubr.f32.mxu1 %v6491_v60  ;;  %v4245_v2 = vpack.c.bf16 %v1227_v48, %v1221_v49  ;;  %v4259_v49 = vpack.c.bf16 %v1232_v54, %v1226_v61  ;;  %v1225_v48 = vld [vmem:[#allocation7 + $0x80] sm:$0xff] }
 0x40f   :  { %4246 = vmatpush1.bf16.msra.mxu0 %v4245_v2  ;;  %v1231_v2 = vld [vmem:[#allocation7 + $0xb0] sm:$0xff] }
 0x410   :  { %3545 = vmatmul.mubr.msk.f32.gmra.mrb[30].mxu1 %vm6549_vm7, %v5794_v19  ;;  %v1224_v19 = vld [vmem:[#allocation7 + $0x78] sm:$0xff]  ;;  %vm2720_vm7 = vcmp.eq.s32.totalorder %v5354_v50, %v5213_v29  ;;  %v6552_v50 = vmov 1.0|1.0  }
 0x411   :  { %1488 = vmatprep.mubr.f32.mxu1 %v6491_v60  ;;  %v4251_v32 = vpack.c.bf16 %v1230_v56, %v1224_v19 }
 0x413   :  { %4252 = vmatprep.subr.bf16.mxu1 %v4251_v32 }
 0x414   :  { %3546 = vmatmul.mubr.msk.f32.gmra.mrb[32].mxu1 %vm6550_vm5, %v5804_v11  ;;  %v4253_v11 = vpack.c.bf16 %v1229_v13, %v1223_v15  ;;  %v4261_v13 = vpack.c.bf16 %v1231_v2, %v1225_v48  ;;  %vm2719_vm5 = vcmp.eq.s32.totalorder %v5352_v40, %v5213_v29 }
 0x415   :  { %1494 = vmatprep.mubr.f32.mxu1 %v6491_v60 }
 0x416   :  { %4254 = vmatpush1.bf16.msra.mxu1 %v4253_v11 }
 0x418   :  { %3547 = vmatmul.mubr.msk.f32.gmra.mrb[34].mxu1 %vm6551_vm13, %v5812_v34  ;;  %v4255_v34 = vpack.c.bf16 %v1220_v63, %v1214_v59 }
 0x419   :  { %1785 = vmatprep.mubr.f32.mxu1 %v6491_v60 }
 0x41a   :  { %4256 = vmatprep.subr.bf16.mxu0 %v4255_v34 }
 0x4c7   :  { %v4067_v17 = vpop.f32.mrb[18].mxu1 }
 0x4c8   :  { %v1162_v37 = vpop.f32.mrb[19].mxu1  ;;  %v1168_v36 = vadd.f32 %v4067_v17, %v3524_v53 }
 0x4c9   :  { %v1163_v30 = vadd.f32 %v3524_v53, %v1162_v37 }
 0x4ca   :  { %v1198_v19 = vmul.f32 0.01, %v1168_v36  ;;  %vm1192_vm0 = vcmp.gt.f32.partialorder %v1168_v36, 0.0 }
 0x4cb   :  { %vm1191_vm4 = vcmp.gt.f32.partialorder %v1163_v30, 0.0  ;;  %v1197_v16 = vmul.f32 0.01, %v1163_v30  ;;  %v4070_v12 = vpop.f32.mrb[20].mxu1 }
 0x4cc   :  { %v1172_v52 = vpop.f32.mrb[21].mxu1  ;;  %v1178_v59 = vadd.f32 %v4070_v12, %v3524_v53  ;;  %v1204_v34 = vsel %vm1192_vm0, %v1168_v36, %v1198_v19 }
 0x4cd   :  { %v1203_v56 = vsel %vm1191_vm4, %v1163_v30, %v1197_v16  ;;  %v1173_v15 = vadd.f32 %v3524_v53, %v1172_v52  ;;  %vm4305_vm4 = vmpackc.low %vm2720_vm7, %vm2719_vm5 }
 0x4ce   :  { %3556 = vmatmul.mubr.msk.f32.vlgmr.msra.gmra.mrb[6].mxu0 %vm6448_vm11, %v1203_v56  ;;  %3562 = vmatmul.mubr.msk.f32.vlgmr.msra.gmra.mrb[24].mxu1 %vm6448_vm11, %v1203_v56  ;;  %v1200_v17 = vmul.f32 0.01, %v1178_v59  ;;  %vm1194_vm0 = vcmp.gt.f32.partialorder %v1178_v59, 0.0 }
 0x4cf   :  { %4258 = vmatpush1.bf16.msra.mxu0 %v4257_v14  ;;  %v4073_v32 = vpop.f32.mrb[22].mxu1  ;;  %1690 = vmatprep.mubr.f32.mxu0 %v6491_v60  ;;  %v1199_v63 = vmul.f32 0.01, %v1173_v15  ;;  %vm1193_vm13 = vcmp.gt.f32.partialorder %v1173_v15, 0.0 }
 0x4d0   :  { %v1182_v11 = vpop.f32.mrb[23].mxu1  ;;  %1791 = vmatprep.mubr.f32.mxu1 %v6491_v60  ;;  %4260 = vmatprep.subr.bf16.mxu0 %v4259_v49  ;;  %v1188_v40 = vadd.f32 %v4073_v32, %v3524_v53  ;;  %v1206_v36 = vsel %vm1194_vm0, %v1178_v59, %v1200_v17  ;;  %vm2703_vm0 = vcmp.eq.s32.totalorder %v5356_v51, %v5213_v29  ;;  %v1962_v51 = vsub.s32 3, %v5002_v9 }
 0x4d1   :  { %v1183_v37 = vadd.f32 %v3524_v53, %v1182_v11  ;;  %v1205_v23 = vsel %vm1193_vm13, %v1173_v15, %v1199_v63  ;;  %vm2704_vm13 = vcmp.eq.s32.totalorder %v5358_v58, %v5213_v29 }
 0x4d2   :  { %3557 = vmatmul.mubr.msk.f32.gmra.mrb[8].mxu0 %vm6448_vm11, %v1204_v34  ;;  %3563 = vmatmul.mubr.msk.f32.gmra.mrb[26].mxu1 %vm6448_vm11, %v1204_v34  ;;  %v1202_v30 = vmul.f32 0.01, %v1188_v40  ;;  %vm1196_vm5 = vcmp.gt.f32.partialorder %v1188_v40, 0.0 }
 0x4d3   :  { %4262 = vmatpush1.bf16.msra.mxu0 %v4261_v13  ;;  %1696 = vmatprep.mubr.f32.mxu0 %v6491_v60  ;;  %v1201_v45 = vmul.f32 0.01, %v1183_v37  ;;  %vm1195_vm7 = vcmp.gt.f32.partialorder %v1183_v37, 0.0 }
 0x4d4   :  { %4306 = vmatprep.subr.msk.bf16.mxu0 %vm4305_vm4, %v6552_v50  ;;  %1797 = vmatprep.mubr.f32.mxu1 %v6491_v60  ;;  %v1208_v53 = vsel %vm1196_vm5, %v1188_v40, %v1202_v30  ;;  %vm2722_vm4 = vcmp.eq.s32.totalorder %v5362_v5, %v5213_v29  ;;  %vm2721_vm5 = vcmp.eq.s32.totalorder %v5360_v62, %v5213_v29 }
 0x4d5   :  { %v1207_v61 = vsel %vm1195_vm7, %v1183_v37, %v1201_v45  ;;  %vm4307_vm7 = vmpackc.low %vm2704_vm13, %vm2703_vm0  ;;  %vm2705_vm13 = vcmp.eq.s32.totalorder %v5364_v20, %v5213_v29  ;;  %v6562_v37 = vld [vmem:[#allocation25_spill] sm:$0xff] }
 0x4d6   :  { %3558 = vmatmul.mubr.msk.f32.gmra.mrb[10].mxu0 %vm6448_vm11, %v1205_v23  ;;  %3564 = vmatmul.mubr.msk.f32.gmra.mrb[28].mxu1 %vm6448_vm11, %v1205_v23  ;;  %vm4309_vm9 = vmpackc.low %vm2722_vm4, %vm2721_vm5  ;;  %vm6553_vm4 = vcmask 261120  }
 0x4d7   :  { %1702 = vmatprep.mubr.f32.mxu0 %v6491_v60  ;;  %1803 = vmatprep.mubr.f32.mxu1 %v6491_v60  ;;  %vm4311_vm0 = vmpackc.low %vm2706_vm1, %vm2705_vm13  ;;  %vm2707_vm1 = vcmp.eq.s32.totalorder %v5372_v55, %v5213_v29 }
 0x4da   :  { %3559 = vmatmul.mubr.msk.f32.gmra.mrb[12].mxu0 %vm6448_vm11, %v1206_v36  ;;  %3565 = vmatmul.mubr.msk.f32.gmra.mrb[30].mxu1 %vm6448_vm11, %v1206_v36 }
 0x4db   :  { %1708 = vmatprep.mubr.f32.mxu0 %v6491_v60  ;;  %1809 = vmatprep.mubr.f32.mxu1 %v6491_v60 }
 0x4de   :  { %3560 = vmatmul.mubr.msk.f32.gmra.mrb[14].mxu0 %vm6448_vm11, %v1207_v61  ;;  %3566 = vmatmul.mubr.msk.f32.gmra.mrb[32].mxu1 %vm6448_vm11, %v1207_v61 }
 0x4df   :  { %1714 = vmatprep.mubr.f32.mxu0 %v6491_v60  ;;  %1815 = vmatprep.mubr.f32.mxu1 %v6491_v60 }
 0x4e2   :  { %3561 = vmatmul.mubr.msk.f32.gmra.mrb[16].mxu0 %vm6448_vm11, %v1208_v53  ;;  %3567 = vmatmul.mubr.msk.f32.gmra.mrb[34].mxu1 %vm6448_vm11, %v1208_v53 }
 0x4e3   :  { %1886 = vmatprep.mubr.f32.mxu0 %v6491_v60  ;;  %2202 = vmatprep.mubr.f32.mxu1 %v6491_v60 }
 0x4e6   :  { %3568 = vmatmul.mubr.msk.f32.vlgmr.msra.gmra.mrb[18].mxu0 %vm6448_vm11, %v1203_v56  ;;  %vm2723_vm11 = vcmp.eq.s32.totalorder %v5368_v43, %v5213_v29  ;;  %v6560_v43 = vld [vmem:[#allocation22_spill] sm:$0xff] }
 0x4e7   :  { %4308 = vmatpush3.bf16.msk.msra.mxu0 %vm4307_vm7, %v6552_v50  ;;  %1892 = vmatprep.mubr.f32.mxu0 %v6491_v60  ;;  %vm4313_vm5 = vmpackc.low %vm2724_vm14, %vm2723_vm11  ;;  %vm2708_vm7 = vcmp.eq.s32.totalorder %v5374_v39, %v5213_v29  ;;  %vm6554_vm14 = vcmask 261120   ;;  %v1954_v39 = vsub.s32 1, %v5002_v9 }
 0x4e8   :  { %4310 = vmatprep.subr.msk.bf16.mxu0 %vm4309_vm9, %v6552_v50  ;;  %vm2726_vm9 = vcmp.eq.s32.totalorder %v5378_v27, %v5213_v29  ;;  %vm4315_vm13 = vmpackc.low %vm2708_vm7, %vm2707_vm1  ;;  %vm2709_vm7 = vcmp.eq.s32.totalorder %v5380_v31, %v5213_v29  ;;  %v6040_v27 = vld [vmem:[%s6410_s14] sm:$0x3f] }
 0x4e9   :  { %v6051_v5 = vrot.slane %v6040_v27, %v1954_v39  ;;  %v6054_v20 = vrot.slane %v6040_v27, %v1962_v51 }
 0x4ea   :  { %3569 = vmatmul.mubr.msk.f32.gmra.mrb[20].mxu0 %vm6553_vm4, %v1204_v34  ;;  %vm2725_vm4 = vcmp.eq.s32.totalorder %v5376_v3, %v5213_v29 }
 0x4eb   :  { %4312 = vmatpush3.bf16.msk.msra.mxu0 %vm4311_vm0, %v6552_v50  ;;  %1898 = vmatprep.mubr.f32.mxu0 %v6491_v60  ;;  %vm4317_vm11 = vmpackc.low %vm2726_vm9, %vm2725_vm4  ;;  %vm2710_vm0 = vcmp.eq.s32.totalorder %v5385_v25, %v5213_v29  ;;  %vm6556_vm9 = vcmask 261120   ;;  %v1950_v25 = vsub.s32 0, %v5002_v9 }
 0x4ec   :  { %4314 = vmatprep.subr.msk.bf16.mxu0 %vm4313_vm5, %v6552_v50  ;;  %vm2728_vm5 = vcmp.eq.s32.totalorder %v5399_v7, %v5213_v29  ;;  %vm4319_vm1 = vmpackc.low %vm2710_vm0, %vm2709_vm7  ;;  %vm2711_vm0 = vcmp.eq.s32.totalorder %v5405_v33, %v5213_v29  ;;  %v1958_v7 = vsub.s32 2, %v5002_v9 }
 0x4ed   :  { %v6045_v58 = vrot.slane %v6040_v27, %v1950_v25  ;;  %v1966_v25 = vsub.s32 4, %v5002_v9 }
 0x4ee   :  { %3570 = vmatmul.mubr.msk.f32.gmra.mrb[22].mxu0 %vm6554_vm14, %v1205_v23  ;;  %vm2727_vm14 = vcmp.eq.s32.totalorder %v6555_v35, %v5213_v29  ;;  %v6048_v62 = vrot.slane %v6040_v27, %v1958_v7  ;;  %v6563_v35 = vld [vmem:[#allocation26_spill] sm:$0xff] }
 0x4ef   :  { %4316 = vmatpush3.bf16.msk.msra.mxu0 %vm4315_vm13, %v6552_v50  ;;  %1904 = vmatprep.mubr.f32.mxu0 %v6491_v60  ;;  %vm4321_vm4 = vmpackc.low %vm2728_vm5, %vm2727_vm14  ;;  %vm2712_vm13 = vcmp.eq.s32.totalorder %v5412_v57, %v5213_v29  ;;  %vm6557_vm5 = vcmask 261120  }
 0x4f0   :  { %4318 = vmatprep.subr.msk.bf16.mxu0 %vm4317_vm11, %v6552_v50  ;;  %vm2730_vm11 = vcmp.eq.s32.totalorder %v5424_v44, %v5213_v29  ;;  %vm4323_vm7 = vmpackc.low %vm2712_vm13, %vm2711_vm0  ;;  %vm2713_vm13 = vcmp.eq.s32.totalorder %v5429_v41, %v5213_v29 }
 0x4f2   :  { %3571 = vmatmul.mubr.msk.f32.gmra.mrb[24].mxu0 %vm6556_vm9, %v1206_v36  ;;  %vm2729_vm9 = vcmp.eq.s32.totalorder %v5417_v24, %v5213_v29 }
 0x4f3   :  { %4320 = vmatpush3.bf16.msk.msra.mxu0 %vm4319_vm1, %v6552_v50  ;;  %1910 = vmatprep.mubr.f32.mxu0 %v6491_v60  ;;  %vm4325_vm14 = vmpackc.low %vm2730_vm11, %vm2729_vm9  ;;  %vm2714_vm1 = vcmp.eq.s32.totalorder %v5436_v18, %v5213_v29  ;;  %vm6558_vm11 = vcmask 261120  }
 0x4f4   :  { %4322 = vmatprep.subr.msk.bf16.mxu0 %vm4321_vm4, %v6552_v50  ;;  %vm2732_vm4 = vcmp.eq.s32.totalorder %v5448_v1, %v5213_v29  ;;  %vm4327_vm0 = vmpackc.low %vm2714_vm1, %vm2713_vm13  ;;  %vm2733_vm13 = vcmp.eq.s32.totalorder %v5459_v26, %v5213_v29  ;;  %v6561_v26 = vld [vmem:[#allocation24_spill] sm:$0xff] }
 0x4f5   :  { %vm4333_vm2 = vmpackc.low %vm2734_vm8, %vm2733_vm13  ;;  %vm1974_vm8 = vcmp.eq.s32.totalorder %v6559_v38, %v6048_v62  ;;  %vm1981_vm13 = vcmp.eq.s32.totalorder %v6560_v43, %v6054_v20 }
 0x4f6   :  { %3572 = vmatmul.mubr.msk.f32.gmra.mrb[26].mxu0 %vm6557_vm5, %v1207_v61  ;;  %vm2731_vm5 = vcmp.eq.s32.totalorder %v5441_v28, %v5213_v29  ;;  %v3576_v57 = vsel %vm1974_vm8, 1.0, %v6491_v60  ;;  %v3583_v49 = vsel %vm1981_vm13, 1.0, %v6491_v60  ;;  %vm1990_vm8 = vcmp.eq.s32.totalorder %v6562_v37, %v6045_v58 }
 0x4f7   :  { %4324 = vmatpush3.bf16.msk.msra.mxu0 %vm4323_vm7, %v6552_v50  ;;  %1916 = vmatprep.mubr.f32.mxu0 %v6491_v60  ;;  %vm4329_vm9 = vmpackc.low %vm2732_vm4, %vm2731_vm5  ;;  %vm2716_vm7 = vcmp.eq.s32.totalorder %v5457_v4, %v5213_v29  ;;  %vm2718_vm4 = vcmp.eq.s32.totalorder %v5465_v21, %v5213_v29  ;;  %vm1997_vm13 = vcmp.eq.s32.totalorder %v6563_v35, %v6051_v5 }
 0x4f8   :  { %4326 = vmatprep.subr.msk.bf16.mxu0 %vm4325_vm14, %v6552_v50  ;;  %vm2715_vm14 = vcmp.eq.s32.totalorder %v5453_v0, %v5213_v29 }
 0x4f9   :  { %vm4331_vm1 = vmpackc.low %vm2716_vm7, %vm2715_vm14  ;;  %vm1978_vm7 = vcmp.eq.s32.totalorder %v6560_v43, %v6045_v58  ;;  %vm1980_vm14 = vcmp.eq.s32.totalorder %v6560_v43, %v6048_v62 }
 0x4fa   :  { %3573 = vmatmul.mubr.msk.f32.gmra.mrb[28].mxu0 %vm6558_vm11, %v1208_v53  ;;  %vm1973_vm11 = vcmp.eq.s32.totalorder %v6559_v38, %v6051_v5  ;;  %v3580_v4 = vsel %vm1978_vm7, 1.0, %v6491_v60  ;;  %v3582_v21 = vsel %vm1980_vm14, 1.0, %v6491_v60  ;;  %vm1993_vm7 = vcmp.eq.s32.totalorder %v6562_v37, %v6054_v20 }
 0x4fb   :  { %4328 = vmatpush3.bf16.msk.msra.mxu0 %vm4327_vm0, %v6552_v50  ;;  %vm2717_vm0 = vcmp.eq.s32.totalorder %v5463_v8, %v5213_v29  ;;  %v3575_v41 = vsel %vm1973_vm11, 1.0, %v6491_v60  ;;  %vm1992_vm11 = vcmp.eq.s32.totalorder %v6562_v37, %v6048_v62  ;;  %v3592_v53 = vsel %vm1990_vm8, 1.0, %v6491_v60 }
 0x4fc   :  { %4330 = vmatprep.subr.msk.bf16.mxu0 %vm4329_vm9, %v6552_v50  ;;  %vm4335_vm5 = vmpackc.low %vm2718_vm4, %vm2717_vm0  ;;  %vm1975_vm9 = vcmp.eq.s32.totalorder %v6559_v38, %v6054_v20  ;;  %vm1984_vm4 = vcmp.eq.s32.totalorder %v6561_v26, %v6045_v58  ;;  %vm1986_vm0 = vcmp.eq.s32.totalorder %v6561_v26, %v6048_v62  ;;  %vm1996_vm14 = vcmp.eq.s32.totalorder %v6563_v35, %v6045_v58 }
 0x4fd   :  { %v3577_v28 = vsel %vm1975_vm9, 1.0, %v6491_v60  ;;  %v3586_v19 = vsel %vm1984_vm4, 1.0, %v6491_v60  ;;  %v3588_v32 = vsel %vm1986_vm0, 1.0, %v6491_v60  ;;  %vm1991_vm9 = vcmp.eq.s32.totalorder %v6562_v37, %v6051_v5 }
 0x4fe   :  { %v3594_v51 = vsel %vm1992_vm11, 1.0, %v6491_v60  ;;  %vm1999_vm4 = vcmp.eq.s32.totalorder %v6563_v35, %v6054_v20 }
 0x4ff   :  { %4332 = vmatpush3.bf16.msk.msra.mxu0 %vm4331_vm1, %v6552_v50  ;;  %vm1979_vm1 = vcmp.eq.s32.totalorder %v6560_v43, %v6051_v5 }
 0x500   :  { %4334 = vmatprep.subr.msk.bf16.mxu0 %vm4333_vm2, %v6552_v50  ;;  %vm1972_vm2 = vcmp.eq.s32.totalorder %v6559_v38, %v6045_v58  ;;  %v3581_v54 = vsel %vm1979_vm1, 1.0, %v6491_v60  ;;  %vm1998_vm1 = vcmp.eq.s32.totalorder %v6563_v35, %v6048_v62 }
 0x501   :  { %v3574_v3 = vsel %vm1972_vm2, 1.0, %v6491_v60  ;;  %vm1987_vm2 = vcmp.eq.s32.totalorder %v6561_v26, %v6054_v20 }
 0x502   :  { %v3589_v17 = vsel %vm1987_vm2, 1.0, %v6491_v60 }
 0x503   :  { %4336 = vmatpush3.bf16.msk.msra.mxu0 %vm4335_vm5, %v6552_v50  ;;  %vm1985_vm5 = vcmp.eq.s32.totalorder %v6561_v26, %v6051_v5 }
 0x504   :  { %v3587_v13 = vsel %vm1985_vm5, 1.0, %v6491_v60 }
 0x5a1   :  { %v1686_v55 = vpop.f32.mrb[6].mxu0  ;;  %v1787_v31 = vpop.f32.mrb[24].mxu1 }
 0x5a2   :  { %v2081_v33 = vmul.f32 %v3574_v3, %v1686_v55  ;;  %v6072_v24 = vmul.f32 %v3576_v57, %v1787_v31  ;;  %v1688_v44 = vpop.f32.mrb[7].mxu0  ;;  %v1789_v18 = vpop.f32.mrb[25].mxu1  ;;  %v3593_v55 = vsel %vm1991_vm9, 1.0, %v6491_v60 }
 0x5a3   :  { %v2082_v1 = vmul.f32 %v3575_v41, %v1688_v44  ;;  %v6076_v0 = vmul.f32 %v3577_v28, %v1789_v18  ;;  %v3595_v44 = vsel %vm1993_vm7, 1.0, %v6491_v60  ;;  %v3598_v28 = vsel %vm1996_vm14, 1.0, %v6491_v60 }
 0x5a5   :  { %v1692_v10 = vpop.f32.mrb[8].mxu0  ;;  %v1793_v8 = vpop.f32.mrb[26].mxu1 }
 0x5a6   :  { %v2087_v16 = vmul.f32 %v3580_v4, %v1692_v10  ;;  %v6092_v12 = vmul.f32 %v3582_v21, %v1793_v8  ;;  %v1694_v14 = vpop.f32.mrb[9].mxu0  ;;  %v1795_v52 = vpop.f32.mrb[27].mxu1  ;;  %v3600_v8 = vsel %vm1998_vm1, 1.0, %v6491_v60  ;;  %v3599_v21 = vsel %vm1997_vm13, 1.0, %v6491_v60 }
 0x5a7   :  { %v2088_v48 = vmul.f32 %v3581_v54, %v1694_v14  ;;  %v6097_v2 = vmul.f32 %v3583_v49, %v1795_v52  ;;  %v3601_v49 = vsel %vm1999_vm4, 1.0, %v6491_v60  ;;  %vm6565_vm13 = vcmask 359424  }
 0x5a8   :  { %v4265_v56 = vpack.c.bf16 %v2087_v16, %v2081_v33  ;;  %v4279_v15 = vpack.c.bf16 %v6092_v12, %v6072_v24 }
 0x5a9   :  { %v4263_v11 = vpack.c.bf16 %v2088_v48, %v2082_v1  ;;  %v4277_v59 = vpack.c.bf16 %v6097_v2, %v6076_v0  ;;  %v1698_v63 = vpop.f32.mrb[10].mxu0  ;;  %v1799_v34 = vpop.f32.mrb[28].mxu1  ;;  %v1970_v1 = vsub.s32 5, %v5002_v9  ;;  %v6564_v48 = vld [vmem:[#allocation27_spill] sm:$0xff] }
 0x5aa   :  { %v2093_v23 = vmul.f32 %v3586_v19, %v1698_v63  ;;  %v6109_v40 = vmul.f32 %v3588_v32, %v1799_v34  ;;  %v1700_v45 = vpop.f32.mrb[11].mxu0  ;;  %v1801_v36 = vpop.f32.mrb[29].mxu1  ;;  %vm2002_vm0 = vcmp.eq.s32.totalorder %v6564_v48, %v6045_v58  ;;  %vm2004_vm5 = vcmp.eq.s32.totalorder %v6564_v48, %v6048_v62 }
 0x5ab   :  { %v2094_v30 = vmul.f32 %v3587_v13, %v1700_v45  ;;  %v6115_v61 = vmul.f32 %v3589_v17, %v1801_v36  ;;  %4264 = vmatprep.subr.bf16.mxu1 %v4263_v11  ;;  %vm2003_vm2 = vcmp.eq.s32.totalorder %v6564_v48, %v6051_v5  ;;  %vm2005_vm8 = vcmp.eq.s32.totalorder %v6564_v48, %v6054_v20 }
 0x5ac   :  { %4266 = vmatpush1.bf16.msra.mxu1 %v4265_v56  ;;  %v6159_v58 = vrot.slane %v6040_v27, %v1966_v25  ;;  %v3604_v34 = vsel %vm2002_vm0, 1.0, %v6491_v60  ;;  %v3605_v62 = vsel %vm2003_vm2, 1.0, %v6491_v60  ;;  %v6165_v5 = vrot.slane %v6040_v27, %v1970_v1 }
 0x5ad   :  { %v1704_v7 = vpop.f32.mrb[12].mxu0  ;;  %v1805_v39 = vpop.f32.mrb[30].mxu1  ;;  %v3607_v20 = vsel %vm2005_vm8, 1.0, %v6491_v60 }
 0x5ae   :  { %v2099_v3 = vmul.f32 %v3592_v53, %v1704_v7  ;;  %v6129_v31 = vmul.f32 %v3594_v51, %v1805_v39  ;;  %v1706_v57 = vpop.f32.mrb[13].mxu0  ;;  %v1807_v33 = vpop.f32.mrb[31].mxu1  ;;  %vm1976_vm11 = vcmp.eq.s32.totalorder %v6559_v38, %v6159_v58  ;;  %vm1977_vm9 = vcmp.eq.s32.totalorder %v6559_v38, %v6165_v5  ;;  %v6186_v38 = vld [vmem:[%s6412_s16] sm:$0x3] }
 0x5af   :  { %v2100_v41 = vmul.f32 %v3593_v55, %v1706_v57  ;;  %v6134_v18 = vmul.f32 %v3595_v44, %v1807_v33  ;;  %v3578_v57 = vsel %vm1976_vm11, 1.0, %v6491_v60  ;;  %vm1982_vm7 = vcmp.eq.s32.totalorder %v6560_v43, %v6159_v58 }
 0x5b0   :  { %v4269_v4 = vpack.c.bf16 %v2099_v3, %v2093_v23  ;;  %v4283_v10 = vpack.c.bf16 %v6129_v31, %v6109_v40  ;;  %v3606_v23 = vsel %vm2004_vm5, 1.0, %v6491_v60  ;;  %vm1983_vm14 = vcmp.eq.s32.totalorder %v6560_v43, %v6165_v5 }
 0x5b1   :  { %v4267_v54 = vpack.c.bf16 %v2100_v41, %v2094_v30  ;;  %v4281_v16 = vpack.c.bf16 %v6134_v18, %v6115_v61  ;;  %v1710_v14 = vpop.f32.mrb[14].mxu0  ;;  %v1811_v52 = vpop.f32.mrb[32].mxu1  ;;  %v3579_v41 = vsel %vm1977_vm9, 1.0, %v6491_v60  ;;  %vm1988_vm1 = vcmp.eq.s32.totalorder %v6561_v26, %v6159_v58  ;;  %vm6566_vm9 = vmmov %vm6565_vm13 }
 0x5b2   :  { %v2105_v9 = vmul.f32 %v3598_v28, %v1710_v14  ;;  %v6150_v19 = vmul.f32 %v3600_v8, %v1811_v52  ;;  %v1712_v56 = vpop.f32.mrb[15].mxu0  ;;  %v1813_v32 = vpop.f32.mrb[33].mxu1  ;;  %vm1989_vm4 = vcmp.eq.s32.totalorder %v6561_v26, %v6165_v5  ;;  %vm1994_vm0 = vcmp.eq.s32.totalorder %v6562_v37, %v6159_v58 }
 0x5b3   :  { %v2106_v13 = vmul.f32 %v3599_v21, %v1712_v56  ;;  %v2108_v11 = vmul.f32 %v3601_v49, %v1813_v32  ;;  %4268 = vmatprep.subr.bf16.mxu1 %v4267_v54  ;;  %v3585_v54 = vsel %vm1983_vm14, 1.0, %v6491_v60  ;;  %vm1995_vm5 = vcmp.eq.s32.totalorder %v6562_v37, %v6165_v5 }
 0x5b4   :  { %4270 = vmatpush1.bf16.msra.mxu1 %v4269_v4  ;;  %v3584_v4 = vsel %vm1982_vm7, 1.0, %v6491_v60  ;;  %v3596_v12 = vsel %vm1994_vm0, 1.0, %v6491_v60  ;;  %v3597_v18 = vsel %vm1995_vm5, 1.0, %v6491_v60  ;;  %vm2000_vm2 = vcmp.eq.s32.totalorder %v6563_v35, %v6159_v58 }
 0x5b5   :  { %v1716_v63 = vpop.f32.mrb[16].mxu0  ;;  %v1817_v17 = vpop.f32.mrb[34].mxu1  ;;  %vm2001_vm8 = vcmp.eq.s32.totalorder %v6563_v35, %v6165_v5  ;;  %vm2006_vm11 = vcmp.eq.s32.totalorder %v6564_v48, %v6159_v58  ;;  %vm2007_vm7 = vcmp.eq.s32.totalorder %v6564_v48, %v6165_v5  ;;  %vm2752_vm14 = vcmp.eq.s32.totalorder %v5487_v6, %v5213_v29  ;;  %v6567_v48 = vld [vmem:[#allocation35_spill] sm:$0xff]  ;;  %v6568_v6 = vld [vmem:[#allocation32_spill] sm:$0xff]  ;;  %v6573_v5 = vld [vmem:[#allocation38_spill] sm:$0xff] }
 0x5b6   :  { %v2111_v45 = vmul.f32 %v3604_v34, %v1716_v63  ;;  %v2113_v36 = vmul.f32 %v3606_v23, %v1817_v17  ;;  %v1718_v30 = vpop.f32.mrb[17].mxu0  ;;  %v1819_v53 = vpop.f32.mrb[35].mxu1  ;;  %v3603_v32 = vsel %vm2001_vm8, 1.0, %v6491_v60  ;;  %v3609_v17 = vsel %vm2007_vm7, 1.0, %v6491_v60 }
 0x5b7   :  { %v2112_v25 = vmul.f32 %v3605_v62, %v1718_v30  ;;  %v2114_v7 = vmul.f32 %v3607_v20, %v1819_v53  ;;  %vm2754_vm0 = vcmp.eq.s32.totalorder %v6567_v48, %v5213_v29  ;;  %vm2735_vm5 = vcmp.eq.s32.totalorder %v6568_v6, %v5213_v29  ;;  %v6577_v30 = vld [vmem:[#allocation42_spill] sm:$0xff]  ;;  %v6579_v20 = vld [vmem:[#allocation49_spill] sm:$0xff] }
 0x5b8   :  { %v4274_v39 = vpack.c.bf16 %v2111_v45, %v2105_v9  ;;  %v4288_v51 = vpack.c.bf16 %v2113_v36, %v6150_v19  ;;  %v3591_v9 = vsel %vm1989_vm4, 1.0, %v6491_v60  ;;  %vm2736_vm4 = vcmp.eq.s32.totalorder %v5491_v42, %v5213_v29  ;;  %v6571_v42 = vld [vmem:[#allocation37_spill] sm:$0xff]  ;;  %v6575_v36 = vld [vmem:[#allocation44_spill] sm:$0xff]  ;;  %v6578_v53 = vld [vmem:[#allocation46_spill] sm:$0xff] }
 0x5b9   :  { %v4271_v55 = vpack.c.bf16 %v2112_v25, %v2106_v13  ;;  %v4285_v27 = vpack.c.bf16 %v2114_v7, %v2108_v11  ;;  %v1888_v3 = vpop.f32.mrb[18].mxu0  ;;  %v3608_v11 = vsel %vm2006_vm11, 1.0, %v6491_v60  ;;  %vm6570_vm11 = vmmov %vm6566_vm9  ;;  %vm2738_vm7 = vcmp.eq.s32.totalorder %v6571_v42, %v5213_v29  ;;  %v6574_v45 = vld [vmem:[#allocation41_spill] sm:$0xff]  ;;  %v6581_v7 = vld [vmem:[#allocation47_spill] sm:$0xff] }
 0x5ba   :  { %v2085_v33 = vmul.f32 %v3578_v57, %v1888_v3  ;;  %v1890_v44 = vpop.f32.mrb[19].mxu0  ;;  %v6580_v25 = vld [vmem:[#allocation45_spill] sm:$0xff]  ;;  %v2630_v3 = vpop.permute.xlu0 %2629  ;;  %v6586_v57 = vld [vmem:[#allocation56_spill] sm:$0xff]  ;;  %v3279_v42 = vld [vmem:[#allocation14 + $0x8] sm:$0xff] }
 0x5bb   :  { %v2086_v28 = vmul.f32 %v3579_v41, %v1890_v44  ;;  %4273 = vmatprep.subr.msk.bf16.mxu1 %vm5104_vm10, %v4271_v55  ;;  %v6584_v55 = vld [vmem:[#allocation50_spill] sm:$0xff]  ;;  %v2627_v44 = vpop.permute.xlu1 %2626  ;;  %v6588_v41 = vld [vmem:[#allocation55_spill] sm:$0xff] }
 0x5bc   :  { %4276 = vmatpush1.bf16.msk.msra.mxu1 %vm5104_vm10, %v4274_v39  ;;  %v6582_v39 = vld [vmem:[#allocation51_spill] sm:$0xff] }
 0x5bd   :  { %v1894_v1 = vpop.f32.mrb[20].mxu0  ;;  %4278 = vmatprep.subr.bf16.mxu1 %v4277_v59  ;;  %v3590_v59 = vsel %vm1988_vm1, 1.0, %v6491_v60  ;;  %vm2751_vm1 = vcmp.eq.s32.totalorder %v5481_v22, %v5213_v29  ;;  %v6569_v22 = vld [vmem:[#allocation33_spill] sm:$0xff] }
 0x5be   :  { %v2091_v8 = vmul.f32 %v3584_v4, %v1894_v1  ;;  %v1896_v21 = vpop.f32.mrb[21].mxu0  ;;  %vm2753_vm8 = vcmp.eq.s32.totalorder %v6569_v22, %v5213_v29  ;;  %v2582_v1 = vpop.permute.xlu0 %2581  ;;  %v6591_v4 = vld [vmem:[#allocation60_spill] sm:$0xff]  ;;  %v3278_v22 = vld [vmem:[#allocation14] sm:$0xff] }
 0x5bf   :  { %v2092_v43 = vmul.f32 %v3585_v54, %v1896_v21  ;;  %3612 = vmatmul.mubr.msk.f32.vlgmr.msra.gmra.mrb[36].mxu1 %vm6565_vm13, %v6186_v38  ;;  %vm4337_vm13 = vmpackc.low %vm2752_vm14, %vm2751_vm1  ;;  %vm2737_vm14 = vcmp.eq.s32.totalorder %v6572_v46, %v5213_v29  ;;  %v4727_v21 = vmov 0.0|0.0  }
 0x5c0   :  { %v4293_v14 = vpack.c.bf16 %v2091_v8, %v2085_v33  ;;  %4280 = vmatpush1.bf16.msra.mxu1 %v4279_v15  ;;  %2273 = vmatprep.mubr.f32.mxu1 %v6491_v60  ;;  %vm4343_vm1 = vmpackc.low %vm2738_vm7, %vm2737_vm14  ;;  %vm2742_vm7 = vcmp.eq.s32.totalorder %v6578_v53, %v5213_v29  ;;  %vm2741_vm14 = vcmp.eq.s32.totalorder %v6580_v25, %v5213_v29  ;;  %v6587_v33 = vld [vmem:[#allocation59_spill] sm:$0xff]  ;;  %v2579_v8 = vpop.permute.xlu1 %2578  ;;  %v3281_v53 = vld [vmem:[#allocation14 + $0x18] sm:$0xff] }
 0x5c1   :  { %v4291_v0 = vpack.c.bf16 %v2092_v43, %v2086_v28  ;;  %v1900_v2 = vpop.f32.mrb[22].mxu0  ;;  %4282 = vmatprep.subr.bf16.mxu1 %v4281_v16  ;;  %v6589_v28 = vld [vmem:[#allocation57_spill] sm:$0xff]  ;;  %4369 = vmatprep.subr.bf16.mxu0 %v4727_v21 }
 0x5c2   :  { %v2097_v52 = vmul.f32 %v3590_v59, %v1900_v2  ;;  %v1902_v49 = vpop.f32.mrb[23].mxu0  ;;  %v3797_v25 = vld [vmem:[#allocation13] ss:$0 sm:$0xff] }
 0x5c3   :  { %v2098_v26 = vmul.f32 %v3591_v9, %v1902_v49  ;;  %v6596_v9 = vld [vmem:[#allocation39_spill] sm:$0xff] }
 0x5c4   :  { %4284 = vmatpush1.bf16.msra.mxu1 %v4283_v10  ;;  %v3602_v10 = vsel %vm2000_vm2, 1.0, %v6491_v60  ;;  %vm4339_vm2 = vmpackc.low %vm2736_vm4, %vm2735_vm5  ;;  %vm2758_vm5 = vcmp.eq.s32.totalorder %v6575_v36, %v5213_v29  ;;  %v4412_v36 = vpack.c.bf16 %v3279_v42, %v3278_v22 }
 0x5c5   :  { %v1906_v24 = vpop.f32.mrb[24].mxu0  ;;  %4287 = vmatprep.subr.msk.bf16.mxu1 %vm5104_vm10, %v4285_v27  ;;  %v6585_v27 = vld [vmem:[#allocation52_spill] sm:$0xff] }
 0x5c6   :  { %v2103_v15 = vmul.f32 %v3596_v12, %v1906_v24  ;;  %v1908_v61 = vpop.f32.mrb[25].mxu0 }
 0x5c7   :  { %v2104_v16 = vmul.f32 %v3597_v18, %v1908_v61  ;;  %v6602_v61 = vld [vmem:[#allocation53_spill] sm:$0xff]  ;;  %v2696_v18 = vpop.permute.xlu0 %2695 }
 0x5c8   :  { %v4297_v37 = vpack.c.bf16 %v2103_v15, %v2097_v52  ;;  %4290 = vmatpush1.bf16.msk.msra.mxu1 %vm5104_vm10, %v4288_v51  ;;  %v6583_v51 = vld [vmem:[#allocation54_spill] sm:$0xff]  ;;  %v6600_v15 = vld [vmem:[#allocation48_spill] sm:$0xff] }
 0x5c9   :  { %v4295_v40 = vpack.c.bf16 %v2104_v16, %v2098_v26  ;;  %v1912_v31 = vpop.f32.mrb[26].mxu0  ;;  %4292 = vmatprep.subr.bf16.mxu1 %v4291_v0  ;;  %v6598_v26 = vld [vmem:[#allocation43_spill] sm:$0xff]  ;;  %v6604_v16 = vld [vmem:[#allocation58_spill] sm:$0xff] }
 0x5ca   :  { %v2109_v19 = vmul.f32 %v3602_v10, %v1912_v31  ;;  %v1914_v56 = vpop.f32.mrb[27].mxu0 }
 0x5cb   :  { %v2110_v13 = vmul.f32 %v3603_v32, %v1914_v56  ;;  %3615 = vmatmul.mubr.msk.f32.vlgmr.msra.gmra.mrb[38].mxu1 %vm6566_vm9, %v6186_v38  ;;  %vm4341_vm9 = vmpackc.low %vm2754_vm0, %vm2753_vm8  ;;  %vm2740_vm0 = vcmp.eq.s32.totalorder %v6574_v45, %v5213_v29  ;;  %v2702_v31 = vpop.permute.xlu0 %2701  ;;  %v3192_v56 = vld [vmem:[#allocation11 + $0x8] sm:$0xff] }
 0x5cc   :  { %4294 = vmatpush1.bf16.msra.mxu1 %v4293_v14  ;;  %2344 = vmatprep.mubr.f32.mxu1 %v6491_v60 }
 0x5cd   :  { %v1918_v35 = vpop.f32.mrb[28].mxu0  ;;  %4296 = vmatprep.subr.bf16.mxu1 %v4295_v40  ;;  %v6606_v40 = vld [vmem:[#allocation62_spill] sm:$0xff] }
 0x5ce   :  { %v2115_v63 = vmul.f32 %v3608_v11, %v1918_v35  ;;  %v1920_v34 = vpop.f32.mrb[29].mxu0  ;;  %v3194_v35 = vld [vmem:[#allocation11 + $0x18] sm:$0xff] }
 0x5cf   :  { %v2116_v23 = vmul.f32 %v3609_v17, %v1920_v34  ;;  %v3707_v34 = vld [vmem:[#allocation8] ss:$0 sm:$0xff] }
 0x5d0   :  { %v4302_v58 = vpack.c.bf16 %v2115_v63, %v2109_v19  ;;  %4298 = vmatpush1.bf16.msra.mxu1 %v4297_v37  ;;  %v2693_v37 = vpop.permute.xlu1 %2692  ;;  %v3191_v19 = vld [vmem:[#allocation11] sm:$0xff] }
 0x5d1   :  { %v4299_v62 = vpack.c.bf16 %v2116_v23, %v2110_v13  ;;  %v4406_v32 = vpack.c.bf16 %v3192_v56, %v3191_v19  ;;  %v3193_v13 = vld [vmem:[#allocation11 + $0x10] sm:$0xff] }
 0x5d2   :  { %v4409_v11 = vpack.c.bf16 %v3194_v35, %v3193_v13 }
 0x5d3   :  { %4301 = vmatprep.subr.msk.bf16.mxu1 %vm5104_vm10, %v4299_v62 }
 0x5d4   :  { %4304 = vmatpush1.bf16.msk.msra.mxu1 %vm5104_vm10, %v4302_v58  ;;  %vm2756_vm10 = vcmp.eq.s32.totalorder %v5544_v47, %v5213_v29  ;;  %v6576_v47 = vld [vmem:[#allocation40_spill] sm:$0xff]  ;;  %v2699_v10 = vpop.permute.xlu1 %2698 }
 0x5d5   :  { %4338 = vmatprep.subr.msk.bf16.mxu1 %vm4337_vm13, %v6552_v50  ;;  %vm2755_vm13 = vcmp.eq.s32.totalorder %v6573_v5, %v5213_v29 }
 0x5d6   :  { %vm4345_vm4 = vmpackc.low %vm2756_vm10, %vm2755_vm13  ;;  %vm2760_vm10 = vcmp.eq.s32.totalorder %v6579_v20, %v5213_v29  ;;  %vm2759_vm13 = vcmp.eq.s32.totalorder %v6581_v7, %v5213_v29 }
 0x5d7   :  { %3618 = vmatmul.mubr.msk.f32.vlgmr.msra.gmra.mrb[40].mxu1 %vm6570_vm11, %v6186_v38  ;;  %vm2757_vm11 = vcmp.eq.s32.totalorder %v6577_v30, %v5213_v29  ;;  %v6590_v38 = vld [vmem:[#allocation61_spill] sm:$0xff]  ;;  %v3280_v30 = vld [vmem:[#allocation14 + $0x10] sm:$0xff] }
 0x5d8   :  { %4340 = vmatpush3.bf16.msk.msra.mxu1 %vm4339_vm2, %v6552_v50  ;;  %vm2739_vm2 = vcmp.eq.s32.totalorder %v6576_v47, %v5213_v29  ;;  %v4415_v20 = vpack.c.bf16 %v3281_v53, %v3280_v30 }
 0x5d9   :  { %4342 = vmatprep.subr.msk.bf16.mxu1 %vm4341_vm9, %v6552_v50  ;;  %vm4347_vm8 = vmpackc.low %vm2740_vm0, %vm2739_vm2  ;;  %vm2744_vm0 = vcmp.eq.s32.totalorder %v6582_v39, %v5213_v29  ;;  %vm2743_vm2 = vcmp.eq.s32.totalorder %v6584_v55, %v5213_v29  ;;  %v3365_v39 = vld [vmem:[%s6417_s21] sm:$0xff] }
 0x5da   :  { %vm4349_vm9 = vmpackc.low %vm2758_vm5, %vm2757_vm11  ;;  %vm2762_vm5 = vcmp.eq.s32.totalorder %v6583_v51, %v5213_v29  ;;  %vm2761_vm11 = vcmp.eq.s32.totalorder %v6585_v27, %v5213_v29  ;;  %v3366_v51 = vld [vmem:[%s6417_s21 + $0x8] sm:$0xff] }
 0x5dc   :  { %4344 = vmatpush3.bf16.msk.msra.mxu1 %vm4343_vm1, %v6552_v50  ;;  %vm4351_vm1 = vmpackc.low %vm2742_vm7, %vm2741_vm14  ;;  %vm2746_vm7 = vcmp.eq.s32.totalorder %v6586_v57, %v5213_v29  ;;  %vm2745_vm14 = vcmp.eq.s32.totalorder %v6588_v41, %v5213_v29  ;;  %v4418_v57 = vpack.c.bf16 %v3366_v51, %v3365_v39  ;;  %v3368_v41 = vld [vmem:[%s6417_s21 + $0x18] sm:$0xff] }
 0x5dd   :  { %4346 = vmatprep.subr.msk.bf16.mxu1 %vm4345_vm4, %v6552_v50  ;;  %vm4353_vm4 = vmpackc.low %vm2760_vm10, %vm2759_vm13  ;;  %vm2764_vm10 = vcmp.eq.s32.totalorder %v6587_v33, %v5213_v29  ;;  %vm2763_vm13 = vcmp.eq.s32.totalorder %v6589_v28, %v5213_v29 }
 0x5e0   :  { %4348 = vmatpush3.bf16.msk.msra.mxu1 %vm4347_vm8, %v6552_v50  ;;  %vm4355_vm8 = vmpackc.low %vm2744_vm0, %vm2743_vm2  ;;  %vm2748_vm0 = vcmp.eq.s32.totalorder %v6590_v38, %v5213_v29  ;;  %vm2747_vm2 = vcmp.eq.s32.totalorder %v6591_v4, %v5213_v29  ;;  %v3799_v38 = vld [vmem:[#allocation16] ss:$0 sm:$0xff] }
 0x5e1   :  { %4350 = vmatprep.subr.msk.bf16.mxu1 %vm4349_vm9, %v6552_v50  ;;  %vm4357_vm9 = vmpackc.low %vm2762_vm5, %vm2761_vm11  ;;  %vm2766_vm5 = vcmp.eq.s32.totalorder %v2630_v3, %v5213_v29  ;;  %vm2765_vm11 = vcmp.eq.s32.totalorder %v2627_v44, %v5213_v29  ;;  %v3367_v44 = vld [vmem:[%s6417_s21 + $0x10] sm:$0xff] }
 0x5e2   :  { %v4421_v28 = vpack.c.bf16 %v3368_v41, %v3367_v44 }
 0x5e4   :  { %4352 = vmatpush3.bf16.msk.msra.mxu1 %vm4351_vm1, %v6552_v50  ;;  %vm4359_vm1 = vmpackc.low %vm2746_vm7, %vm2745_vm14  ;;  %vm2750_vm7 = vcmp.eq.s32.totalorder %v2582_v1, %v5213_v29 }
 0x5e5   :  { %4354 = vmatprep.subr.msk.bf16.mxu1 %vm4353_vm4, %v6552_v50  ;;  %vm4361_vm4 = vmpackc.low %vm2764_vm10, %vm2763_vm13  ;;  %vm2749_vm10 = vcmp.eq.s32.totalorder %v2579_v8, %v5213_v29  ;;  %vm6605_vm13 = vnez %v6604_v16 }
 0x5e6   :  { %vm4367_vm14 = vmpackc.low %vm2750_vm7, %vm2749_vm10  ;;  %vm4728_vm7 = vmmov 0  }
 0x5e8   :  { %4356 = vmatpush3.bf16.msk.msra.mxu1 %vm4355_vm8, %v6552_v50  ;;  %vm4363_vm8 = vmpackc.low %vm2748_vm0, %vm2747_vm2  ;;  %vm6607_vm0 = vnez %v6606_v40 }
 0x5e9   :  { %4358 = vmatprep.subr.msk.bf16.mxu1 %vm4357_vm9, %v6552_v50  ;;  %vm4365_vm9 = vmpackc.low %vm2766_vm5, %vm2765_vm11  ;;  %vm2787_vm5 = vcmp.eq.s32.totalorder %v2693_v37, %v5213_v29  ;;  %vm2789_vm11 = vcmp.eq.s32.totalorder %v2699_v10, %v5213_v29 }
 0x5ec   :  { %4360 = vmatpush3.bf16.msk.msra.mxu1 %vm4359_vm1, %v6552_v50  ;;  %vm6603_vm1 = vnez %v6602_v61 }
 0x5ed   :  { %4362 = vmatprep.subr.msk.bf16.mxu1 %vm4361_vm4, %v6552_v50  ;;  %vm2788_vm4 = vcmp.eq.s32.totalorder %v2696_v18, %v5213_v29 }
 0x5ee   :  { %vm4400_vm2 = vmpackc.low %vm2788_vm4, %vm2787_vm5 }
 0x5f0   :  { %4364 = vmatpush3.bf16.msk.msra.mxu1 %vm4363_vm8, %v6552_v50  ;;  %vm2790_vm8 = vcmp.eq.s32.totalorder %v2702_v31, %v5213_v29 }
 0x5f1   :  { %4366 = vmatprep.subr.msk.bf16.mxu1 %vm4365_vm9, %v6552_v50  ;;  %vm4403_vm9 = vmpackc.low %vm2790_vm8, %vm2789_vm11 }
 0x5f4   :  { %4368 = vmatpush3.bf16.msk.msra.mxu1 %vm4367_vm14, %v6552_v50  ;;  %vm6608_vm14 = vcmask 261120  }
 0x5f5   :  { %4405 = vmatprep.subr.bf16.mxu1 %v4727_v21 }
 0x692   :  { %v2204_v54 = vpop.f32.mrb[36].mxu1 }
 0x693   :  { %v2206_v43 = vpop.f32.mrb[37].mxu1 }
 0x694   :  { %3042 = vmatprep.mubr.f32.mxu0 %v2206_v43 }
 0x695   :  { %3043 = vmatmul.mubr.f32.vlgmr.msra.gmra.mrb[30].mxu0 %v2204_v54 }
 0x696   :  { %4371 = vmatpush1.bf16.msk.msra.mxu0 %vm5469_vm6, %v6552_v50  ;;  %vm6597_vm6 = vnez %v6596_v9 }
 0x697   :  { %4372 = vmatprep.subr.bf16.mxu0 %v4727_v21 }
 0x69a   :  { %4374 = vmatpush1.bf16.msk.msra.mxu0 %vm5475_vm12, %v6552_v50  ;;  %vm2974_vm12 = vcmask 523264  }
 0x69b   :  { %4375 = vmatprep.subr.bf16.mxu0 %v4727_v21 }
 0x69e   :  { %4377 = vmatpush1.bf16.msk.msra.mxu0 %vm5483_vm15, %v6552_v50  ;;  %v2275_v59 = vpop.f32.mrb[38].mxu1  ;;  %vm6599_vm15 = vnez %v6598_v26 }
 0x69f   :  { %v2277_v52 = vpop.f32.mrb[39].mxu1  ;;  %4378 = vmatprep.subr.bf16.mxu0 %v4727_v21 }
 0x6a0   :  { %3112 = vmatprep.mubr.f32.mxu1 %v2277_v52 }
 0x6a1   :  { %3113 = vmatmul.mubr.f32.vlgmr.msra.gmra.mrb[42].mxu1 %v2275_v59 }
 0x6a2   :  { %4380 = vmatpush1.bf16.msk.msra.mxu0 %vm5501_vm3, %v6552_v50  ;;  %vm6601_vm3 = vnez %v6600_v15  ;;  %4407 = vmatpush3.bf16.msra.mxu1 %v4406_v32 }
 0x6a3   :  { %4381 = vmatprep.subr.bf16.mxu0 %v4727_v21  ;;  %4408 = vmatprep.subr.bf16.mxu1 %v4727_v21 }
 0x6a4   :  { %4082 = vmatprep.mubr.msk.f32.mxu1 %vm4728_vm7, %v6491_v60 }
 0x6a6   :  { %4383 = vmatpush1.bf16.msk.msra.mxu0 %vm6597_vm6, %v6552_v50  ;;  %4410 = vmatpush3.bf16.msra.mxu1 %v4409_v11 }
 0x6a7   :  { %4384 = vmatprep.subr.bf16.mxu0 %v4727_v21  ;;  %4411 = vmatprep.subr.bf16.mxu1 %v4727_v21 }
 0x6aa   :  { %4386 = vmatpush1.bf16.msk.msra.mxu0 %vm6599_vm15, %v6552_v50  ;;  %v2346_v24 = vpop.f32.mrb[40].mxu1 }
 0x6ab   :  { %4387 = vmatprep.subr.bf16.mxu0 %v4727_v21  ;;  %v2348_v12 = vpop.f32.mrb[41].mxu1 }
 0x6ac   :  { %3796 = vmatprep.mubr.msk.f32.mxu0 %vm2974_vm12, %v2348_v12  ;;  %vm6609_vm12 = vmmov %vm6608_vm14 }
 0x6ae   :  { %4389 = vmatpush1.bf16.msk.msra.mxu0 %vm6601_vm3, %v6552_v50  ;;  %vm6610_vm3 = vmmov %vm6609_vm12 }
 0x6af   :  { %4390 = vmatprep.subr.bf16.mxu0 %v4727_v21 }
 0x6b2   :  { %4392 = vmatpush1.bf16.msk.msra.mxu0 %vm6603_vm1, %v6552_v50  ;;  %vm3452_vm1 = vcmask 1024  }
 0x6b3   :  { %4393 = vmatprep.subr.bf16.mxu0 %v4727_v21 }
 0x6b6   :  { %4395 = vmatpush1.bf16.msk.msra.mxu0 %vm6605_vm13, %v6552_v50 }
 0x6b7   :  { %4396 = vmatprep.subr.bf16.mxu0 %v4727_v21 }
 0x6ba   :  { %4398 = vmatpush1.bf16.msk.msra.mxu0 %vm6607_vm0, %v6552_v50 }
 0x6bb   :  { %4399 = vmatprep.subr.bf16.mxu0 %v4727_v21 }
 0x6be   :  { %4401 = vmatpush1.bf16.msk.msra.mxu0 %vm4400_vm2, %v6552_v50 }
 0x6bf   :  { %4402 = vmatprep.subr.bf16.mxu0 %v4727_v21 }
 0x6c2   :  { %4404 = vmatpush1.bf16.msk.msra.mxu0 %vm4403_vm9, %v6552_v50 }
 0x6c5   :  { %3183 = vmatmul.mubr.f32.vlgmr.msra.gmra.mrb[32].mxu0 %v2346_v24 }
 0x768   :  { %v3902_v29 = vpop.f32.mrb[30].mxu0 }
 0x769   :  { %v3903_v63 = vpop.f32.mrb[31].mxu0 }
 0x76a   :  { %v3904_v50 = vadd.f32 %v3903_v63, %v3902_v29 }
 0x76c   :  { %v3045_v58 = vadd.f32 %v3904_v50, %v3707_v34 }
 0x774   :  { %v3937_v17 = vpop.f32.mrb[42].mxu1 }
 0x775   :  { %v3938_v23 = vpop.f32.mrb[43].mxu1 }
 0x776   :  { %v3939_v62 = vadd.f32 %v3938_v23, %v3937_v17 }
 0x778   :  { %v3115_v48 = vadd.f32 %v3939_v62, %v3045_v58 }
 0x798   :  { %v3184_v6 = vpop.f32.mrb[32].mxu0 }
 0x799   :  { %v3185_v46 = vadd.f32 %v3184_v6, %v3115_v48  ;;  %v3186_v5 = vpop.f32.mrb[33].mxu0 }
 0x79b   :  { %vm3188_vm10 = vcmp.gt.f32.partialorder %v3185_v46, 0.0  ;;  %v3189_v45 = vmul.f32 0.01, %v3185_v46 }
 0x79d   :  { %v3190_v47 = vsel %vm3188_vm10, %v3185_v46, %v3189_v45 }
 0x79e   :  { %4083 = vmatmul.mubr.msk.f32.vlgmr.msra.gmra.mrb[44].mxu1 %vm6608_vm14, %v3190_v47 }
 0x79f   :  { %4413 = vmatpush3.bf16.msra.mxu1 %v4412_v36  ;;  %4093 = vmatprep.mubr.msk.f32.mxu1 %vm4728_vm7, %v6491_v60 }
 0x7a0   :  { %4414 = vmatprep.subr.bf16.mxu1 %v4727_v21 }
 0x7a3   :  { %4416 = vmatpush3.bf16.msra.mxu1 %v4415_v20 }
 0x7a4   :  { %4417 = vmatprep.subr.bf16.mxu1 %v4727_v21 }
 0x871   :  { %v3271_v7 = vpop.f32.mrb[44].mxu1 }
 0x872   :  { %v3272_v55 = vadd.f32 %v3797_v25, %v3271_v7  ;;  %v4084_v27 = vpop.f32.mrb[45].mxu1 }
 0x874   :  { %vm3275_vm6 = vcmp.gt.f32.partialorder %v3272_v55, 0.0  ;;  %v3276_v3 = vmul.f32 0.01, %v3272_v55 }
 0x876   :  { %v3277_v33 = vsel %vm3275_vm6, %v3272_v55, %v3276_v3 }
 0x877   :  { %4094 = vmatmul.mubr.msk.f32.vlgmr.msra.gmra.mrb[46].mxu1 %vm6609_vm12, %v3277_v33 }
 0x878   :  { %4419 = vmatpush3.bf16.msra.mxu1 %v4418_v57  ;;  %4104 = vmatprep.mubr.msk.f32.mxu1 %vm4728_vm7, %v6491_v60  ;;  %v3801_v60 = vld [vmem:[#allocation2] ss:$0 sm:$0xff] }
 0x879   :  { %4420 = vmatprep.subr.bf16.mxu1 %v4727_v21 }
 0x87c   :  { %4422 = vmatpush3.bf16.msra.mxu1 %v4421_v28 }
 0x94a   :  { %v3358_v1 = vpop.f32.mrb[46].mxu1 }
 0x94b   :  { %v3359_v4 = vadd.f32 %v3799_v38, %v3358_v1  ;;  %v4095_v8 = vpop.f32.mrb[47].mxu1 }
 0x94d   :  { %vm3362_vm15 = vcmp.gt.f32.partialorder %v3359_v4, 0.0  ;;  %v3363_v54 = vmul.f32 0.01, %v3359_v4 }
 0x94f   :  { %v3364_v43 = vsel %vm3362_vm15, %v3359_v4, %v3363_v54 }
 0x950   :  { %4105 = vmatmul.mubr.msk.f32.vlgmr.msra.gmra.mrb[48].mxu1 %vm6610_vm3, %v3364_v43 }
 0xa23   :  { %v3445_v21 = vpop.f32.mrb[48].mxu1 }
 0xa24   :  { %v3446_v14 = vadd.f32 %v3801_v60, %v3445_v21  ;;  %v4106_v0 = vpop.f32.mrb[49].mxu1 }
 0xa26   :  { %4494 = vtanh.f32 %v3446_v14 }
 0xa30   :  { %v4495_v2 = vpop.eup %4494 }
 0xa31   :  { %v3450_v59 = vmul.f32 40.0, %v4495_v2 }
 0xa33   :  { %v3451_v52 = vadd.f32 50.0, %v3450_v59 }
 0xa35   :  { %3453 = vst.msk [vmem:[%s6419_s23] sm:$0x3] %vm3452_vm1, %v3451_v52 }
 0xa36   :  { %3458 = vsyncpa [#allocation4], 1 }
 0xa37   :  { %3459 = vsyncpa [#allocation6], 1 }
 0xa38   :  { %3460 = vsyncpa [#allocation9], 1 }
 0xa39   :  { %3461 = vsyncpa [#allocation12], 1 }
 0xa3a   :  { %3462 = vsyncpa [#allocation15], 1 }

</bundles_post_ra>
